<compile_context>
chip_gen: v7x
topology: tpu7x:2x2x1
jax: 0.10.0
libtpu: 0.0.40
codegen_flags: <defaults>
</compile_context>

<pallas_src>
import functools

import numpy as np
import jax
import jax.numpy as jnp
from jax.experimental import pallas as pl
from jax.experimental.pallas import tpu as pltpu


def _conv_in_lrelu_kernel(x_ref, w_ref, b_ref, mask_ref, o_ref, *,
                          kh, kw, wp, p_out, inv_count,
                          apply_norm, apply_act):
    """Direct stride-1 conv (in the effective layout) for ONE sample.

    x_ref    : (1, rows, C)      f32   flattened padded input (+ kw-1 zero rows)
    w_ref    : (kh*kw, C, OCp)   bf16  per-tap weight matrices, OCp % 128 == 0
    b_ref    : (1, OCp)          f32
    mask_ref : (p_out, 1)        f32   1.0 on valid output positions
    o_ref    : (1, p_out, OCp)   f32
    """
    ocp = w_ref.shape[-1]
    acc = jnp.zeros((p_out, ocp), jnp.float32)

    # kh*kw shifted windows -> one MXU matmul each (static unroll).
    for i in range(kh):
        for j in range(kw):
            start = i * wp + j
            win = x_ref[0, pl.ds(start, p_out), :].astype(jnp.bfloat16)
            acc = acc + jnp.dot(win, w_ref[i * kw + j],
                                preferred_element_type=jnp.float32)

    y = acc + b_ref[...]                      # f32 bias add, lane-dense

    if apply_norm:
        # InstanceNorm2d: per-(sample, channel) stats over the *valid*
        # spatial positions only (wrapped/garbage columns are masked out).
        mask = mask_ref[...]
        mean = jnp.sum(y * mask, axis=0, keepdims=True) * inv_count
        ctr = y - mean
        var = jnp.sum(jnp.square(ctr) * mask, axis=0, keepdims=True) * inv_count
        y = ctr * jax.lax.rsqrt(var + 1e-5)

    if apply_act:
        y = jnp.where(y >= 0, y, 0.2 * y)     # LeakyReLU(0.2)

    o_ref[0] = y.astype(o_ref.dtype)


def _round_up(x, m):
    return (x + m - 1) // m * m


def conv_block(x_nhwc, w_oihw, b, *, stride, apply_norm, apply_act):
    """One Downsample / conv layer (4x4 conv, pad=1) as a single pallas_call."""
    OC, CIN, KH, KW = w_oihw.shape            # KH = KW = 4
    N, H, W, _ = x_nhwc.shape
    pad = 1
    oh_t = (H + 2 * pad - KH) // stride + 1   # true PyTorch output size
    ow_t = (W + 2 * pad - KW) // stride + 1

    xp = jnp.pad(x_nhwc, ((0, 0), (pad, pad), (pad, pad), (0, 0)))

    if stride == 2:
        # Space-to-depth by 2: stride-2 4x4 conv -> stride-1 2x2 conv on 4*C ch.
        hp = xp.shape[1] + (xp.shape[1] % 2)      # pad to even (handles odd H/W)
        wpd = xp.shape[2] + (xp.shape[2] % 2)
        xp = jnp.pad(xp, ((0, 0), (0, hp - xp.shape[1]),
                          (0, wpd - xp.shape[2]), (0, 0)))
        hg, wg = hp // 2, wpd // 2
        xp = xp.reshape(N, hg, 2, wg, 2, CIN)
        xp = jnp.transpose(xp, (0, 1, 3, 2, 4, 5)).reshape(N, hg, wg, 4 * CIN)
        kh_e, kw_e, c_e = 2, 2, 4 * CIN
        # w[oc, c, 2*gi+dh, 2*gj+dw] -> w_eff[gi*2+gj, dh*2C + dw*C + c, oc]
        w_e = w_oihw.reshape(OC, CIN, 2, 2, 2, 2)       # (OC, C, gi, dh, gj, dw)
        w_e = jnp.transpose(w_e, (2, 4, 3, 5, 1, 0))    # (gi, gj, dh, dw, C, OC)
        w_e = w_e.reshape(kh_e * kw_e, c_e, OC)
        hh, ww = hg, wg
    else:
        kh_e, kw_e, c_e = KH, KW, CIN
        w_e = jnp.transpose(w_oihw, (2, 3, 1, 0)).reshape(KH * KW, CIN, OC)
        hh, ww = xp.shape[1], xp.shape[2]

    oh_f = hh - kh_e + 1                     # full output rows (incl. discarded)
    p_out = oh_f * ww
    rows = hh * ww + (kw_e - 1)

    # Flatten spatial dims (free row-major reshape) + kw-1 zero tail rows so
    # every shifted window of length p_out stays in bounds.
    x2d = xp.reshape(N, hh * ww, c_e)
    x2d = jnp.pad(x2d, ((0, 0), (0, kw_e - 1), (0, 0)))

    # Lane-dense output channels: pad OC up to a multiple of 128.
    ocp = _round_up(OC, 128)
    w_e = jnp.pad(w_e, ((0, 0), (0, 0), (0, ocp - OC))).astype(jnp.bfloat16)
    b_e = jnp.pad(jnp.asarray(b, jnp.float32), (0, ocp - OC)).reshape(1, ocp)

    # Static validity mask (excludes wrapped columns / extra rows) for IN stats.
    pidx = np.arange(p_out)
    valid = ((pidx % ww) < ow_t) & ((pidx // ww) < oh_t)
    mask = jnp.asarray(valid.astype(np.float32).reshape(p_out, 1))

    kernel = functools.partial(
        _conv_in_lrelu_kernel, kh=kh_e, kw=kw_e, wp=ww, p_out=p_out,
        inv_count=1.0 / float(oh_t * ow_t),
        apply_norm=apply_norm, apply_act=apply_act)

    # TODO(synk): for production sizes (filt=64, 256x256) add a P-tile grid
    # axis with a two-pass InstanceNorm to bound VMEM further, and fuse the
    # tiny stride-1 layers 4+5 into one pallas_call.
    out = pl.pallas_call(
        kernel,
        out_shape=jax.ShapeDtypeStruct((N, p_out, ocp), jnp.float32),
        grid=(N,),
        in_specs=[
            pl.BlockSpec((1, rows, c_e), lambda n: (n, 0, 0)),
            pl.BlockSpec((kh_e * kw_e, c_e, ocp), lambda n: (0, 0, 0)),
            pl.BlockSpec((1, ocp), lambda n: (0, 0)),
            pl.BlockSpec((p_out, 1), lambda n: (0, 0)),
        ],
        out_specs=pl.BlockSpec((1, p_out, ocp), lambda n: (n, 0, 0)),
        compiler_params=pltpu.CompilerParams(
            dimension_semantics=("parallel",),
            vmem_limit_bytes=32 * 1024 * 1024),
    )(x2d, w_e, b_e, mask)

    # Drop wrapped columns / extra rows / lane padding; back to NHWC.
    out = out.reshape(N, oh_f, ww, ocp)[:, :oh_t, :ow_t, :OC]
    return out


def init_params(key, filt=8):
    """Deterministic synthetic params. Conv2d(..., bias=truthy) -> all have bias."""
    specs = [
        (3, filt),              # Downsample 1 (no instance norm)
        (filt, filt * 2),       # Downsample 2
        (filt * 2, filt * 4),   # Downsample 3
        (filt * 4, filt * 8),   # Downsample 4 (stride 1)
        (filt * 8, 1),          # last conv
    ]
    params = []
    for cin, cout in specs:
        key, kw_, kb_ = jax.random.split(key, 3)
        w = jax.random.normal(kw_, (cout, cin, 4, 4), jnp.float32) * 0.05
        bb = jax.random.normal(kb_, (cout,), jnp.float32) * 0.05
        params.append((w, bb))
    return params


def cyclegan_discriminator(x_nchw, params):
    x = jnp.transpose(x_nchw, (0, 2, 3, 1))  # NCHW -> NHWC
    (w1, b1), (w2, b2), (w3, b3), (w4, b4), (w5, b5) = params
    # Downsample(3, F, k=4, s=2, p=1, no instance norm) + LeakyReLU(0.2)
    x = conv_block(x, w1, b1, stride=2, apply_norm=False, apply_act=True)
    # Downsample(F, 2F) + IN + LeakyReLU
    x = conv_block(x, w2, b2, stride=2, apply_norm=True, apply_act=True)
    # Downsample(2F, 4F) + IN + LeakyReLU
    x = conv_block(x, w3, b3, stride=2, apply_norm=True, apply_act=True)
    # Downsample(4F, 8F, stride=1) + IN + LeakyReLU
    x = conv_block(x, w4, b4, stride=1, apply_norm=True, apply_act=True)
    # last: Conv2d(8F, 1, k=4, s=1, p=1), no norm, no activation
    x = conv_block(x, w5, b5, stride=1, apply_norm=False, apply_act=False)
    return jnp.transpose(x, (0, 3, 1, 2))  # NHWC -> NCHW


if __name__ == "__main__":
    key = jax.random.PRNGKey(0)
    k_x, k_p = jax.random.split(key)

    FILT = 8  # small stand-in for the default filter=64
    x = jax.random.normal(k_x, (2, 3, 32, 32), jnp.float32)  # NCHW, like PyTorch
    params = init_params(k_p, filt=FILT)

    fwd = jax.jit(cyclegan_discriminator)
    out = jax.block_until_ready(fwd(x, params))

    # Spatial trace: 32 -> 16 -> 8 -> 4 -> 3 -> 2 ; channels -> 1
    assert out.shape == (2, 1, 2, 2), out.shape
    assert out.dtype == jnp.float32
    print("KERNEL_OK")
</pallas_src>

<mosaic_0001>
module attributes {stable_mosaic.version = 11 : i64} {
  func.func @_conv_in_lrelu_kernel(%arg0: i32, %arg1: memref<1x290x12xf32, #tpu.memory_space<vmem>>, %arg2: memref<4x12x128xbf16, #tpu.memory_space<vmem>>, %arg3: memref<1x128xf32, #tpu.memory_space<vmem>>, %arg4: memref<272x1xf32, #tpu.memory_space<vmem>>, %arg5: memref<1x272x128xf32, #tpu.memory_space<vmem>>) attributes {dimension_semantics = [#tpu.dimension_semantics<parallel>], iteration_bounds = array<i64: 2>, scalar_prefetch = 0 : i64, scratch_operands = 0 : i64, tpu.core_type = #tpu.core_type<tc>, window_params = [{transform_indices = @transform_0, window_bounds = array<i64: 1, 290, 12>}, {pipeline_mode = #tpu.pipeline_mode<synchronous>, transform_indices = @transform_1, window_bounds = array<i64: 4, 12, 128>}, {pipeline_mode = #tpu.pipeline_mode<synchronous>, transform_indices = @transform_2, window_bounds = array<i64: 1, 128>}, {pipeline_mode = #tpu.pipeline_mode<synchronous>, transform_indices = @transform_3, window_bounds = array<i64: 272, 1>}, {transform_indices = @transform_4, window_bounds = array<i64: 1, 272, 128>}]} {
    %cst = arith.constant 0.000000e+00 : f32
    %0 = vector.broadcast %cst : f32 to vector<272x128xf32>
    %c0 = arith.constant 0 : index
    %c0_0 = arith.constant 0 : index
    %c0_1 = arith.constant 0 : index
    %1 = vector.load %arg1[%c0, %c0_0, %c0_1] : memref<1x290x12xf32, #tpu.memory_space<vmem>>, vector<1x272x12xf32>
    %2 = vector.shape_cast %1 : vector<1x272x12xf32> to vector<272x12xf32>
    %3 = arith.truncf %2 : vector<272x12xf32> to vector<272x12xbf16>
    %c0_2 = arith.constant 0 : index
    %c0_3 = arith.constant 0 : index
    %c0_4 = arith.constant 0 : index
    %4 = vector.load %arg2[%c0_2, %c0_3, %c0_4] : memref<4x12x128xbf16, #tpu.memory_space<vmem>>, vector<1x12x128xbf16>
    %5 = vector.shape_cast %4 : vector<1x12x128xbf16> to vector<12x128xbf16>
    %cst_5 = arith.constant dense<0.000000e+00> : vector<272x128xf32>
    %6 = tpu.matmul %3, %5, %cst_5 {dimension_numbers = #tpu.dot_dimension_numbers<[1], [0], [0], [1], [0, 0, 1, 1], [], []>} : vector<272x12xbf16>, vector<12x128xbf16>, vector<272x128xf32> -> vector<272x128xf32>
    %7 = arith.addf %0, %6 : vector<272x128xf32>
    %c0_6 = arith.constant 0 : index
    %c1 = arith.constant 1 : index
    %c0_7 = arith.constant 0 : index
    %8 = vector.load %arg1[%c0_6, %c1, %c0_7] : memref<1x290x12xf32, #tpu.memory_space<vmem>>, vector<1x272x12xf32>
    %9 = vector.shape_cast %8 : vector<1x272x12xf32> to vector<272x12xf32>
    %10 = arith.truncf %9 : vector<272x12xf32> to vector<272x12xbf16>
    %c1_8 = arith.constant 1 : index
    %c0_9 = arith.constant 0 : index
    %c0_10 = arith.constant 0 : index
    %11 = vector.load %arg2[%c1_8, %c0_9, %c0_10] : memref<4x12x128xbf16, #tpu.memory_space<vmem>>, vector<1x12x128xbf16>
    %12 = vector.shape_cast %11 : vector<1x12x128xbf16> to vector<12x128xbf16>
    %cst_11 = arith.constant dense<0.000000e+00> : vector<272x128xf32>
    %13 = tpu.matmul %10, %12, %cst_11 {dimension_numbers = #tpu.dot_dimension_numbers<[1], [0], [0], [1], [0, 0, 1, 1], [], []>} : vector<272x12xbf16>, vector<12x128xbf16>, vector<272x128xf32> -> vector<272x128xf32>
    %14 = arith.addf %7, %13 : vector<272x128xf32>
    %c0_12 = arith.constant 0 : index
    %c17 = arith.constant 17 : index
    %c0_13 = arith.constant 0 : index
    %15 = vector.load %arg1[%c0_12, %c17, %c0_13] : memref<1x290x12xf32, #tpu.memory_space<vmem>>, vector<1x272x12xf32>
    %16 = vector.shape_cast %15 : vector<1x272x12xf32> to vector<272x12xf32>
    %17 = arith.truncf %16 : vector<272x12xf32> to vector<272x12xbf16>
    %c2 = arith.constant 2 : index
    %c0_14 = arith.constant 0 : index
    %c0_15 = arith.constant 0 : index
    %18 = vector.load %arg2[%c2, %c0_14, %c0_15] : memref<4x12x128xbf16, #tpu.memory_space<vmem>>, vector<1x12x128xbf16>
    %19 = vector.shape_cast %18 : vector<1x12x128xbf16> to vector<12x128xbf16>
    %cst_16 = arith.constant dense<0.000000e+00> : vector<272x128xf32>
    %20 = tpu.matmul %17, %19, %cst_16 {dimension_numbers = #tpu.dot_dimension_numbers<[1], [0], [0], [1], [0, 0, 1, 1], [], []>} : vector<272x12xbf16>, vector<12x128xbf16>, vector<272x128xf32> -> vector<272x128xf32>
    %21 = arith.addf %14, %20 : vector<272x128xf32>
    %c0_17 = arith.constant 0 : index
    %c18 = arith.constant 18 : index
    %c0_18 = arith.constant 0 : index
    %22 = vector.load %arg1[%c0_17, %c18, %c0_18] : memref<1x290x12xf32, #tpu.memory_space<vmem>>, vector<1x272x12xf32>
    %23 = vector.shape_cast %22 : vector<1x272x12xf32> to vector<272x12xf32>
    %24 = arith.truncf %23 : vector<272x12xf32> to vector<272x12xbf16>
    %c3 = arith.constant 3 : index
    %c0_19 = arith.constant 0 : index
    %c0_20 = arith.constant 0 : index
    %25 = vector.load %arg2[%c3, %c0_19, %c0_20] : memref<4x12x128xbf16, #tpu.memory_space<vmem>>, vector<1x12x128xbf16>
    %26 = vector.shape_cast %25 : vector<1x12x128xbf16> to vector<12x128xbf16>
    %cst_21 = arith.constant dense<0.000000e+00> : vector<272x128xf32>
    %27 = tpu.matmul %24, %26, %cst_21 {dimension_numbers = #tpu.dot_dimension_numbers<[1], [0], [0], [1], [0, 0, 1, 1], [], []>} : vector<272x12xbf16>, vector<12x128xbf16>, vector<272x128xf32> -> vector<272x128xf32>
    %28 = arith.addf %21, %27 : vector<272x128xf32>
    %c0_22 = arith.constant 0 : index
    %c0_23 = arith.constant 0 : index
    %29 = vector.load %arg3[%c0_22, %c0_23] : memref<1x128xf32, #tpu.memory_space<vmem>>, vector<1x128xf32>
    %30 = vector.broadcast %29 : vector<1x128xf32> to vector<272x128xf32>
    %31 = arith.addf %28, %30 : vector<272x128xf32>
    %cst_24 = arith.constant 0.000000e+00 : f32
    %32 = vector.broadcast %cst_24 : f32 to vector<272x128xf32>
    %33 = arith.cmpf oge, %31, %32 : vector<272x128xf32>
    %cst_25 = arith.constant 2.000000e-01 : f32
    %34 = vector.broadcast %cst_25 : f32 to vector<272x128xf32>
    %35 = arith.mulf %34, %31 : vector<272x128xf32>
    %36 = arith.select %33, %31, %35 : vector<272x128xi1>, vector<272x128xf32>
    %c0_26 = arith.constant 0 : index
    %c0_27 = arith.constant 0 : index
    %c0_28 = arith.constant 0 : index
    %37 = vector.load %arg5[%c0_26, %c0_27, %c0_28] : memref<1x272x128xf32, #tpu.memory_space<vmem>>, vector<1x272x128xf32>
    %38 = vector.shape_cast %37 : vector<1x272x128xf32> to vector<272x128xf32>
    %39 = vector.shape_cast %36 : vector<272x128xf32> to vector<1x272x128xf32>
    tpu.vector_store %arg5[%c0_26, %c0_27, %c0_28], %39 {strides = array<i32>} : memref<1x272x128xf32, #tpu.memory_space<vmem>>, vector<1x272x128xf32>,
    return
  }
  func.func @transform_0(%arg0: i32) -> (i32, i32, i32) {
    %c0_i32 = arith.constant 0 : i32
    %c0_i32_0 = arith.constant 0 : i32
    %c0_i32_1 = arith.constant 0 : i32
    return %arg0, %c0_i32, %c0_i32_0 : i32, i32, i32
  }
  func.func @transform_1(%arg0: i32) -> (i32, i32, i32) {
    %c0_i32 = arith.constant 0 : i32
    %c0_i32_0 = arith.constant 0 : i32
    %c0_i32_1 = arith.constant 0 : i32
    %c0_i32_2 = arith.constant 0 : i32
    return %c0_i32, %c0_i32_0, %c0_i32_1 : i32, i32, i32
  }
  func.func @transform_2(%arg0: i32) -> (i32, i32) {
    %c0_i32 = arith.constant 0 : i32
    %c0_i32_0 = arith.constant 0 : i32
    %c0_i32_1 = arith.constant 0 : i32
    return %c0_i32, %c0_i32_0 : i32, i32
  }
  func.func @transform_3(%arg0: i32) -> (i32, i32) {
    %c0_i32 = arith.constant 0 : i32
    %c0_i32_0 = arith.constant 0 : i32
    %c0_i32_1 = arith.constant 0 : i32
    return %c0_i32, %c0_i32_0 : i32, i32
  }
  func.func @transform_4(%arg0: i32) -> (i32, i32, i32) {
    %c0_i32 = arith.constant 0 : i32
    %c0_i32_0 = arith.constant 0 : i32
    %c0_i32_1 = arith.constant 0 : i32
    return %arg0, %c0_i32, %c0_i32_0 : i32, i32, i32
  }
}

module attributes {stable_mosaic.version = 11 : i64} {
  func.func @_conv_in_lrelu_kernel(%arg0: i32, %arg1: memref<1x82x32xf32, #tpu.memory_space<vmem>>, %arg2: memref<4x32x128xbf16, #tpu.memory_space<vmem>>, %arg3: memref<1x128xf32, #tpu.memory_space<vmem>>, %arg4: memref<72x1xf32, #tpu.memory_space<vmem>>, %arg5: memref<1x72x128xf32, #tpu.memory_space<vmem>>) attributes {dimension_semantics = [#tpu.dimension_semantics<parallel>], iteration_bounds = array<i64: 2>, scalar_prefetch = 0 : i64, scratch_operands = 0 : i64, tpu.core_type = #tpu.core_type<tc>, window_params = [{transform_indices = @transform_0, window_bounds = array<i64: 1, 82, 32>}, {pipeline_mode = #tpu.pipeline_mode<synchronous>, transform_indices = @transform_1, window_bounds = array<i64: 4, 32, 128>}, {pipeline_mode = #tpu.pipeline_mode<synchronous>, transform_indices = @transform_2, window_bounds = array<i64: 1, 128>}, {pipeline_mode = #tpu.pipeline_mode<synchronous>, transform_indices = @transform_3, window_bounds = array<i64: 72, 1>}, {transform_indices = @transform_4, window_bounds = array<i64: 1, 72, 128>}]} {
    %cst = arith.constant 0.000000e+00 : f32
    %0 = vector.broadcast %cst : f32 to vector<72x128xf32>
    %c0 = arith.constant 0 : index
    %c0_0 = arith.constant 0 : index
    %c0_1 = arith.constant 0 : index
    %1 = vector.load %arg1[%c0, %c0_0, %c0_1] : memref<1x82x32xf32, #tpu.memory_space<vmem>>, vector<1x72x32xf32>
    %2 = vector.shape_cast %1 : vector<1x72x32xf32> to vector<72x32xf32>
    %3 = arith.truncf %2 : vector<72x32xf32> to vector<72x32xbf16>
    %c0_2 = arith.constant 0 : index
    %c0_3 = arith.constant 0 : index
    %c0_4 = arith.constant 0 : index
    %4 = vector.load %arg2[%c0_2, %c0_3, %c0_4] : memref<4x32x128xbf16, #tpu.memory_space<vmem>>, vector<1x32x128xbf16>
    %5 = vector.shape_cast %4 : vector<1x32x128xbf16> to vector<32x128xbf16>
    %cst_5 = arith.constant dense<0.000000e+00> : vector<72x128xf32>
    %6 = tpu.matmul %3, %5, %cst_5 {dimension_numbers = #tpu.dot_dimension_numbers<[1], [0], [0], [1], [0, 0, 1, 1], [], []>} : vector<72x32xbf16>, vector<32x128xbf16>, vector<72x128xf32> -> vector<72x128xf32>
    %7 = arith.addf %0, %6 : vector<72x128xf32>
    %c0_6 = arith.constant 0 : index
    %c1 = arith.constant 1 : index
    %c0_7 = arith.constant 0 : index
    %8 = vector.load %arg1[%c0_6, %c1, %c0_7] : memref<1x82x32xf32, #tpu.memory_space<vmem>>, vector<1x72x32xf32>
    %9 = vector.shape_cast %8 : vector<1x72x32xf32> to vector<72x32xf32>
    %10 = arith.truncf %9 : vector<72x32xf32> to vector<72x32xbf16>
    %c1_8 = arith.constant 1 : index
    %c0_9 = arith.constant 0 : index
    %c0_10 = arith.constant 0 : index
    %11 = vector.load %arg2[%c1_8, %c0_9, %c0_10] : memref<4x32x128xbf16, #tpu.memory_space<vmem>>, vector<1x32x128xbf16>
    %12 = vector.shape_cast %11 : vector<1x32x128xbf16> to vector<32x128xbf16>
    %cst_11 = arith.constant dense<0.000000e+00> : vector<72x128xf32>
    %13 = tpu.matmul %10, %12, %cst_11 {dimension_numbers = #tpu.dot_dimension_numbers<[1], [0], [0], [1], [0, 0, 1, 1], [], []>} : vector<72x32xbf16>, vector<32x128xbf16>, vector<72x128xf32> -> vector<72x128xf32>
    %14 = arith.addf %7, %13 : vector<72x128xf32>
    %c0_12 = arith.constant 0 : index
    %c9 = arith.constant 9 : index
    %c0_13 = arith.constant 0 : index
    %15 = vector.load %arg1[%c0_12, %c9, %c0_13] : memref<1x82x32xf32, #tpu.memory_space<vmem>>, vector<1x72x32xf32>
    %16 = vector.shape_cast %15 : vector<1x72x32xf32> to vector<72x32xf32>
    %17 = arith.truncf %16 : vector<72x32xf32> to vector<72x32xbf16>
    %c2 = arith.constant 2 : index
    %c0_14 = arith.constant 0 : index
    %c0_15 = arith.constant 0 : index
    %18 = vector.load %arg2[%c2, %c0_14, %c0_15] : memref<4x32x128xbf16, #tpu.memory_space<vmem>>, vector<1x32x128xbf16>
    %19 = vector.shape_cast %18 : vector<1x32x128xbf16> to vector<32x128xbf16>
    %cst_16 = arith.constant dense<0.000000e+00> : vector<72x128xf32>
    %20 = tpu.matmul %17, %19, %cst_16 {dimension_numbers = #tpu.dot_dimension_numbers<[1], [0], [0], [1], [0, 0, 1, 1], [], []>} : vector<72x32xbf16>, vector<32x128xbf16>, vector<72x128xf32> -> vector<72x128xf32>
    %21 = arith.addf %14, %20 : vector<72x128xf32>
    %c0_17 = arith.constant 0 : index
    %c10 = arith.constant 10 : index
    %c0_18 = arith.constant 0 : index
    %22 = vector.load %arg1[%c0_17, %c10, %c0_18] : memref<1x82x32xf32, #tpu.memory_space<vmem>>, vector<1x72x32xf32>
    %23 = vector.shape_cast %22 : vector<1x72x32xf32> to vector<72x32xf32>
    %24 = arith.truncf %23 : vector<72x32xf32> to vector<72x32xbf16>
    %c3 = arith.constant 3 : index
    %c0_19 = arith.constant 0 : index
    %c0_20 = arith.constant 0 : index
    %25 = vector.load %arg2[%c3, %c0_19, %c0_20] : memref<4x32x128xbf16, #tpu.memory_space<vmem>>, vector<1x32x128xbf16>
    %26 = vector.shape_cast %25 : vector<1x32x128xbf16> to vector<32x128xbf16>
    %cst_21 = arith.constant dense<0.000000e+00> : vector<72x128xf32>
    %27 = tpu.matmul %24, %26, %cst_21 {dimension_numbers = #tpu.dot_dimension_numbers<[1], [0], [0], [1], [0, 0, 1, 1], [], []>} : vector<72x32xbf16>, vector<32x128xbf16>, vector<72x128xf32> -> vector<72x128xf32>
    %28 = arith.addf %21, %27 : vector<72x128xf32>
    %c0_22 = arith.constant 0 : index
    %c0_23 = arith.constant 0 : index
    %29 = vector.load %arg3[%c0_22, %c0_23] : memref<1x128xf32, #tpu.memory_space<vmem>>, vector<1x128xf32>
    %30 = vector.broadcast %29 : vector<1x128xf32> to vector<72x128xf32>
    %31 = arith.addf %28, %30 : vector<72x128xf32>
    %c0_24 = arith.constant 0 : index
    %c0_25 = arith.constant 0 : index
    %32 = vector.load %arg4[%c0_24, %c0_25] : memref<72x1xf32, #tpu.memory_space<vmem>>, vector<72x1xf32>
    %33 = vector.broadcast %32 : vector<72x1xf32> to vector<72x128xf32>
    %34 = arith.mulf %31, %33 : vector<72x128xf32>
    %cst_26 = arith.constant dense<0.000000e+00> : vector<128xf32>
    %35 = vector.multi_reduction <add>, %34, %cst_26 [0] : vector<72x128xf32> to vector<128xf32>
    %36 = vector.shape_cast %35 : vector<128xf32> to vector<1x128xf32>
    %cst_27 = arith.constant 1.562500e-02 : f32
    %37 = vector.broadcast %cst_27 : f32 to vector<1x128xf32>
    %38 = arith.mulf %36, %37 : vector<1x128xf32>
    %39 = vector.broadcast %38 : vector<1x128xf32> to vector<72x128xf32>
    %40 = arith.subf %31, %39 : vector<72x128xf32>
    %41 = arith.mulf %40, %40 : vector<72x128xf32>
    %42 = vector.broadcast %32 : vector<72x1xf32> to vector<72x128xf32>
    %43 = arith.mulf %41, %42 : vector<72x128xf32>
    %cst_28 = arith.constant dense<0.000000e+00> : vector<128xf32>
    %44 = vector.multi_reduction <add>, %43, %cst_28 [0] : vector<72x128xf32> to vector<128xf32>
    %45 = vector.shape_cast %44 : vector<128xf32> to vector<1x128xf32>
    %cst_29 = arith.constant 1.562500e-02 : f32
    %46 = vector.broadcast %cst_29 : f32 to vector<1x128xf32>
    %47 = arith.mulf %45, %46 : vector<1x128xf32>
    %cst_30 = arith.constant 9.99999974E-6 : f32
    %48 = vector.broadcast %cst_30 : f32 to vector<1x128xf32>
    %49 = arith.addf %47, %48 : vector<1x128xf32>
    %50 = math.rsqrt %49 : vector<1x128xf32>
    %51 = vector.broadcast %50 : vector<1x128xf32> to vector<72x128xf32>
    %52 = arith.mulf %40, %51 : vector<72x128xf32>
    %cst_31 = arith.constant 0.000000e+00 : f32
    %53 = vector.broadcast %cst_31 : f32 to vector<72x128xf32>
    %54 = arith.cmpf oge, %52, %53 : vector<72x128xf32>
    %cst_32 = arith.constant 2.000000e-01 : f32
    %55 = vector.broadcast %cst_32 : f32 to vector<72x128xf32>
    %56 = arith.mulf %55, %52 : vector<72x128xf32>
    %57 = arith.select %54, %52, %56 : vector<72x128xi1>, vector<72x128xf32>
    %c0_33 = arith.constant 0 : index
    %c0_34 = arith.constant 0 : index
    %c0_35 = arith.constant 0 : index
    %58 = vector.load %arg5[%c0_33, %c0_34, %c0_35] : memref<1x72x128xf32, #tpu.memory_space<vmem>>, vector<1x72x128xf32>
    %59 = vector.shape_cast %58 : vector<1x72x128xf32> to vector<72x128xf32>
    %60 = vector.shape_cast %57 : vector<72x128xf32> to vector<1x72x128xf32>
    tpu.vector_store %arg5[%c0_33, %c0_34, %c0_35], %60 {strides = array<i32>} : memref<1x72x128xf32, #tpu.memory_space<vmem>>, vector<1x72x128xf32>,
    return
  }
  func.func @transform_0(%arg0: i32) -> (i32, i32, i32) {
    %c0_i32 = arith.constant 0 : i32
    %c0_i32_0 = arith.constant 0 : i32
    %c0_i32_1 = arith.constant 0 : i32
    return %arg0, %c0_i32, %c0_i32_0 : i32, i32, i32
  }
  func.func @transform_1(%arg0: i32) -> (i32, i32, i32) {
    %c0_i32 = arith.constant 0 : i32
    %c0_i32_0 = arith.constant 0 : i32
    %c0_i32_1 = arith.constant 0 : i32
    %c0_i32_2 = arith.constant 0 : i32
    return %c0_i32, %c0_i32_0, %c0_i32_1 : i32, i32, i32
  }
  func.func @transform_2(%arg0: i32) -> (i32, i32) {
    %c0_i32 = arith.constant 0 : i32
    %c0_i32_0 = arith.constant 0 : i32
    %c0_i32_1 = arith.constant 0 : i32
    return %c0_i32, %c0_i32_0 : i32, i32
  }
  func.func @transform_3(%arg0: i32) -> (i32, i32) {
    %c0_i32 = arith.constant 0 : i32
    %c0_i32_0 = arith.constant 0 : i32
    %c0_i32_1 = arith.constant 0 : i32
    return %c0_i32, %c0_i32_0 : i32, i32
  }
  func.func @transform_4(%arg0: i32) -> (i32, i32, i32) {
    %c0_i32 = arith.constant 0 : i32
    %c0_i32_0 = arith.constant 0 : i32
    %c0_i32_1 = arith.constant 0 : i32
    return %arg0, %c0_i32, %c0_i32_0 : i32, i32, i32
  }
}

module attributes {stable_mosaic.version = 11 : i64} {
  func.func @_conv_in_lrelu_kernel(%arg0: i32, %arg1: memref<1x26x64xf32, #tpu.memory_space<vmem>>, %arg2: memref<4x64x128xbf16, #tpu.memory_space<vmem>>, %arg3: memref<1x128xf32, #tpu.memory_space<vmem>>, %arg4: memref<20x1xf32, #tpu.memory_space<vmem>>, %arg5: memref<1x20x128xf32, #tpu.memory_space<vmem>>) attributes {dimension_semantics = [#tpu.dimension_semantics<parallel>], iteration_bounds = array<i64: 2>, scalar_prefetch = 0 : i64, scratch_operands = 0 : i64, tpu.core_type = #tpu.core_type<tc>, window_params = [{transform_indices = @transform_0, window_bounds = array<i64: 1, 26, 64>}, {pipeline_mode = #tpu.pipeline_mode<synchronous>, transform_indices = @transform_1, window_bounds = array<i64: 4, 64, 128>}, {pipeline_mode = #tpu.pipeline_mode<synchronous>, transform_indices = @transform_2, window_bounds = array<i64: 1, 128>}, {pipeline_mode = #tpu.pipeline_mode<synchronous>, transform_indices = @transform_3, window_bounds = array<i64: 20, 1>}, {transform_indices = @transform_4, window_bounds = array<i64: 1, 20, 128>}]} {
    %cst = arith.constant 0.000000e+00 : f32
    %0 = vector.broadcast %cst : f32 to vector<20x128xf32>
    %c0 = arith.constant 0 : index
    %c0_0 = arith.constant 0 : index
    %c0_1 = arith.constant 0 : index
    %1 = vector.load %arg1[%c0, %c0_0, %c0_1] : memref<1x26x64xf32, #tpu.memory_space<vmem>>, vector<1x20x64xf32>
    %2 = vector.shape_cast %1 : vector<1x20x64xf32> to vector<20x64xf32>
    %3 = arith.truncf %2 : vector<20x64xf32> to vector<20x64xbf16>
    %c0_2 = arith.constant 0 : index
    %c0_3 = arith.constant 0 : index
    %c0_4 = arith.constant 0 : index
    %4 = vector.load %arg2[%c0_2, %c0_3, %c0_4] : memref<4x64x128xbf16, #tpu.memory_space<vmem>>, vector<1x64x128xbf16>
    %5 = vector.shape_cast %4 : vector<1x64x128xbf16> to vector<64x128xbf16>
    %cst_5 = arith.constant dense<0.000000e+00> : vector<20x128xf32>
    %6 = tpu.matmul %3, %5, %cst_5 {dimension_numbers = #tpu.dot_dimension_numbers<[1], [0], [0], [1], [0, 0, 1, 1], [], []>} : vector<20x64xbf16>, vector<64x128xbf16>, vector<20x128xf32> -> vector<20x128xf32>
    %7 = arith.addf %0, %6 : vector<20x128xf32>
    %c0_6 = arith.constant 0 : index
    %c1 = arith.constant 1 : index
    %c0_7 = arith.constant 0 : index
    %8 = vector.load %arg1[%c0_6, %c1, %c0_7] : memref<1x26x64xf32, #tpu.memory_space<vmem>>, vector<1x20x64xf32>
    %9 = vector.shape_cast %8 : vector<1x20x64xf32> to vector<20x64xf32>
    %10 = arith.truncf %9 : vector<20x64xf32> to vector<20x64xbf16>
    %c1_8 = arith.constant 1 : index
    %c0_9 = arith.constant 0 : index
    %c0_10 = arith.constant 0 : index
    %11 = vector.load %arg2[%c1_8, %c0_9, %c0_10] : memref<4x64x128xbf16, #tpu.memory_space<vmem>>, vector<1x64x128xbf16>
    %12 = vector.shape_cast %11 : vector<1x64x128xbf16> to vector<64x128xbf16>
    %cst_11 = arith.constant dense<0.000000e+00> : vector<20x128xf32>
    %13 = tpu.matmul %10, %12, %cst_11 {dimension_numbers = #tpu.dot_dimension_numbers<[1], [0], [0], [1], [0, 0, 1, 1], [], []>} : vector<20x64xbf16>, vector<64x128xbf16>, vector<20x128xf32> -> vector<20x128xf32>
    %14 = arith.addf %7, %13 : vector<20x128xf32>
    %c0_12 = arith.constant 0 : index
    %c5 = arith.constant 5 : index
    %c0_13 = arith.constant 0 : index
    %15 = vector.load %arg1[%c0_12, %c5, %c0_13] : memref<1x26x64xf32, #tpu.memory_space<vmem>>, vector<1x20x64xf32>
    %16 = vector.shape_cast %15 : vector<1x20x64xf32> to vector<20x64xf32>
    %17 = arith.truncf %16 : vector<20x64xf32> to vector<20x64xbf16>
    %c2 = arith.constant 2 : index
    %c0_14 = arith.constant 0 : index
    %c0_15 = arith.constant 0 : index
    %18 = vector.load %arg2[%c2, %c0_14, %c0_15] : memref<4x64x128xbf16, #tpu.memory_space<vmem>>, vector<1x64x128xbf16>
    %19 = vector.shape_cast %18 : vector<1x64x128xbf16> to vector<64x128xbf16>
    %cst_16 = arith.constant dense<0.000000e+00> : vector<20x128xf32>
    %20 = tpu.matmul %17, %19, %cst_16 {dimension_numbers = #tpu.dot_dimension_numbers<[1], [0], [0], [1], [0, 0, 1, 1], [], []>} : vector<20x64xbf16>, vector<64x128xbf16>, vector<20x128xf32> -> vector<20x128xf32>
    %21 = arith.addf %14, %20 : vector<20x128xf32>
    %c0_17 = arith.constant 0 : index
    %c6 = arith.constant 6 : index
    %c0_18 = arith.constant 0 : index
    %22 = vector.load %arg1[%c0_17, %c6, %c0_18] : memref<1x26x64xf32, #tpu.memory_space<vmem>>, vector<1x20x64xf32>
    %23 = vector.shape_cast %22 : vector<1x20x64xf32> to vector<20x64xf32>
    %24 = arith.truncf %23 : vector<20x64xf32> to vector<20x64xbf16>
    %c3 = arith.constant 3 : index
    %c0_19 = arith.constant 0 : index
    %c0_20 = arith.constant 0 : index
    %25 = vector.load %arg2[%c3, %c0_19, %c0_20] : memref<4x64x128xbf16, #tpu.memory_space<vmem>>, vector<1x64x128xbf16>
    %26 = vector.shape_cast %25 : vector<1x64x128xbf16> to vector<64x128xbf16>
    %cst_21 = arith.constant dense<0.000000e+00> : vector<20x128xf32>
    %27 = tpu.matmul %24, %26, %cst_21 {dimension_numbers = #tpu.dot_dimension_numbers<[1], [0], [0], [1], [0, 0, 1, 1], [], []>} : vector<20x64xbf16>, vector<64x128xbf16>, vector<20x128xf32> -> vector<20x128xf32>
    %28 = arith.addf %21, %27 : vector<20x128xf32>
    %c0_22 = arith.constant 0 : index
    %c0_23 = arith.constant 0 : index
    %29 = vector.load %arg3[%c0_22, %c0_23] : memref<1x128xf32, #tpu.memory_space<vmem>>, vector<1x128xf32>
    %30 = vector.broadcast %29 : vector<1x128xf32> to vector<20x128xf32>
    %31 = arith.addf %28, %30 : vector<20x128xf32>
    %c0_24 = arith.constant 0 : index
    %c0_25 = arith.constant 0 : index
    %32 = vector.load %arg4[%c0_24, %c0_25] : memref<20x1xf32, #tpu.memory_space<vmem>>, vector<20x1xf32>
    %33 = vector.broadcast %32 : vector<20x1xf32> to vector<20x128xf32>
    %34 = arith.mulf %31, %33 : vector<20x128xf32>
    %cst_26 = arith.constant dense<0.000000e+00> : vector<128xf32>
    %35 = vector.multi_reduction <add>, %34, %cst_26 [0] : vector<20x128xf32> to vector<128xf32>
    %36 = vector.shape_cast %35 : vector<128xf32> to vector<1x128xf32>
    %cst_27 = arith.constant 6.250000e-02 : f32
    %37 = vector.broadcast %cst_27 : f32 to vector<1x128xf32>
    %38 = arith.mulf %36, %37 : vector<1x128xf32>
    %39 = vector.broadcast %38 : vector<1x128xf32> to vector<20x128xf32>
    %40 = arith.subf %31, %39 : vector<20x128xf32>
    %41 = arith.mulf %40, %40 : vector<20x128xf32>
    %42 = vector.broadcast %32 : vector<20x1xf32> to vector<20x128xf32>
    %43 = arith.mulf %41, %42 : vector<20x128xf32>
    %cst_28 = arith.constant dense<0.000000e+00> : vector<128xf32>
    %44 = vector.multi_reduction <add>, %43, %cst_28 [0] : vector<20x128xf32> to vector<128xf32>
    %45 = vector.shape_cast %44 : vector<128xf32> to vector<1x128xf32>
    %cst_29 = arith.constant 6.250000e-02 : f32
    %46 = vector.broadcast %cst_29 : f32 to vector<1x128xf32>
    %47 = arith.mulf %45, %46 : vector<1x128xf32>
    %cst_30 = arith.constant 9.99999974E-6 : f32
    %48 = vector.broadcast %cst_30 : f32 to vector<1x128xf32>
    %49 = arith.addf %47, %48 : vector<1x128xf32>
    %50 = math.rsqrt %49 : vector<1x128xf32>
    %51 = vector.broadcast %50 : vector<1x128xf32> to vector<20x128xf32>
    %52 = arith.mulf %40, %51 : vector<20x128xf32>
    %cst_31 = arith.constant 0.000000e+00 : f32
    %53 = vector.broadcast %cst_31 : f32 to vector<20x128xf32>
    %54 = arith.cmpf oge, %52, %53 : vector<20x128xf32>
    %cst_32 = arith.constant 2.000000e-01 : f32
    %55 = vector.broadcast %cst_32 : f32 to vector<20x128xf32>
    %56 = arith.mulf %55, %52 : vector<20x128xf32>
    %57 = arith.select %54, %52, %56 : vector<20x128xi1>, vector<20x128xf32>
    %c0_33 = arith.constant 0 : index
    %c0_34 = arith.constant 0 : index
    %c0_35 = arith.constant 0 : index
    %58 = vector.load %arg5[%c0_33, %c0_34, %c0_35] : memref<1x20x128xf32, #tpu.memory_space<vmem>>, vector<1x20x128xf32>
    %59 = vector.shape_cast %58 : vector<1x20x128xf32> to vector<20x128xf32>
    %60 = vector.shape_cast %57 : vector<20x128xf32> to vector<1x20x128xf32>
    tpu.vector_store %arg5[%c0_33, %c0_34, %c0_35], %60 {strides = array<i32>} : memref<1x20x128xf32, #tpu.memory_space<vmem>>, vector<1x20x128xf32>,
    return
  }
  func.func @transform_0(%arg0: i32) -> (i32, i32, i32) {
    %c0_i32 = arith.constant 0 : i32
    %c0_i32_0 = arith.constant 0 : i32
    %c0_i32_1 = arith.constant 0 : i32
    return %arg0, %c0_i32, %c0_i32_0 : i32, i32, i32
  }
  func.func @transform_1(%arg0: i32) -> (i32, i32, i32) {
    %c0_i32 = arith.constant 0 : i32
    %c0_i32_0 = arith.constant 0 : i32
    %c0_i32_1 = arith.constant 0 : i32
    %c0_i32_2 = arith.constant 0 : i32
    return %c0_i32, %c0_i32_0, %c0_i32_1 : i32, i32, i32
  }
  func.func @transform_2(%arg0: i32) -> (i32, i32) {
    %c0_i32 = arith.constant 0 : i32
    %c0_i32_0 = arith.constant 0 : i32
    %c0_i32_1 = arith.constant 0 : i32
    return %c0_i32, %c0_i32_0 : i32, i32
  }
  func.func @transform_3(%arg0: i32) -> (i32, i32) {
    %c0_i32 = arith.constant 0 : i32
    %c0_i32_0 = arith.constant 0 : i32
    %c0_i32_1 = arith.constant 0 : i32
    return %c0_i32, %c0_i32_0 : i32, i32
  }
  func.func @transform_4(%arg0: i32) -> (i32, i32, i32) {
    %c0_i32 = arith.constant 0 : i32
    %c0_i32_0 = arith.constant 0 : i32
    %c0_i32_1 = arith.constant 0 : i32
    return %arg0, %c0_i32, %c0_i32_0 : i32, i32, i32
  }
}

module attributes {stable_mosaic.version = 11 : i64} {
  func.func @_conv_in_lrelu_kernel(%arg0: i32, %arg1: memref<1x39x32xf32, #tpu.memory_space<vmem>>, %arg2: memref<16x32x128xbf16, #tpu.memory_space<vmem>>, %arg3: memref<1x128xf32, #tpu.memory_space<vmem>>, %arg4: memref<18x1xf32, #tpu.memory_space<vmem>>, %arg5: memref<1x18x128xf32, #tpu.memory_space<vmem>>) attributes {dimension_semantics = [#tpu.dimension_semantics<parallel>], iteration_bounds = array<i64: 2>, scalar_prefetch = 0 : i64, scratch_operands = 0 : i64, tpu.core_type = #tpu.core_type<tc>, window_params = [{transform_indices = @transform_0, window_bounds = array<i64: 1, 39, 32>}, {pipeline_mode = #tpu.pipeline_mode<synchronous>, transform_indices = @transform_1, window_bounds = array<i64: 16, 32, 128>}, {pipeline_mode = #tpu.pipeline_mode<synchronous>, transform_indices = @transform_2, window_bounds = array<i64: 1, 128>}, {pipeline_mode = #tpu.pipeline_mode<synchronous>, transform_indices = @transform_3, window_bounds = array<i64: 18, 1>}, {transform_indices = @transform_4, window_bounds = array<i64: 1, 18, 128>}]} {
    %cst = arith.constant 0.000000e+00 : f32
    %0 = vector.broadcast %cst : f32 to vector<18x128xf32>
    %c0 = arith.constant 0 : index
    %c0_0 = arith.constant 0 : index
    %c0_1 = arith.constant 0 : index
    %1 = vector.load %arg1[%c0, %c0_0, %c0_1] : memref<1x39x32xf32, #tpu.memory_space<vmem>>, vector<1x18x32xf32>
    %2 = vector.shape_cast %1 : vector<1x18x32xf32> to vector<18x32xf32>
    %3 = arith.truncf %2 : vector<18x32xf32> to vector<18x32xbf16>
    %c0_2 = arith.constant 0 : index
    %c0_3 = arith.constant 0 : index
    %c0_4 = arith.constant 0 : index
    %4 = vector.load %arg2[%c0_2, %c0_3, %c0_4] : memref<16x32x128xbf16, #tpu.memory_space<vmem>>, vector<1x32x128xbf16>
    %5 = vector.shape_cast %4 : vector<1x32x128xbf16> to vector<32x128xbf16>
    %cst_5 = arith.constant dense<0.000000e+00> : vector<18x128xf32>
    %6 = tpu.matmul %3, %5, %cst_5 {dimension_numbers = #tpu.dot_dimension_numbers<[1], [0], [0], [1], [0, 0, 1, 1], [], []>} : vector<18x32xbf16>, vector<32x128xbf16>, vector<18x128xf32> -> vector<18x128xf32>
    %7 = arith.addf %0, %6 : vector<18x128xf32>
    %c0_6 = arith.constant 0 : index
    %c1 = arith.constant 1 : index
    %c0_7 = arith.constant 0 : index
    %8 = vector.load %arg1[%c0_6, %c1, %c0_7] : memref<1x39x32xf32, #tpu.memory_space<vmem>>, vector<1x18x32xf32>
    %9 = vector.shape_cast %8 : vector<1x18x32xf32> to vector<18x32xf32>
    %10 = arith.truncf %9 : vector<18x32xf32> to vector<18x32xbf16>
    %c1_8 = arith.constant 1 : index
    %c0_9 = arith.constant 0 : index
    %c0_10 = arith.constant 0 : index
    %11 = vector.load %arg2[%c1_8, %c0_9, %c0_10] : memref<16x32x128xbf16, #tpu.memory_space<vmem>>, vector<1x32x128xbf16>
    %12 = vector.shape_cast %11 : vector<1x32x128xbf16> to vector<32x128xbf16>
    %cst_11 = arith.constant dense<0.000000e+00> : vector<18x128xf32>
    %13 = tpu.matmul %10, %12, %cst_11 {dimension_numbers = #tpu.dot_dimension_numbers<[1], [0], [0], [1], [0, 0, 1, 1], [], []>} : vector<18x32xbf16>, vector<32x128xbf16>, vector<18x128xf32> -> vector<18x128xf32>
    %14 = arith.addf %7, %13 : vector<18x128xf32>
    %c0_12 = arith.constant 0 : index
    %c2 = arith.constant 2 : index
    %c0_13 = arith.constant 0 : index
    %15 = vector.load %arg1[%c0_12, %c2, %c0_13] : memref<1x39x32xf32, #tpu.memory_space<vmem>>, vector<1x18x32xf32>
    %16 = vector.shape_cast %15 : vector<1x18x32xf32> to vector<18x32xf32>
    %17 = arith.truncf %16 : vector<18x32xf32> to vector<18x32xbf16>
    %c2_14 = arith.constant 2 : index
    %c0_15 = arith.constant 0 : index
    %c0_16 = arith.constant 0 : index
    %18 = vector.load %arg2[%c2_14, %c0_15, %c0_16] : memref<16x32x128xbf16, #tpu.memory_space<vmem>>, vector<1x32x128xbf16>
    %19 = vector.shape_cast %18 : vector<1x32x128xbf16> to vector<32x128xbf16>
    %cst_17 = arith.constant dense<0.000000e+00> : vector<18x128xf32>
    %20 = tpu.matmul %17, %19, %cst_17 {dimension_numbers = #tpu.dot_dimension_numbers<[1], [0], [0], [1], [0, 0, 1, 1], [], []>} : vector<18x32xbf16>, vector<32x128xbf16>, vector<18x128xf32> -> vector<18x128xf32>
    %21 = arith.addf %14, %20 : vector<18x128xf32>
    %c0_18 = arith.constant 0 : index
    %c3 = arith.constant 3 : index
    %c0_19 = arith.constant 0 : index
    %22 = vector.load %arg1[%c0_18, %c3, %c0_19] : memref<1x39x32xf32, #tpu.memory_space<vmem>>, vector<1x18x32xf32>
    %23 = vector.shape_cast %22 : vector<1x18x32xf32> to vector<18x32xf32>
    %24 = arith.truncf %23 : vector<18x32xf32> to vector<18x32xbf16>
    %c3_20 = arith.constant 3 : index
    %c0_21 = arith.constant 0 : index
    %c0_22 = arith.constant 0 : index
    %25 = vector.load %arg2[%c3_20, %c0_21, %c0_22] : memref<16x32x128xbf16, #tpu.memory_space<vmem>>, vector<1x32x128xbf16>
    %26 = vector.shape_cast %25 : vector<1x32x128xbf16> to vector<32x128xbf16>
    %cst_23 = arith.constant dense<0.000000e+00> : vector<18x128xf32>
    %27 = tpu.matmul %24, %26, %cst_23 {dimension_numbers = #tpu.dot_dimension_numbers<[1], [0], [0], [1], [0, 0, 1, 1], [], []>} : vector<18x32xbf16>, vector<32x128xbf16>, vector<18x128xf32> -> vector<18x128xf32>
    %28 = arith.addf %21, %27 : vector<18x128xf32>
    %c0_24 = arith.constant 0 : index
    %c6 = arith.constant 6 : index
    %c0_25 = arith.constant 0 : index
    %29 = vector.load %arg1[%c0_24, %c6, %c0_25] : memref<1x39x32xf32, #tpu.memory_space<vmem>>, vector<1x18x32xf32>
    %30 = vector.shape_cast %29 : vector<1x18x32xf32> to vector<18x32xf32>
    %31 = arith.truncf %30 : vector<18x32xf32> to vector<18x32xbf16>
    %c4 = arith.constant 4 : index
    %c0_26 = arith.constant 0 : index
    %c0_27 = arith.constant 0 : index
    %32 = vector.load %arg2[%c4, %c0_26, %c0_27] : memref<16x32x128xbf16, #tpu.memory_space<vmem>>, vector<1x32x128xbf16>
    %33 = vector.shape_cast %32 : vector<1x32x128xbf16> to vector<32x128xbf16>
    %cst_28 = arith.constant dense<0.000000e+00> : vector<18x128xf32>
    %34 = tpu.matmul %31, %33, %cst_28 {dimension_numbers = #tpu.dot_dimension_numbers<[1], [0], [0], [1], [0, 0, 1, 1], [], []>} : vector<18x32xbf16>, vector<32x128xbf16>, vector<18x128xf32> -> vector<18x128xf32>
    %35 = arith.addf %28, %34 : vector<18x128xf32>
    %c0_29 = arith.constant 0 : index
    %c7 = arith.constant 7 : index
    %c0_30 = arith.constant 0 : index
    %36 = vector.load %arg1[%c0_29, %c7, %c0_30] : memref<1x39x32xf32, #tpu.memory_space<vmem>>, vector<1x18x32xf32>
    %37 = vector.shape_cast %36 : vector<1x18x32xf32> to vector<18x32xf32>
    %38 = arith.truncf %37 : vector<18x32xf32> to vector<18x32xbf16>
    %c5 = arith.constant 5 : index
    %c0_31 = arith.constant 0 : index
    %c0_32 = arith.constant 0 : index
    %39 = vector.load %arg2[%c5, %c0_31, %c0_32] : memref<16x32x128xbf16, #tpu.memory_space<vmem>>, vector<1x32x128xbf16>
    %40 = vector.shape_cast %39 : vector<1x32x128xbf16> to vector<32x128xbf16>
    %cst_33 = arith.constant dense<0.000000e+00> : vector<18x128xf32>
    %41 = tpu.matmul %38, %40, %cst_33 {dimension_numbers = #tpu.dot_dimension_numbers<[1], [0], [0], [1], [0, 0, 1, 1], [], []>} : vector<18x32xbf16>, vector<32x128xbf16>, vector<18x128xf32> -> vector<18x128xf32>
    %42 = arith.addf %35, %41 : vector<18x128xf32>
    %c0_34 = arith.constant 0 : index
    %c8 = arith.constant 8 : index
    %c0_35 = arith.constant 0 : index
    %43 = vector.load %arg1[%c0_34, %c8, %c0_35] : memref<1x39x32xf32, #tpu.memory_space<vmem>>, vector<1x18x32xf32>
    %44 = vector.shape_cast %43 : vector<1x18x32xf32> to vector<18x32xf32>
    %45 = arith.truncf %44 : vector<18x32xf32> to vector<18x32xbf16>
    %c6_36 = arith.constant 6 : index
    %c0_37 = arith.constant 0 : index
    %c0_38 = arith.constant 0 : index
    %46 = vector.load %arg2[%c6_36, %c0_37, %c0_38] : memref<16x32x128xbf16, #tpu.memory_space<vmem>>, vector<1x32x128xbf16>
    %47 = vector.shape_cast %46 : vector<1x32x128xbf16> to vector<32x128xbf16>
    %cst_39 = arith.constant dense<0.000000e+00> : vector<18x128xf32>
    %48 = tpu.matmul %45, %47, %cst_39 {dimension_numbers = #tpu.dot_dimension_numbers<[1], [0], [0], [1], [0, 0, 1, 1], [], []>} : vector<18x32xbf16>, vector<32x128xbf16>, vector<18x128xf32> -> vector<18x128xf32>
    %49 = arith.addf %42, %48 : vector<18x128xf32>
    %c0_40 = arith.constant 0 : index
    %c9 = arith.constant 9 : index
    %c0_41 = arith.constant 0 : index
    %50 = vector.load %arg1[%c0_40, %c9, %c0_41] : memref<1x39x32xf32, #tpu.memory_space<vmem>>, vector<1x18x32xf32>
    %51 = vector.shape_cast %50 : vector<1x18x32xf32> to vector<18x32xf32>
    %52 = arith.truncf %51 : vector<18x32xf32> to vector<18x32xbf16>
    %c7_42 = arith.constant 7 : index
    %c0_43 = arith.constant 0 : index
    %c0_44 = arith.constant 0 : index
    %53 = vector.load %arg2[%c7_42, %c0_43, %c0_44] : memref<16x32x128xbf16, #tpu.memory_space<vmem>>, vector<1x32x128xbf16>
    %54 = vector.shape_cast %53 : vector<1x32x128xbf16> to vector<32x128xbf16>
    %cst_45 = arith.constant dense<0.000000e+00> : vector<18x128xf32>
    %55 = tpu.matmul %52, %54, %cst_45 {dimension_numbers = #tpu.dot_dimension_numbers<[1], [0], [0], [1], [0, 0, 1, 1], [], []>} : vector<18x32xbf16>, vector<32x128xbf16>, vector<18x128xf32> -> vector<18x128xf32>
    %56 = arith.addf %49, %55 : vector<18x128xf32>
    %c0_46 = arith.constant 0 : index
    %c12 = arith.constant 12 : index
    %c0_47 = arith.constant 0 : index
    %57 = vector.load %arg1[%c0_46, %c12, %c0_47] : memref<1x39x32xf32, #tpu.memory_space<vmem>>, vector<1x18x32xf32>
    %58 = vector.shape_cast %57 : vector<1x18x32xf32> to vector<18x32xf32>
    %59 = arith.truncf %58 : vector<18x32xf32> to vector<18x32xbf16>
    %c8_48 = arith.constant 8 : index
    %c0_49 = arith.constant 0 : index
    %c0_50 = arith.constant 0 : index
    %60 = vector.load %arg2[%c8_48, %c0_49, %c0_50] : memref<16x32x128xbf16, #tpu.memory_space<vmem>>, vector<1x32x128xbf16>
    %61 = vector.shape_cast %60 : vector<1x32x128xbf16> to vector<32x128xbf16>
    %cst_51 = arith.constant dense<0.000000e+00> : vector<18x128xf32>
    %62 = tpu.matmul %59, %61, %cst_51 {dimension_numbers = #tpu.dot_dimension_numbers<[1], [0], [0], [1], [0, 0, 1, 1], [], []>} : vector<18x32xbf16>, vector<32x128xbf16>, vector<18x128xf32> -> vector<18x128xf32>
    %63 = arith.addf %56, %62 : vector<18x128xf32>
    %c0_52 = arith.constant 0 : index
    %c13 = arith.constant 13 : index
    %c0_53 = arith.constant 0 : index
    %64 = vector.load %arg1[%c0_52, %c13, %c0_53] : memref<1x39x32xf32, #tpu.memory_space<vmem>>, vector<1x18x32xf32>
    %65 = vector.shape_cast %64 : vector<1x18x32xf32> to vector<18x32xf32>
    %66 = arith.truncf %65 : vector<18x32xf32> to vector<18x32xbf16>
    %c9_54 = arith.constant 9 : index
    %c0_55 = arith.constant 0 : index
    %c0_56 = arith.constant 0 : index
    %67 = vector.load %arg2[%c9_54, %c0_55, %c0_56] : memref<16x32x128xbf16, #tpu.memory_space<vmem>>, vector<1x32x128xbf16>
    %68 = vector.shape_cast %67 : vector<1x32x128xbf16> to vector<32x128xbf16>
    %cst_57 = arith.constant dense<0.000000e+00> : vector<18x128xf32>
    %69 = tpu.matmul %66, %68, %cst_57 {dimension_numbers = #tpu.dot_dimension_numbers<[1], [0], [0], [1], [0, 0, 1, 1], [], []>} : vector<18x32xbf16>, vector<32x128xbf16>, vector<18x128xf32> -> vector<18x128xf32>
    %70 = arith.addf %63, %69 : vector<18x128xf32>
    %c0_58 = arith.constant 0 : index
    %c14 = arith.constant 14 : index
    %c0_59 = arith.constant 0 : index
    %71 = vector.load %arg1[%c0_58, %c14, %c0_59] : memref<1x39x32xf32, #tpu.memory_space<vmem>>, vector<1x18x32xf32>
    %72 = vector.shape_cast %71 : vector<1x18x32xf32> to vector<18x32xf32>
    %73 = arith.truncf %72 : vector<18x32xf32> to vector<18x32xbf16>
    %c10 = arith.constant 10 : index
    %c0_60 = arith.constant 0 : index
    %c0_61 = arith.constant 0 : index
    %74 = vector.load %arg2[%c10, %c0_60, %c0_61] : memref<16x32x128xbf16, #tpu.memory_space<vmem>>, vector<1x32x128xbf16>
    %75 = vector.shape_cast %74 : vector<1x32x128xbf16> to vector<32x128xbf16>
    %cst_62 = arith.constant dense<0.000000e+00> : vector<18x128xf32>
    %76 = tpu.matmul %73, %75, %cst_62 {dimension_numbers = #tpu.dot_dimension_numbers<[1], [0], [0], [1], [0, 0, 1, 1], [], []>} : vector<18x32xbf16>, vector<32x128xbf16>, vector<18x128xf32> -> vector<18x128xf32>
    %77 = arith.addf %70, %76 : vector<18x128xf32>
    %c0_63 = arith.constant 0 : index
    %c15 = arith.constant 15 : index
    %c0_64 = arith.constant 0 : index
    %78 = vector.load %arg1[%c0_63, %c15, %c0_64] : memref<1x39x32xf32, #tpu.memory_space<vmem>>, vector<1x18x32xf32>
    %79 = vector.shape_cast %78 : vector<1x18x32xf32> to vector<18x32xf32>
    %80 = arith.truncf %79 : vector<18x32xf32> to vector<18x32xbf16>
    %c11 = arith.constant 11 : index
    %c0_65 = arith.constant 0 : index
    %c0_66 = arith.constant 0 : index
    %81 = vector.load %arg2[%c11, %c0_65, %c0_66] : memref<16x32x128xbf16, #tpu.memory_space<vmem>>, vector<1x32x128xbf16>
    %82 = vector.shape_cast %81 : vector<1x32x128xbf16> to vector<32x128xbf16>
    %cst_67 = arith.constant dense<0.000000e+00> : vector<18x128xf32>
    %83 = tpu.matmul %80, %82, %cst_67 {dimension_numbers = #tpu.dot_dimension_numbers<[1], [0], [0], [1], [0, 0, 1, 1], [], []>} : vector<18x32xbf16>, vector<32x128xbf16>, vector<18x128xf32> -> vector<18x128xf32>
    %84 = arith.addf %77, %83 : vector<18x128xf32>
    %c0_68 = arith.constant 0 : index
    %c18 = arith.constant 18 : index
    %c0_69 = arith.constant 0 : index
    %85 = vector.load %arg1[%c0_68, %c18, %c0_69] : memref<1x39x32xf32, #tpu.memory_space<vmem>>, vector<1x18x32xf32>
    %86 = vector.shape_cast %85 : vector<1x18x32xf32> to vector<18x32xf32>
    %87 = arith.truncf %86 : vector<18x32xf32> to vector<18x32xbf16>
    %c12_70 = arith.constant 12 : index
    %c0_71 = arith.constant 0 : index
    %c0_72 = arith.constant 0 : index
    %88 = vector.load %arg2[%c12_70, %c0_71, %c0_72] : memref<16x32x128xbf16, #tpu.memory_space<vmem>>, vector<1x32x128xbf16>
    %89 = vector.shape_cast %88 : vector<1x32x128xbf16> to vector<32x128xbf16>
    %cst_73 = arith.constant dense<0.000000e+00> : vector<18x128xf32>
    %90 = tpu.matmul %87, %89, %cst_73 {dimension_numbers = #tpu.dot_dimension_numbers<[1], [0], [0], [1], [0, 0, 1, 1], [], []>} : vector<18x32xbf16>, vector<32x128xbf16>, vector<18x128xf32> -> vector<18x128xf32>
    %91 = arith.addf %84, %90 : vector<18x128xf32>
    %c0_74 = arith.constant 0 : index
    %c19 = arith.constant 19 : index
    %c0_75 = arith.constant 0 : index
    %92 = vector.load %arg1[%c0_74, %c19, %c0_75] : memref<1x39x32xf32, #tpu.memory_space<vmem>>, vector<1x18x32xf32>
    %93 = vector.shape_cast %92 : vector<1x18x32xf32> to vector<18x32xf32>
    %94 = arith.truncf %93 : vector<18x32xf32> to vector<18x32xbf16>
    %c13_76 = arith.constant 13 : index
    %c0_77 = arith.constant 0 : index
    %c0_78 = arith.constant 0 : index
    %95 = vector.load %arg2[%c13_76, %c0_77, %c0_78] : memref<16x32x128xbf16, #tpu.memory_space<vmem>>, vector<1x32x128xbf16>
    %96 = vector.shape_cast %95 : vector<1x32x128xbf16> to vector<32x128xbf16>
    %cst_79 = arith.constant dense<0.000000e+00> : vector<18x128xf32>
    %97 = tpu.matmul %94, %96, %cst_79 {dimension_numbers = #tpu.dot_dimension_numbers<[1], [0], [0], [1], [0, 0, 1, 1], [], []>} : vector<18x32xbf16>, vector<32x128xbf16>, vector<18x128xf32> -> vector<18x128xf32>
    %98 = arith.addf %91, %97 : vector<18x128xf32>
    %c0_80 = arith.constant 0 : index
    %c20 = arith.constant 20 : index
    %c0_81 = arith.constant 0 : index
    %99 = vector.load %arg1[%c0_80, %c20, %c0_81] : memref<1x39x32xf32, #tpu.memory_space<vmem>>, vector<1x18x32xf32>
    %100 = vector.shape_cast %99 : vector<1x18x32xf32> to vector<18x32xf32>
    %101 = arith.truncf %100 : vector<18x32xf32> to vector<18x32xbf16>
    %c14_82 = arith.constant 14 : index
    %c0_83 = arith.constant 0 : index
    %c0_84 = arith.constant 0 : index
    %102 = vector.load %arg2[%c14_82, %c0_83, %c0_84] : memref<16x32x128xbf16, #tpu.memory_space<vmem>>, vector<1x32x128xbf16>
    %103 = vector.shape_cast %102 : vector<1x32x128xbf16> to vector<32x128xbf16>
    %cst_85 = arith.constant dense<0.000000e+00> : vector<18x128xf32>
    %104 = tpu.matmul %101, %103, %cst_85 {dimension_numbers = #tpu.dot_dimension_numbers<[1], [0], [0], [1], [0, 0, 1, 1], [], []>} : vector<18x32xbf16>, vector<32x128xbf16>, vector<18x128xf32> -> vector<18x128xf32>
    %105 = arith.addf %98, %104 : vector<18x128xf32>
    %c0_86 = arith.constant 0 : index
    %c21 = arith.constant 21 : index
    %c0_87 = arith.constant 0 : index
    %106 = vector.load %arg1[%c0_86, %c21, %c0_87] : memref<1x39x32xf32, #tpu.memory_space<vmem>>, vector<1x18x32xf32>
    %107 = vector.shape_cast %106 : vector<1x18x32xf32> to vector<18x32xf32>
    %108 = arith.truncf %107 : vector<18x32xf32> to vector<18x32xbf16>
    %c15_88 = arith.constant 15 : index
    %c0_89 = arith.constant 0 : index
    %c0_90 = arith.constant 0 : index
    %109 = vector.load %arg2[%c15_88, %c0_89, %c0_90] : memref<16x32x128xbf16, #tpu.memory_space<vmem>>, vector<1x32x128xbf16>
    %110 = vector.shape_cast %109 : vector<1x32x128xbf16> to vector<32x128xbf16>
    %cst_91 = arith.constant dense<0.000000e+00> : vector<18x128xf32>
    %111 = tpu.matmul %108, %110, %cst_91 {dimension_numbers = #tpu.dot_dimension_numbers<[1], [0], [0], [1], [0, 0, 1, 1], [], []>} : vector<18x32xbf16>, vector<32x128xbf16>, vector<18x128xf32> -> vector<18x128xf32>
    %112 = arith.addf %105, %111 : vector<18x128xf32>
    %c0_92 = arith.constant 0 : index
    %c0_93 = arith.constant 0 : index
    %113 = vector.load %arg3[%c0_92, %c0_93] : memref<1x128xf32, #tpu.memory_space<vmem>>, vector<1x128xf32>
    %114 = vector.broadcast %113 : vector<1x128xf32> to vector<18x128xf32>
    %115 = arith.addf %112, %114 : vector<18x128xf32>
    %c0_94 = arith.constant 0 : index
    %c0_95 = arith.constant 0 : index
    %116 = vector.load %arg4[%c0_94, %c0_95] : memref<18x1xf32, #tpu.memory_space<vmem>>, vector<18x1xf32>
    %117 = vector.broadcast %116 : vector<18x1xf32> to vector<18x128xf32>
    %118 = arith.mulf %115, %117 : vector<18x128xf32>
    %cst_96 = arith.constant dense<0.000000e+00> : vector<128xf32>
    %119 = vector.multi_reduction <add>, %118, %cst_96 [0] : vector<18x128xf32> to vector<128xf32>
    %120 = vector.shape_cast %119 : vector<128xf32> to vector<1x128xf32>
    %cst_97 = arith.constant 0.111111112 : f32
    %121 = vector.broadcast %cst_97 : f32 to vector<1x128xf32>
    %122 = arith.mulf %120, %121 : vector<1x128xf32>
    %123 = vector.broadcast %122 : vector<1x128xf32> to vector<18x128xf32>
    %124 = arith.subf %115, %123 : vector<18x128xf32>
    %125 = arith.mulf %124, %124 : vector<18x128xf32>
    %126 = vector.broadcast %116 : vector<18x1xf32> to vector<18x128xf32>
    %127 = arith.mulf %125, %126 : vector<18x128xf32>
    %cst_98 = arith.constant dense<0.000000e+00> : vector<128xf32>
    %128 = vector.multi_reduction <add>, %127, %cst_98 [0] : vector<18x128xf32> to vector<128xf32>
    %129 = vector.shape_cast %128 : vector<128xf32> to vector<1x128xf32>
    %cst_99 = arith.constant 0.111111112 : f32
    %130 = vector.broadcast %cst_99 : f32 to vector<1x128xf32>
    %131 = arith.mulf %129, %130 : vector<1x128xf32>
    %cst_100 = arith.constant 9.99999974E-6 : f32
    %132 = vector.broadcast %cst_100 : f32 to vector<1x128xf32>
    %133 = arith.addf %131, %132 : vector<1x128xf32>
    %134 = math.rsqrt %133 : vector<1x128xf32>
    %135 = vector.broadcast %134 : vector<1x128xf32> to vector<18x128xf32>
    %136 = arith.mulf %124, %135 : vector<18x128xf32>
    %cst_101 = arith.constant 0.000000e+00 : f32
    %137 = vector.broadcast %cst_101 : f32 to vector<18x128xf32>
    %138 = arith.cmpf oge, %136, %137 : vector<18x128xf32>
    %cst_102 = arith.constant 2.000000e-01 : f32
    %139 = vector.broadcast %cst_102 : f32 to vector<18x128xf32>
    %140 = arith.mulf %139, %136 : vector<18x128xf32>
    %141 = arith.select %138, %136, %140 : vector<18x128xi1>, vector<18x128xf32>
    %c0_103 = arith.constant 0 : index
    %c0_104 = arith.constant 0 : index
    %c0_105 = arith.constant 0 : index
    %142 = vector.load %arg5[%c0_103, %c0_104, %c0_105] : memref<1x18x128xf32, #tpu.memory_space<vmem>>, vector<1x18x128xf32>
    %143 = vector.shape_cast %142 : vector<1x18x128xf32> to vector<18x128xf32>
    %144 = vector.shape_cast %141 : vector<18x128xf32> to vector<1x18x128xf32>
    tpu.vector_store %arg5[%c0_103, %c0_104, %c0_105], %144 {strides = array<i32>} : memref<1x18x128xf32, #tpu.memory_space<vmem>>, vector<1x18x128xf32>,
    return
  }
  func.func @transform_0(%arg0: i32) -> (i32, i32, i32) {
    %c0_i32 = arith.constant 0 : i32
    %c0_i32_0 = arith.constant 0 : i32
    %c0_i32_1 = arith.constant 0 : i32
    return %arg0, %c0_i32, %c0_i32_0 : i32, i32, i32
  }
  func.func @transform_1(%arg0: i32) -> (i32, i32, i32) {
    %c0_i32 = arith.constant 0 : i32
    %c0_i32_0 = arith.constant 0 : i32
    %c0_i32_1 = arith.constant 0 : i32
    %c0_i32_2 = arith.constant 0 : i32
    return %c0_i32, %c0_i32_0, %c0_i32_1 : i32, i32, i32
  }
  func.func @transform_2(%arg0: i32) -> (i32, i32) {
    %c0_i32 = arith.constant 0 : i32
    %c0_i32_0 = arith.constant 0 : i32
    %c0_i32_1 = arith.constant 0 : i32
    return %c0_i32, %c0_i32_0 : i32, i32
  }
  func.func @transform_3(%arg0: i32) -> (i32, i32) {
    %c0_i32 = arith.constant 0 : i32
    %c0_i32_0 = arith.constant 0 : i32
    %c0_i32_1 = arith.constant 0 : i32
    return %c0_i32, %c0_i32_0 : i32, i32
  }
  func.func @transform_4(%arg0: i32) -> (i32, i32, i32) {
    %c0_i32 = arith.constant 0 : i32
    %c0_i32_0 = arith.constant 0 : i32
    %c0_i32_1 = arith.constant 0 : i32
    return %arg0, %c0_i32, %c0_i32_0 : i32, i32, i32
  }
}

module attributes {stable_mosaic.version = 11 : i64} {
  func.func @_conv_in_lrelu_kernel(%arg0: i32, %arg1: memref<1x28x64xf32, #tpu.memory_space<vmem>>, %arg2: memref<16x64x128xbf16, #tpu.memory_space<vmem>>, %arg3: memref<1x128xf32, #tpu.memory_space<vmem>>, %arg4: memref<10x1xf32, #tpu.memory_space<vmem>>, %arg5: memref<1x10x128xf32, #tpu.memory_space<vmem>>) attributes {dimension_semantics = [#tpu.dimension_semantics<parallel>], iteration_bounds = array<i64: 2>, scalar_prefetch = 0 : i64, scratch_operands = 0 : i64, tpu.core_type = #tpu.core_type<tc>, window_params = [{transform_indices = @transform_0, window_bounds = array<i64: 1, 28, 64>}, {pipeline_mode = #tpu.pipeline_mode<synchronous>, transform_indices = @transform_1, window_bounds = array<i64: 16, 64, 128>}, {pipeline_mode = #tpu.pipeline_mode<synchronous>, transform_indices = @transform_2, window_bounds = array<i64: 1, 128>}, {pipeline_mode = #tpu.pipeline_mode<synchronous>, transform_indices = @transform_3, window_bounds = array<i64: 10, 1>}, {transform_indices = @transform_4, window_bounds = array<i64: 1, 10, 128>}]} {
    %cst = arith.constant 0.000000e+00 : f32
    %0 = vector.broadcast %cst : f32 to vector<10x128xf32>
    %c0 = arith.constant 0 : index
    %c0_0 = arith.constant 0 : index
    %c0_1 = arith.constant 0 : index
    %1 = vector.load %arg1[%c0, %c0_0, %c0_1] : memref<1x28x64xf32, #tpu.memory_space<vmem>>, vector<1x10x64xf32>
    %2 = vector.shape_cast %1 : vector<1x10x64xf32> to vector<10x64xf32>
    %3 = arith.truncf %2 : vector<10x64xf32> to vector<10x64xbf16>
    %c0_2 = arith.constant 0 : index
    %c0_3 = arith.constant 0 : index
    %c0_4 = arith.constant 0 : index
    %4 = vector.load %arg2[%c0_2, %c0_3, %c0_4] : memref<16x64x128xbf16, #tpu.memory_space<vmem>>, vector<1x64x128xbf16>
    %5 = vector.shape_cast %4 : vector<1x64x128xbf16> to vector<64x128xbf16>
    %cst_5 = arith.constant dense<0.000000e+00> : vector<10x128xf32>
    %6 = tpu.matmul %3, %5, %cst_5 {dimension_numbers = #tpu.dot_dimension_numbers<[1], [0], [0], [1], [0, 0, 1, 1], [], []>} : vector<10x64xbf16>, vector<64x128xbf16>, vector<10x128xf32> -> vector<10x128xf32>
    %7 = arith.addf %0, %6 : vector<10x128xf32>
    %c0_6 = arith.constant 0 : index
    %c1 = arith.constant 1 : index
    %c0_7 = arith.constant 0 : index
    %8 = vector.load %arg1[%c0_6, %c1, %c0_7] : memref<1x28x64xf32, #tpu.memory_space<vmem>>, vector<1x10x64xf32>
    %9 = vector.shape_cast %8 : vector<1x10x64xf32> to vector<10x64xf32>
    %10 = arith.truncf %9 : vector<10x64xf32> to vector<10x64xbf16>
    %c1_8 = arith.constant 1 : index
    %c0_9 = arith.constant 0 : index
    %c0_10 = arith.constant 0 : index
    %11 = vector.load %arg2[%c1_8, %c0_9, %c0_10] : memref<16x64x128xbf16, #tpu.memory_space<vmem>>, vector<1x64x128xbf16>
    %12 = vector.shape_cast %11 : vector<1x64x128xbf16> to vector<64x128xbf16>
    %cst_11 = arith.constant dense<0.000000e+00> : vector<10x128xf32>
    %13 = tpu.matmul %10, %12, %cst_11 {dimension_numbers = #tpu.dot_dimension_numbers<[1], [0], [0], [1], [0, 0, 1, 1], [], []>} : vector<10x64xbf16>, vector<64x128xbf16>, vector<10x128xf32> -> vector<10x128xf32>
    %14 = arith.addf %7, %13 : vector<10x128xf32>
    %c0_12 = arith.constant 0 : index
    %c2 = arith.constant 2 : index
    %c0_13 = arith.constant 0 : index
    %15 = vector.load %arg1[%c0_12, %c2, %c0_13] : memref<1x28x64xf32, #tpu.memory_space<vmem>>, vector<1x10x64xf32>
    %16 = vector.shape_cast %15 : vector<1x10x64xf32> to vector<10x64xf32>
    %17 = arith.truncf %16 : vector<10x64xf32> to vector<10x64xbf16>
    %c2_14 = arith.constant 2 : index
    %c0_15 = arith.constant 0 : index
    %c0_16 = arith.constant 0 : index
    %18 = vector.load %arg2[%c2_14, %c0_15, %c0_16] : memref<16x64x128xbf16, #tpu.memory_space<vmem>>, vector<1x64x128xbf16>
    %19 = vector.shape_cast %18 : vector<1x64x128xbf16> to vector<64x128xbf16>
    %cst_17 = arith.constant dense<0.000000e+00> : vector<10x128xf32>
    %20 = tpu.matmul %17, %19, %cst_17 {dimension_numbers = #tpu.dot_dimension_numbers<[1], [0], [0], [1], [0, 0, 1, 1], [], []>} : vector<10x64xbf16>, vector<64x128xbf16>, vector<10x128xf32> -> vector<10x128xf32>
    %21 = arith.addf %14, %20 : vector<10x128xf32>
    %c0_18 = arith.constant 0 : index
    %c3 = arith.constant 3 : index
    %c0_19 = arith.constant 0 : index
    %22 = vector.load %arg1[%c0_18, %c3, %c0_19] : memref<1x28x64xf32, #tpu.memory_space<vmem>>, vector<1x10x64xf32>
    %23 = vector.shape_cast %22 : vector<1x10x64xf32> to vector<10x64xf32>
    %24 = arith.truncf %23 : vector<10x64xf32> to vector<10x64xbf16>
    %c3_20 = arith.constant 3 : index
    %c0_21 = arith.constant 0 : index
    %c0_22 = arith.constant 0 : index
    %25 = vector.load %arg2[%c3_20, %c0_21, %c0_22] : memref<16x64x128xbf16, #tpu.memory_space<vmem>>, vector<1x64x128xbf16>
    %26 = vector.shape_cast %25 : vector<1x64x128xbf16> to vector<64x128xbf16>
    %cst_23 = arith.constant dense<0.000000e+00> : vector<10x128xf32>
    %27 = tpu.matmul %24, %26, %cst_23 {dimension_numbers = #tpu.dot_dimension_numbers<[1], [0], [0], [1], [0, 0, 1, 1], [], []>} : vector<10x64xbf16>, vector<64x128xbf16>, vector<10x128xf32> -> vector<10x128xf32>
    %28 = arith.addf %21, %27 : vector<10x128xf32>
    %c0_24 = arith.constant 0 : index
    %c5 = arith.constant 5 : index
    %c0_25 = arith.constant 0 : index
    %29 = vector.load %arg1[%c0_24, %c5, %c0_25] : memref<1x28x64xf32, #tpu.memory_space<vmem>>, vector<1x10x64xf32>
    %30 = vector.shape_cast %29 : vector<1x10x64xf32> to vector<10x64xf32>
    %31 = arith.truncf %30 : vector<10x64xf32> to vector<10x64xbf16>
    %c4 = arith.constant 4 : index
    %c0_26 = arith.constant 0 : index
    %c0_27 = arith.constant 0 : index
    %32 = vector.load %arg2[%c4, %c0_26, %c0_27] : memref<16x64x128xbf16, #tpu.memory_space<vmem>>, vector<1x64x128xbf16>
    %33 = vector.shape_cast %32 : vector<1x64x128xbf16> to vector<64x128xbf16>
    %cst_28 = arith.constant dense<0.000000e+00> : vector<10x128xf32>
    %34 = tpu.matmul %31, %33, %cst_28 {dimension_numbers = #tpu.dot_dimension_numbers<[1], [0], [0], [1], [0, 0, 1, 1], [], []>} : vector<10x64xbf16>, vector<64x128xbf16>, vector<10x128xf32> -> vector<10x128xf32>
    %35 = arith.addf %28, %34 : vector<10x128xf32>
    %c0_29 = arith.constant 0 : index
    %c6 = arith.constant 6 : index
    %c0_30 = arith.constant 0 : index
    %36 = vector.load %arg1[%c0_29, %c6, %c0_30] : memref<1x28x64xf32, #tpu.memory_space<vmem>>, vector<1x10x64xf32>
    %37 = vector.shape_cast %36 : vector<1x10x64xf32> to vector<10x64xf32>
    %38 = arith.truncf %37 : vector<10x64xf32> to vector<10x64xbf16>
    %c5_31 = arith.constant 5 : index
    %c0_32 = arith.constant 0 : index
    %c0_33 = arith.constant 0 : index
    %39 = vector.load %arg2[%c5_31, %c0_32, %c0_33] : memref<16x64x128xbf16, #tpu.memory_space<vmem>>, vector<1x64x128xbf16>
    %40 = vector.shape_cast %39 : vector<1x64x128xbf16> to vector<64x128xbf16>
    %cst_34 = arith.constant dense<0.000000e+00> : vector<10x128xf32>
    %41 = tpu.matmul %38, %40, %cst_34 {dimension_numbers = #tpu.dot_dimension_numbers<[1], [0], [0], [1], [0, 0, 1, 1], [], []>} : vector<10x64xbf16>, vector<64x128xbf16>, vector<10x128xf32> -> vector<10x128xf32>
    %42 = arith.addf %35, %41 : vector<10x128xf32>
    %c0_35 = arith.constant 0 : index
    %c7 = arith.constant 7 : index
    %c0_36 = arith.constant 0 : index
    %43 = vector.load %arg1[%c0_35, %c7, %c0_36] : memref<1x28x64xf32, #tpu.memory_space<vmem>>, vector<1x10x64xf32>
    %44 = vector.shape_cast %43 : vector<1x10x64xf32> to vector<10x64xf32>
    %45 = arith.truncf %44 : vector<10x64xf32> to vector<10x64xbf16>
    %c6_37 = arith.constant 6 : index
    %c0_38 = arith.constant 0 : index
    %c0_39 = arith.constant 0 : index
    %46 = vector.load %arg2[%c6_37, %c0_38, %c0_39] : memref<16x64x128xbf16, #tpu.memory_space<vmem>>, vector<1x64x128xbf16>
    %47 = vector.shape_cast %46 : vector<1x64x128xbf16> to vector<64x128xbf16>
    %cst_40 = arith.constant dense<0.000000e+00> : vector<10x128xf32>
    %48 = tpu.matmul %45, %47, %cst_40 {dimension_numbers = #tpu.dot_dimension_numbers<[1], [0], [0], [1], [0, 0, 1, 1], [], []>} : vector<10x64xbf16>, vector<64x128xbf16>, vector<10x128xf32> -> vector<10x128xf32>
    %49 = arith.addf %42, %48 : vector<10x128xf32>
    %c0_41 = arith.constant 0 : index
    %c8 = arith.constant 8 : index
    %c0_42 = arith.constant 0 : index
    %50 = vector.load %arg1[%c0_41, %c8, %c0_42] : memref<1x28x64xf32, #tpu.memory_space<vmem>>, vector<1x10x64xf32>
    %51 = vector.shape_cast %50 : vector<1x10x64xf32> to vector<10x64xf32>
    %52 = arith.truncf %51 : vector<10x64xf32> to vector<10x64xbf16>
    %c7_43 = arith.constant 7 : index
    %c0_44 = arith.constant 0 : index
    %c0_45 = arith.constant 0 : index
    %53 = vector.load %arg2[%c7_43, %c0_44, %c0_45] : memref<16x64x128xbf16, #tpu.memory_space<vmem>>, vector<1x64x128xbf16>
    %54 = vector.shape_cast %53 : vector<1x64x128xbf16> to vector<64x128xbf16>
    %cst_46 = arith.constant dense<0.000000e+00> : vector<10x128xf32>
    %55 = tpu.matmul %52, %54, %cst_46 {dimension_numbers = #tpu.dot_dimension_numbers<[1], [0], [0], [1], [0, 0, 1, 1], [], []>} : vector<10x64xbf16>, vector<64x128xbf16>, vector<10x128xf32> -> vector<10x128xf32>
    %56 = arith.addf %49, %55 : vector<10x128xf32>
    %c0_47 = arith.constant 0 : index
    %c10 = arith.constant 10 : index
    %c0_48 = arith.constant 0 : index
    %57 = vector.load %arg1[%c0_47, %c10, %c0_48] : memref<1x28x64xf32, #tpu.memory_space<vmem>>, vector<1x10x64xf32>
    %58 = vector.shape_cast %57 : vector<1x10x64xf32> to vector<10x64xf32>
    %59 = arith.truncf %58 : vector<10x64xf32> to vector<10x64xbf16>
    %c8_49 = arith.constant 8 : index
    %c0_50 = arith.constant 0 : index
    %c0_51 = arith.constant 0 : index
    %60 = vector.load %arg2[%c8_49, %c0_50, %c0_51] : memref<16x64x128xbf16, #tpu.memory_space<vmem>>, vector<1x64x128xbf16>
    %61 = vector.shape_cast %60 : vector<1x64x128xbf16> to vector<64x128xbf16>
    %cst_52 = arith.constant dense<0.000000e+00> : vector<10x128xf32>
    %62 = tpu.matmul %59, %61, %cst_52 {dimension_numbers = #tpu.dot_dimension_numbers<[1], [0], [0], [1], [0, 0, 1, 1], [], []>} : vector<10x64xbf16>, vector<64x128xbf16>, vector<10x128xf32> -> vector<10x128xf32>
    %63 = arith.addf %56, %62 : vector<10x128xf32>
    %c0_53 = arith.constant 0 : index
    %c11 = arith.constant 11 : index
    %c0_54 = arith.constant 0 : index
    %64 = vector.load %arg1[%c0_53, %c11, %c0_54] : memref<1x28x64xf32, #tpu.memory_space<vmem>>, vector<1x10x64xf32>
    %65 = vector.shape_cast %64 : vector<1x10x64xf32> to vector<10x64xf32>
    %66 = arith.truncf %65 : vector<10x64xf32> to vector<10x64xbf16>
    %c9 = arith.constant 9 : index
    %c0_55 = arith.constant 0 : index
    %c0_56 = arith.constant 0 : index
    %67 = vector.load %arg2[%c9, %c0_55, %c0_56] : memref<16x64x128xbf16, #tpu.memory_space<vmem>>, vector<1x64x128xbf16>
    %68 = vector.shape_cast %67 : vector<1x64x128xbf16> to vector<64x128xbf16>
    %cst_57 = arith.constant dense<0.000000e+00> : vector<10x128xf32>
    %69 = tpu.matmul %66, %68, %cst_57 {dimension_numbers = #tpu.dot_dimension_numbers<[1], [0], [0], [1], [0, 0, 1, 1], [], []>} : vector<10x64xbf16>, vector<64x128xbf16>, vector<10x128xf32> -> vector<10x128xf32>
    %70 = arith.addf %63, %69 : vector<10x128xf32>
    %c0_58 = arith.constant 0 : index
    %c12 = arith.constant 12 : index
    %c0_59 = arith.constant 0 : index
    %71 = vector.load %arg1[%c0_58, %c12, %c0_59] : memref<1x28x64xf32, #tpu.memory_space<vmem>>, vector<1x10x64xf32>
    %72 = vector.shape_cast %71 : vector<1x10x64xf32> to vector<10x64xf32>
    %73 = arith.truncf %72 : vector<10x64xf32> to vector<10x64xbf16>
    %c10_60 = arith.constant 10 : index
    %c0_61 = arith.constant 0 : index
    %c0_62 = arith.constant 0 : index
    %74 = vector.load %arg2[%c10_60, %c0_61, %c0_62] : memref<16x64x128xbf16, #tpu.memory_space<vmem>>, vector<1x64x128xbf16>
    %75 = vector.shape_cast %74 : vector<1x64x128xbf16> to vector<64x128xbf16>
    %cst_63 = arith.constant dense<0.000000e+00> : vector<10x128xf32>
    %76 = tpu.matmul %73, %75, %cst_63 {dimension_numbers = #tpu.dot_dimension_numbers<[1], [0], [0], [1], [0, 0, 1, 1], [], []>} : vector<10x64xbf16>, vector<64x128xbf16>, vector<10x128xf32> -> vector<10x128xf32>
    %77 = arith.addf %70, %76 : vector<10x128xf32>
    %c0_64 = arith.constant 0 : index
    %c13 = arith.constant 13 : index
    %c0_65 = arith.constant 0 : index
    %78 = vector.load %arg1[%c0_64, %c13, %c0_65] : memref<1x28x64xf32, #tpu.memory_space<vmem>>, vector<1x10x64xf32>
    %79 = vector.shape_cast %78 : vector<1x10x64xf32> to vector<10x64xf32>
    %80 = arith.truncf %79 : vector<10x64xf32> to vector<10x64xbf16>
    %c11_66 = arith.constant 11 : index
    %c0_67 = arith.constant 0 : index
    %c0_68 = arith.constant 0 : index
    %81 = vector.load %arg2[%c11_66, %c0_67, %c0_68] : memref<16x64x128xbf16, #tpu.memory_space<vmem>>, vector<1x64x128xbf16>
    %82 = vector.shape_cast %81 : vector<1x64x128xbf16> to vector<64x128xbf16>
    %cst_69 = arith.constant dense<0.000000e+00> : vector<10x128xf32>
    %83 = tpu.matmul %80, %82, %cst_69 {dimension_numbers = #tpu.dot_dimension_numbers<[1], [0], [0], [1], [0, 0, 1, 1], [], []>} : vector<10x64xbf16>, vector<64x128xbf16>, vector<10x128xf32> -> vector<10x128xf32>
    %84 = arith.addf %77, %83 : vector<10x128xf32>
    %c0_70 = arith.constant 0 : index
    %c15 = arith.constant 15 : index
    %c0_71 = arith.constant 0 : index
    %85 = vector.load %arg1[%c0_70, %c15, %c0_71] : memref<1x28x64xf32, #tpu.memory_space<vmem>>, vector<1x10x64xf32>
    %86 = vector.shape_cast %85 : vector<1x10x64xf32> to vector<10x64xf32>
    %87 = arith.truncf %86 : vector<10x64xf32> to vector<10x64xbf16>
    %c12_72 = arith.constant 12 : index
    %c0_73 = arith.constant 0 : index
    %c0_74 = arith.constant 0 : index
    %88 = vector.load %arg2[%c12_72, %c0_73, %c0_74] : memref<16x64x128xbf16, #tpu.memory_space<vmem>>, vector<1x64x128xbf16>
    %89 = vector.shape_cast %88 : vector<1x64x128xbf16> to vector<64x128xbf16>
    %cst_75 = arith.constant dense<0.000000e+00> : vector<10x128xf32>
    %90 = tpu.matmul %87, %89, %cst_75 {dimension_numbers = #tpu.dot_dimension_numbers<[1], [0], [0], [1], [0, 0, 1, 1], [], []>} : vector<10x64xbf16>, vector<64x128xbf16>, vector<10x128xf32> -> vector<10x128xf32>
    %91 = arith.addf %84, %90 : vector<10x128xf32>
    %c0_76 = arith.constant 0 : index
    %c16 = arith.constant 16 : index
    %c0_77 = arith.constant 0 : index
    %92 = vector.load %arg1[%c0_76, %c16, %c0_77] : memref<1x28x64xf32, #tpu.memory_space<vmem>>, vector<1x10x64xf32>
    %93 = vector.shape_cast %92 : vector<1x10x64xf32> to vector<10x64xf32>
    %94 = arith.truncf %93 : vector<10x64xf32> to vector<10x64xbf16>
    %c13_78 = arith.constant 13 : index
    %c0_79 = arith.constant 0 : index
    %c0_80 = arith.constant 0 : index
    %95 = vector.load %arg2[%c13_78, %c0_79, %c0_80] : memref<16x64x128xbf16, #tpu.memory_space<vmem>>, vector<1x64x128xbf16>
    %96 = vector.shape_cast %95 : vector<1x64x128xbf16> to vector<64x128xbf16>
    %cst_81 = arith.constant dense<0.000000e+00> : vector<10x128xf32>
    %97 = tpu.matmul %94, %96, %cst_81 {dimension_numbers = #tpu.dot_dimension_numbers<[1], [0], [0], [1], [0, 0, 1, 1], [], []>} : vector<10x64xbf16>, vector<64x128xbf16>, vector<10x128xf32> -> vector<10x128xf32>
    %98 = arith.addf %91, %97 : vector<10x128xf32>
    %c0_82 = arith.constant 0 : index
    %c17 = arith.constant 17 : index
    %c0_83 = arith.constant 0 : index
    %99 = vector.load %arg1[%c0_82, %c17, %c0_83] : memref<1x28x64xf32, #tpu.memory_space<vmem>>, vector<1x10x64xf32>
    %100 = vector.shape_cast %99 : vector<1x10x64xf32> to vector<10x64xf32>
    %101 = arith.truncf %100 : vector<10x64xf32> to vector<10x64xbf16>
    %c14 = arith.constant 14 : index
    %c0_84 = arith.constant 0 : index
    %c0_85 = arith.constant 0 : index
    %102 = vector.load %arg2[%c14, %c0_84, %c0_85] : memref<16x64x128xbf16, #tpu.memory_space<vmem>>, vector<1x64x128xbf16>
    %103 = vector.shape_cast %102 : vector<1x64x128xbf16> to vector<64x128xbf16>
    %cst_86 = arith.constant dense<0.000000e+00> : vector<10x128xf32>
    %104 = tpu.matmul %101, %103, %cst_86 {dimension_numbers = #tpu.dot_dimension_numbers<[1], [0], [0], [1], [0, 0, 1, 1], [], []>} : vector<10x64xbf16>, vector<64x128xbf16>, vector<10x128xf32> -> vector<10x128xf32>
    %105 = arith.addf %98, %104 : vector<10x128xf32>
    %c0_87 = arith.constant 0 : index
    %c18 = arith.constant 18 : index
    %c0_88 = arith.constant 0 : index
    %106 = vector.load %arg1[%c0_87, %c18, %c0_88] : memref<1x28x64xf32, #tpu.memory_space<vmem>>, vector<1x10x64xf32>
    %107 = vector.shape_cast %106 : vector<1x10x64xf32> to vector<10x64xf32>
    %108 = arith.truncf %107 : vector<10x64xf32> to vector<10x64xbf16>
    %c15_89 = arith.constant 15 : index
    %c0_90 = arith.constant 0 : index
    %c0_91 = arith.constant 0 : index
    %109 = vector.load %arg2[%c15_89, %c0_90, %c0_91] : memref<16x64x128xbf16, #tpu.memory_space<vmem>>, vector<1x64x128xbf16>
    %110 = vector.shape_cast %109 : vector<1x64x128xbf16> to vector<64x128xbf16>
    %cst_92 = arith.constant dense<0.000000e+00> : vector<10x128xf32>
    %111 = tpu.matmul %108, %110, %cst_92 {dimension_numbers = #tpu.dot_dimension_numbers<[1], [0], [0], [1], [0, 0, 1, 1], [], []>} : vector<10x64xbf16>, vector<64x128xbf16>, vector<10x128xf32> -> vector<10x128xf32>
    %112 = arith.addf %105, %111 : vector<10x128xf32>
    %c0_93 = arith.constant 0 : index
    %c0_94 = arith.constant 0 : index
    %113 = vector.load %arg3[%c0_93, %c0_94] : memref<1x128xf32, #tpu.memory_space<vmem>>, vector<1x128xf32>
    %114 = vector.broadcast %113 : vector<1x128xf32> to vector<10x128xf32>
    %115 = arith.addf %112, %114 : vector<10x128xf32>
    %c0_95 = arith.constant 0 : index
    %c0_96 = arith.constant 0 : index
    %c0_97 = arith.constant 0 : index
    %116 = vector.load %arg5[%c0_95, %c0_96, %c0_97] : memref<1x10x128xf32, #tpu.memory_space<vmem>>, vector<1x10x128xf32>
    %117 = vector.shape_cast %116 : vector<1x10x128xf32> to vector<10x128xf32>
    %118 = vector.shape_cast %115 : vector<10x128xf32> to vector<1x10x128xf32>
    tpu.vector_store %arg5[%c0_95, %c0_96, %c0_97], %118 {strides = array<i32>} : memref<1x10x128xf32, #tpu.memory_space<vmem>>, vector<1x10x128xf32>,
    return
  }
  func.func @transform_0(%arg0: i32) -> (i32, i32, i32) {
    %c0_i32 = arith.constant 0 : i32
    %c0_i32_0 = arith.constant 0 : i32
    %c0_i32_1 = arith.constant 0 : i32
    return %arg0, %c0_i32, %c0_i32_0 : i32, i32, i32
  }
  func.func @transform_1(%arg0: i32) -> (i32, i32, i32) {
    %c0_i32 = arith.constant 0 : i32
    %c0_i32_0 = arith.constant 0 : i32
    %c0_i32_1 = arith.constant 0 : i32
    %c0_i32_2 = arith.constant 0 : i32
    return %c0_i32, %c0_i32_0, %c0_i32_1 : i32, i32, i32
  }
  func.func @transform_2(%arg0: i32) -> (i32, i32) {
    %c0_i32 = arith.constant 0 : i32
    %c0_i32_0 = arith.constant 0 : i32
    %c0_i32_1 = arith.constant 0 : i32
    return %c0_i32, %c0_i32_0 : i32, i32
  }
  func.func @transform_3(%arg0: i32) -> (i32, i32) {
    %c0_i32 = arith.constant 0 : i32
    %c0_i32_0 = arith.constant 0 : i32
    %c0_i32_1 = arith.constant 0 : i32
    return %c0_i32, %c0_i32_0 : i32, i32
  }
  func.func @transform_4(%arg0: i32) -> (i32, i32, i32) {
    %c0_i32 = arith.constant 0 : i32
    %c0_i32_0 = arith.constant 0 : i32
    %c0_i32_1 = arith.constant 0 : i32
    return %arg0, %c0_i32, %c0_i32_0 : i32, i32, i32
  }
}

</mosaic_0001>

<bundles_post_ra>
// kernel: cyclegan_discriminator.5
= control target key start
LH: loop header
LB: loop body
LE: loop exit
PB: predicated region body
PF: predicated region fallthrough
CT: control target
= control target key end

     0   :  { %s2119_s15 = smov 0   ;;  %s2711_s0 = inlined_call_operand.vmem [shape: f32[2,290,12], index: 0, kind: input, shape index: {}]   ;;  %s2712_s1 = inlined_call_operand.vmem [shape: bf16[4,12,128], index: 1, kind: input, shape index: {}]   ;;  %s2713_s2 = inlined_call_operand.vmem [shape: f32[1,128], index: 2, kind: input, shape index: {}]   ;;  %s2714_s3 = inlined_call_operand.vmem [shape: f32[272,1], index: 3, kind: input, shape index: {}]   ;;  %s2715_s4 = inlined_call_operand.vmem [shape: f32[2,272,128], index: 4, kind: output, shape index: {}]  }
   0x1 LB: > { %s1628_s16 = sadd.s32 4294967295, %s2090_s15   ;;  %p1632_p0 = scmp.ge.s32.totalorder %s2090_s15, 1  ;;  %s2090_s15 = sphi %s2119_s15, %s14_s15  }
   0x2   : > { %p162_p1 = scmp.lt.s32.totalorder %s2090_s15, 3 }
   0x4   : > { %p163_p2 = pnand %p1632_p0, %p162_p1 }
   0x5   : > { %vm363_vm0 = vcmask (!%p163_p2), 1045504   ;;  %v2092_v0 = vmov (!%p163_p2), 0.0   ;;  %v2080_v1 = vld [vmem:[%s2712_s1 + $0x8] sm:$0x3f] (!%p163_p2)   ;;  %v2081_v2 = vld [vmem:[%s2712_s1] sm:$0x3f] (!%p163_p2)  }
   0x6   : > { %166 = sbr.rel (%p163_p2) target bundleno = 508 (0x1fc), region = 36  ;;  %1788 = vmatprep.subr.bf16.mxu0 (!%p163_p2), %v2092_v0  ;;  %1858 = vmatprep.subr.bf16.mxu1 (!%p163_p2), %v2092_v0  ;;  %p188_p3 = scmp.lt.s32.totalorder (!%p163_p2), %s1628_s16, 1  ;;  %v365_v3 = vsel (!%p163_p2), %vm363_vm0, %v2080_v1, 0  ;;  %vm2093_vm1 = vmmov (!%p163_p2), 0   ;;  %v593_v4 = vsel (!%p163_p2), %vm363_vm0, %v2081_v2, 0  ;;  %vm311_vm2 = vcmask (!%p163_p2), 97280  }
   0x7   : > { %1790 = vmatprep.mubr.msk.bf16.mxu0 (!%p163_p2), %vm2093_vm1, %v2092_v0  ;;  %1860 = vmatprep.mubr.msk.bf16.mxu1 (!%p163_p2), %vm2093_vm1, %v2092_v0  ;;  %v2082_v5 = vld [vmem:[%s2712_s1 + $0x10] sm:$0x3f] (!%p163_p2)   ;;  %v2083_v6 = vld [vmem:[%s2712_s1 + $0x18] sm:$0x3f] (!%p163_p2)  }
   0x8   : > { %1789 = vmatpush3.bf16.msra.mxu0 (!%p163_p2), %v365_v3  ;;  %1859 = vmatpush3.bf16.msra.mxu1 (!%p163_p2), %v593_v4  ;;  %v875_v12 = vsel (!%p163_p2), %vm363_vm0, %v2082_v5, 0  ;;  %v1191_v14 = vsel (!%p163_p2), %vm363_vm0, %v2083_v6, 0 }
   0x9   : > { %1928 = vmatprep.subr.bf16.mxu0 (!%p163_p2), %v2092_v0  ;;  %1998 = vmatprep.subr.bf16.mxu1 (!%p163_p2), %v2092_v0 }
   0xd   : > { %s2717_s16 = smov (!%p188_p3, %s1628_s16), 1 }
   0xe   : > { %s2068_s20 = smul.u32 296, %s2717_s16 }
   0xf   : > { %s2069_s30 = smul.u32 272, %s2717_s16 }
  0x10   : > { %s2155_s27 = scalar_lea.vmem %s2711_s0, %s2068_s20 }
  0x11   : > { %v252_v7 = vld [vmem:[%s2155_s27 + $0x1] sm:$0xff]  ;;  %v253_v8 = vld [vmem:[%s2155_s27 + $0x9] sm:$0xff]  ;;  %v254_v15 = vld [vmem:[%s2155_s27 + $0x11] sm:$0xff]  ;;  %s2607_s7 = scalar_lea.vmem %s2715_s4, %s2069_s30 }
  0x12   : > { %v199_v9 = vld [vmem:[%s2155_s27] sm:$0xff]  ;;  %v286_v10 = vpack.c.bf16 %v253_v8, %v252_v7  ;;  %v200_v11 = vld [vmem:[%s2155_s27 + $0x8] sm:$0xff]  ;;  %v201_v17 = vld [vmem:[%s2155_s27 + $0x10] sm:$0xff] }
  0x13   : > { %v233_v13 = vpack.c.bf16 %v200_v11, %v199_v9  ;;  %v255_v16 = vld [vmem:[%s2155_s27 + $0x19] sm:$0xff]  ;;  %v256_v21 = vld [vmem:[%s2155_s27 + $0x21] sm:$0xff]  ;;  %v257_v22 = vld [vmem:[%s2155_s27 + $0x29] sm:$0xff] }
  0x14   : > { %1791 = vmatmul.mubr.msk.bf16.vlgmr.msra.gmra.mrb[0].mxu0 %vm311_vm2, %v286_v10  ;;  %v202_v18 = vld [vmem:[%s2155_s27 + $0x18] sm:$0xff]  ;;  %v2173_v19 = vpack.c.bf16 %v255_v16, %v254_v15  ;;  %v203_v23 = vld [vmem:[%s2155_s27 + $0x20] sm:$0xff]  ;;  %v204_v24 = vld [vmem:[%s2155_s27 + $0x28] sm:$0xff]  ;;  %v2186_v25 = vpack.c.bf16 %v257_v22, %v256_v21 }
  0x15   : > { %1861 = vmatmul.mubr.msk.bf16.vlgmr.msra.gmra.mrb[0].mxu1 %vm311_vm2, %v233_v13  ;;  %1929 = vmatpush3.bf16.msra.mxu0 %v875_v12  ;;  %v234_v20 = vpack.c.bf16 %v202_v18, %v201_v17  ;;  %v235_v26 = vpack.c.bf16 %v204_v24, %v203_v23  ;;  %v258_v27 = vld [vmem:[%s2155_s27 + $0x31] sm:$0xff]  ;;  %v259_v28 = vld [vmem:[%s2155_s27 + $0x39] sm:$0xff]  ;;  %v260_v33 = vld [vmem:[%s2155_s27 + $0x41] sm:$0xff] }
  0x16   : > { %1999 = vmatpush3.bf16.msra.mxu1 %v1191_v14  ;;  %1794 = vmatprep.mubr.msk.bf16.mxu0 %vm2093_vm1, %v2092_v0  ;;  %v205_v29 = vld [vmem:[%s2155_s27 + $0x30] sm:$0xff]  ;;  %v206_v30 = vld [vmem:[%s2155_s27 + $0x38] sm:$0xff]  ;;  %v2199_v31 = vpack.c.bf16 %v259_v28, %v258_v27  ;;  %v207_v35 = vld [vmem:[%s2155_s27 + $0x40] sm:$0xff] }
  0x17   : > { %1864 = vmatprep.mubr.msk.bf16.mxu1 %vm2093_vm1, %v2092_v0  ;;  %v236_v32 = vpack.c.bf16 %v206_v30, %v205_v29  ;;  %v261_v34 = vld [vmem:[%s2155_s27 + $0x49] sm:$0xff]  ;;  %v262_v39 = vld [vmem:[%s2155_s27 + $0x51] sm:$0xff]  ;;  %v263_v40 = vld [vmem:[%s2155_s27 + $0x59] sm:$0xff] }
  0x18   : > { %v208_v36 = vld [vmem:[%s2155_s27 + $0x48] sm:$0xff]  ;;  %v2212_v37 = vpack.c.bf16 %v261_v34, %v260_v33  ;;  %v209_v41 = vld [vmem:[%s2155_s27 + $0x50] sm:$0xff]  ;;  %v210_v42 = vld [vmem:[%s2155_s27 + $0x58] sm:$0xff]  ;;  %v2225_v43 = vpack.c.bf16 %v263_v40, %v262_v39 }
  0x19   : > { %v237_v38 = vpack.c.bf16 %v208_v36, %v207_v35  ;;  %v238_v44 = vpack.c.bf16 %v210_v42, %v209_v41  ;;  %v264_v45 = vld [vmem:[%s2155_s27 + $0x61] sm:$0xff]  ;;  %v265_v46 = vld [vmem:[%s2155_s27 + $0x69] sm:$0xff]  ;;  %v266_v51 = vld [vmem:[%s2155_s27 + $0x71] sm:$0xff] }
  0x1a   : > { %v211_v47 = vld [vmem:[%s2155_s27 + $0x60] sm:$0xff]  ;;  %v212_v48 = vld [vmem:[%s2155_s27 + $0x68] sm:$0xff]  ;;  %v2238_v49 = vpack.c.bf16 %v265_v46, %v264_v45  ;;  %v213_v53 = vld [vmem:[%s2155_s27 + $0x70] sm:$0xff] }
  0x1b   : > { %v239_v50 = vpack.c.bf16 %v212_v48, %v211_v47  ;;  %v267_v52 = vld [vmem:[%s2155_s27 + $0x79] sm:$0xff]  ;;  %v268_v57 = vld [vmem:[%s2155_s27 + $0x81] sm:$0xff]  ;;  %v269_v58 = vld [vmem:[%s2155_s27 + $0x89] sm:$0xff] }
  0x1c   : > { %1795 = vmatmul.mubr.msk.bf16.gmra.mrb[4].mxu0 %vm311_vm2, %v2173_v19  ;;  %v214_v54 = vld [vmem:[%s2155_s27 + $0x78] sm:$0xff]  ;;  %v2251_v55 = vpack.c.bf16 %v267_v52, %v266_v51  ;;  %v215_v59 = vld [vmem:[%s2155_s27 + $0x80] sm:$0xff]  ;;  %v216_v60 = vld [vmem:[%s2155_s27 + $0x88] sm:$0xff]  ;;  %v2264_v61 = vpack.c.bf16 %v269_v58, %v268_v57 }
  0x1d   : > { %1865 = vmatmul.mubr.msk.bf16.gmra.mrb[4].mxu1 %vm311_vm2, %v234_v20  ;;  %1798 = vmatprep.mubr.msk.bf16.mxu0 %vm2093_vm1, %v2092_v0  ;;  %v240_v56 = vpack.c.bf16 %v214_v54, %v213_v53  ;;  %v241_v62 = vpack.c.bf16 %v216_v60, %v215_v59  ;;  %v270_v63 = vld [vmem:[%s2155_s27 + $0x91] sm:$0xff]  ;;  %v271_v1 = vld [vmem:[%s2155_s27 + $0x99] sm:$0xff]  ;;  %v272_v6 = vld [vmem:[%s2155_s27 + $0xa1] sm:$0xff] }
  0x1e   : > { %1868 = vmatprep.mubr.msk.bf16.mxu1 %vm2093_vm1, %v2092_v0  ;;  %v217_v2 = vld [vmem:[%s2155_s27 + $0x90] sm:$0xff]  ;;  %v218_v3 = vld [vmem:[%s2155_s27 + $0x98] sm:$0xff]  ;;  %v2277_v4 = vpack.c.bf16 %v271_v1, %v270_v63  ;;  %v219_v8 = vld [vmem:[%s2155_s27 + $0xa0] sm:$0xff] }
  0x1f   : > { %v242_v5 = vpack.c.bf16 %v218_v3, %v217_v2  ;;  %v273_v7 = vld [vmem:[%s2155_s27 + $0xa9] sm:$0xff]  ;;  %v274_v12 = vld [vmem:[%s2155_s27 + $0xb1] sm:$0xff]  ;;  %v275_v13 = vld [vmem:[%s2155_s27 + $0xb9] sm:$0xff] }
  0x20   : > { %v220_v9 = vld [vmem:[%s2155_s27 + $0xa8] sm:$0xff]  ;;  %v2290_v10 = vpack.c.bf16 %v273_v7, %v272_v6  ;;  %v221_v14 = vld [vmem:[%s2155_s27 + $0xb0] sm:$0xff]  ;;  %v222_v15 = vld [vmem:[%s2155_s27 + $0xb8] sm:$0xff]  ;;  %v2303_v16 = vpack.c.bf16 %v275_v13, %v274_v12 }
  0x21   : > { %v243_v11 = vpack.c.bf16 %v220_v9, %v219_v8  ;;  %v244_v17 = vpack.c.bf16 %v222_v15, %v221_v14  ;;  %v276_v18 = vld [vmem:[%s2155_s27 + $0xc1] sm:$0xff]  ;;  %v277_v20 = vld [vmem:[%s2155_s27 + $0xc9] sm:$0xff]  ;;  %v279_v27 = vld [vmem:[%s2155_s27 + $0xd9] sm:$0xff] }
  0x22   : > { %v223_v21 = vld [vmem:[%s2155_s27 + $0xc0] sm:$0xff]  ;;  %v224_v22 = vld [vmem:[%s2155_s27 + $0xc8] sm:$0xff]  ;;  %v2316_v23 = vpack.c.bf16 %v277_v20, %v276_v18  ;;  %v225_v28 = vld [vmem:[%s2155_s27 + $0xd0] sm:$0xff] }
  0x23   : > { %v245_v24 = vpack.c.bf16 %v224_v22, %v223_v21  ;;  %v226_v29 = vld [vmem:[%s2155_s27 + $0xd8] sm:$0xff]  ;;  %v280_v33 = vld [vmem:[%s2155_s27 + $0xe1] sm:$0xff]  ;;  %v281_v34 = vld [vmem:[%s2155_s27 + $0xe9] sm:$0xff] }
  0x24   : > { %1799 = vmatmul.mubr.msk.bf16.gmra.mrb[8].mxu0 %vm311_vm2, %v2186_v25  ;;  %v227_v35 = vld [vmem:[%s2155_s27 + $0xe0] sm:$0xff]  ;;  %v228_v36 = vld [vmem:[%s2155_s27 + $0xe8] sm:$0xff]  ;;  %v282_v40 = vld [vmem:[%s2155_s27 + $0xf1] sm:$0xff] }
  0x25   : > { %1869 = vmatmul.mubr.msk.bf16.gmra.mrb[8].mxu1 %vm311_vm2, %v235_v26  ;;  %1802 = vmatprep.mubr.msk.bf16.mxu0 %vm2093_vm1, %v2092_v0  ;;  %v278_v26 = vld [vmem:[%s2155_s27 + $0xd1] sm:$0xff]  ;;  %v247_v39 = vpack.c.bf16 %v228_v36, %v227_v35  ;;  %v283_v41 = vld [vmem:[%s2155_s27 + $0xf9] sm:$0xff]  ;;  %v284_v47 = vld [vmem:[%s2155_s27 + $0x101] sm:$0xff] }
  0x26   : > { %1872 = vmatprep.mubr.msk.bf16.mxu1 %vm2093_vm1, %v2092_v0  ;;  %v2329_v30 = vpack.c.bf16 %v279_v27, %v278_v26  ;;  %v229_v42 = vld [vmem:[%s2155_s27 + $0xf0] sm:$0xff]  ;;  %v2355_v45 = vpack.c.bf16 %v283_v41, %v282_v40  ;;  %v232_v51 = vld [vmem:[%s2155_s27 + $0x108] sm:$0xff]  ;;  %v1089_v3 = vld [vmem:[%s2155_s27 + $0x5a] sm:$0xff] }
  0x27   : > { %v285_v48 = vld [vmem:[%s2155_s27 + $0x109] sm:$0xff]  ;;  %v1080_v54 = vld [vmem:[%s2155_s27 + $0x12] sm:$0xff]  ;;  %v1093_v8 = vld [vmem:[%s2155_s27 + $0x7a] sm:$0xff] }
  0x28   : > { %v2368_v52 = vpack.c.bf16 %v285_v48, %v284_v47  ;;  %v1082_v58 = vld [vmem:[%s2155_s27 + $0x22] sm:$0xff]  ;;  %v1083_v59 = vld [vmem:[%s2155_s27 + $0x2a] sm:$0xff]  ;;  %v1097_v13 = vld [vmem:[%s2155_s27 + $0x9a] sm:$0xff] }
  0x29   : > { %v1115_v60 = vpack.c.bf16 %v1083_v59, %v1082_v58  ;;  %v1087_v1 = vld [vmem:[%s2155_s27 + $0x4a] sm:$0xff]  ;;  %v1101_v18 = vld [vmem:[%s2155_s27 + $0xba] sm:$0xff] }
  0x2a   : > { %v1091_v6 = vld [vmem:[%s2155_s27 + $0x6a] sm:$0xff] }
  0x2b   : > { %v1099_v15 = vld [vmem:[%s2155_s27 + $0xaa] sm:$0xff] }
  0x2c   : > { %1803 = vmatmul.mubr.msk.bf16.gmra.mrb[12].mxu0 %vm311_vm2, %v2199_v31  ;;  %v1103_v35 = vld [vmem:[%s2155_s27 + $0xca] sm:$0xff] }
  0x2d   : > { %1873 = vmatmul.mubr.msk.bf16.gmra.mrb[12].mxu1 %vm311_vm2, %v236_v32  ;;  %1806 = vmatprep.mubr.msk.bf16.mxu0 %vm2093_vm1, %v2092_v0  ;;  %v246_v32 = vpack.c.bf16 %v226_v29, %v225_v28 }
  0x2e   : > { %1876 = vmatprep.mubr.msk.bf16.mxu1 %vm2093_vm1, %v2092_v0 }
  0x34   : > { %1807 = vmatmul.mubr.msk.bf16.gmra.mrb[16].mxu0 %vm311_vm2, %v2212_v37 }
  0x35   : > { %1877 = vmatmul.mubr.msk.bf16.gmra.mrb[16].mxu1 %vm311_vm2, %v237_v38  ;;  %1810 = vmatprep.mubr.msk.bf16.mxu0 %vm2093_vm1, %v2092_v0  ;;  %v2342_v38 = vpack.c.bf16 %v281_v34, %v280_v33  ;;  %v1102_v34 = vld [vmem:[%s2155_s27 + $0xc2] sm:$0xff] }
  0x36   : > { %1880 = vmatprep.mubr.msk.bf16.mxu1 %vm2093_vm1, %v2092_v0 }
  0x3c   : > { %1811 = vmatmul.mubr.msk.bf16.gmra.mrb[20].mxu0 %vm311_vm2, %v2225_v43 }
  0x3d   : > { %1881 = vmatmul.mubr.msk.bf16.gmra.mrb[20].mxu1 %vm311_vm2, %v238_v44  ;;  %1814 = vmatprep.mubr.msk.bf16.mxu0 %vm2093_vm1, %v2092_v0  ;;  %v230_v44 = vld [vmem:[%s2155_s27 + $0xf8] sm:$0xff] }
  0x3e   : > { %1884 = vmatprep.mubr.msk.bf16.mxu1 %vm2093_vm1, %v2092_v0  ;;  %v248_v46 = vpack.c.bf16 %v230_v44, %v229_v42 }
  0x44   : > { %1815 = vmatmul.mubr.msk.bf16.gmra.mrb[24].mxu0 %vm311_vm2, %v2238_v49 }
  0x45   : > { %1885 = vmatmul.mubr.msk.bf16.gmra.mrb[24].mxu1 %vm311_vm2, %v239_v50  ;;  %1818 = vmatprep.mubr.msk.bf16.mxu0 %vm2093_vm1, %v2092_v0  ;;  %v231_v50 = vld [vmem:[%s2155_s27 + $0x100] sm:$0xff] }
  0x46   : > { %1888 = vmatprep.mubr.msk.bf16.mxu1 %vm2093_vm1, %v2092_v0  ;;  %v249_v53 = vpack.c.bf16 %v232_v51, %v231_v50  ;;  %v1104_v51 = vld [vmem:[%s2155_s27 + $0xd2] sm:$0xff] }
  0x4c   : > { %1819 = vmatmul.mubr.msk.bf16.gmra.mrb[28].mxu0 %vm311_vm2, %v2251_v55 }
  0x4d   : > { %1889 = vmatmul.mubr.msk.bf16.gmra.mrb[28].mxu1 %vm311_vm2, %v240_v56  ;;  %1822 = vmatprep.mubr.msk.bf16.mxu0 %vm2093_vm1, %v2092_v0  ;;  %v1081_v56 = vld [vmem:[%s2155_s27 + $0x1a] sm:$0xff] }
  0x4e   : > { %1892 = vmatprep.mubr.msk.bf16.mxu1 %vm2093_vm1, %v2092_v0  ;;  %v1114_v57 = vpack.c.bf16 %v1081_v56, %v1080_v54 }
  0x54   : > { %1823 = vmatmul.mubr.msk.bf16.gmra.mrb[32].mxu0 %vm311_vm2, %v2264_v61 }
  0x55   : > { %1893 = vmatmul.mubr.msk.bf16.gmra.mrb[32].mxu1 %vm311_vm2, %v241_v62  ;;  %1826 = vmatprep.mubr.msk.bf16.mxu0 %vm2093_vm1, %v2092_v0  ;;  %v1085_v62 = vld [vmem:[%s2155_s27 + $0x3a] sm:$0xff] }
  0x56   : > { %1896 = vmatprep.mubr.msk.bf16.mxu1 %vm2093_vm1, %v2092_v0 }
  0x5c   : > { %1827 = vmatmul.mubr.msk.bf16.gmra.mrb[36].mxu0 %vm311_vm2, %v2277_v4 }
  0x5d   : > { %1897 = vmatmul.mubr.msk.bf16.gmra.mrb[36].mxu1 %vm311_vm2, %v242_v5  ;;  %1830 = vmatprep.mubr.msk.bf16.mxu0 %vm2093_vm1, %v2092_v0 }
  0x5e   : > { %1900 = vmatprep.mubr.msk.bf16.mxu1 %vm2093_vm1, %v2092_v0 }
  0x64   : > { %1831 = vmatmul.mubr.msk.bf16.gmra.mrb[40].mxu0 %vm311_vm2, %v2290_v10 }
  0x65   : > { %1901 = vmatmul.mubr.msk.bf16.gmra.mrb[40].mxu1 %vm311_vm2, %v243_v11  ;;  %1834 = vmatprep.mubr.msk.bf16.mxu0 %vm2093_vm1, %v2092_v0  ;;  %v1095_v11 = vld [vmem:[%s2155_s27 + $0x8a] sm:$0xff] }
  0x66   : > { %1904 = vmatprep.mubr.msk.bf16.mxu1 %vm2093_vm1, %v2092_v0 }
  0x6c   : > { %1835 = vmatmul.mubr.msk.bf16.gmra.mrb[44].mxu0 %vm311_vm2, %v2303_v16 }
  0x6d   : > { %1905 = vmatmul.mubr.msk.bf16.gmra.mrb[44].mxu1 %vm311_vm2, %v244_v17  ;;  %1838 = vmatprep.mubr.msk.bf16.mxu0 %vm2093_vm1, %v2092_v0 }
  0x6e   : > { %1908 = vmatprep.mubr.msk.bf16.mxu1 %vm2093_vm1, %v2092_v0 }
  0x74   : > { %1839 = vmatmul.mubr.msk.bf16.gmra.mrb[48].mxu0 %vm311_vm2, %v2316_v23 }
  0x75   : > { %1909 = vmatmul.mubr.msk.bf16.gmra.mrb[48].mxu1 %vm311_vm2, %v245_v24  ;;  %1842 = vmatprep.mubr.msk.bf16.mxu0 %vm2093_vm1, %v2092_v0 }
  0x76   : > { %1912 = vmatprep.mubr.msk.bf16.mxu1 %vm2093_vm1, %v2092_v0 }
  0x7c   : > { %1843 = vmatmul.mubr.msk.bf16.gmra.mrb[52].mxu0 %vm311_vm2, %v2329_v30 }
  0x7d   : > { %1913 = vmatmul.mubr.msk.bf16.gmra.mrb[52].mxu1 %vm311_vm2, %v246_v32  ;;  %1846 = vmatprep.mubr.msk.bf16.mxu0 %vm2093_vm1, %v2092_v0 }
  0x7e   : > { %1916 = vmatprep.mubr.msk.bf16.mxu1 %vm2093_vm1, %v2092_v0 }
  0x84   : > { %1847 = vmatmul.mubr.msk.bf16.gmra.mrb[56].mxu0 %vm311_vm2, %v2342_v38 }
  0x85   : > { %1917 = vmatmul.mubr.msk.bf16.gmra.mrb[56].mxu1 %vm311_vm2, %v247_v39  ;;  %1850 = vmatprep.mubr.msk.bf16.mxu0 %vm2093_vm1, %v2092_v0 }
  0x86   : > { %1920 = vmatprep.mubr.msk.bf16.mxu1 %vm2093_vm1, %v2092_v0 }
  0x8c   : > { %1851 = vmatmul.mubr.msk.bf16.gmra.mrb[60].mxu0 %vm311_vm2, %v2355_v45 }
  0x8d   : > { %1921 = vmatmul.mubr.msk.bf16.gmra.mrb[60].mxu1 %vm311_vm2, %v248_v46  ;;  %1854 = vmatprep.mubr.msk.bf16.mxu0 %vm2093_vm1, %v2092_v0 }
  0x8e   : > { %1924 = vmatprep.mubr.msk.bf16.mxu1 %vm2093_vm1, %v2092_v0 }
  0x94   : > { %1855 = vmatmul.mubr.msk.bf16.gmra.mrb[64].mxu0 %vm311_vm2, %v2368_v52 }
  0x95   : > { %1925 = vmatmul.mubr.msk.bf16.gmra.mrb[64].mxu1 %vm311_vm2, %v249_v53  ;;  %1930 = vmatprep.mubr.msk.bf16.mxu0 %vm2093_vm1, %v2092_v0  ;;  %v1105_v53 = vld [vmem:[%s2155_s27 + $0xda] sm:$0xff] }
  0x96   : > { %2000 = vmatprep.mubr.msk.bf16.mxu1 %vm2093_vm1, %v2092_v0 }
  0x9c   : > { %1931 = vmatmul.mubr.msk.bf16.vlgmr.msra.gmra.mrb[68].mxu0 %vm311_vm2, %v2173_v19  ;;  %v1084_v19 = vld [vmem:[%s2155_s27 + $0x32] sm:$0xff] }
  0x9d   : > { %2001 = vmatmul.mubr.msk.bf16.vlgmr.msra.gmra.mrb[68].mxu1 %vm311_vm2, %v1114_v57  ;;  %1934 = vmatprep.mubr.msk.bf16.mxu0 %vm2093_vm1, %v2092_v0  ;;  %v1116_v63 = vpack.c.bf16 %v1085_v62, %v1084_v19 }
  0x9e   : > { %2004 = vmatprep.mubr.msk.bf16.mxu1 %vm2093_vm1, %v2092_v0 }
  0xa4   : > { %1935 = vmatmul.mubr.msk.bf16.gmra.mrb[72].mxu0 %vm311_vm2, %v2186_v25  ;;  %v1086_v25 = vld [vmem:[%s2155_s27 + $0x42] sm:$0xff] }
  0xa5   : > { %2005 = vmatmul.mubr.msk.bf16.gmra.mrb[72].mxu1 %vm311_vm2, %v1115_v60  ;;  %1938 = vmatprep.mubr.msk.bf16.mxu0 %vm2093_vm1, %v2092_v0  ;;  %v1117_v2 = vpack.c.bf16 %v1087_v1, %v1086_v25  ;;  %v1106_v1 = vld [vmem:[%s2155_s27 + $0xe2] sm:$0xff] }
  0xa6   : > { %2008 = vmatprep.mubr.msk.bf16.mxu1 %vm2093_vm1, %v2092_v0 }
  0xac   : > { %1939 = vmatmul.mubr.msk.bf16.gmra.mrb[76].mxu0 %vm311_vm2, %v2199_v31  ;;  %v1088_v31 = vld [vmem:[%s2155_s27 + $0x52] sm:$0xff] }
  0xad   : > { %2009 = vmatmul.mubr.msk.bf16.gmra.mrb[76].mxu1 %vm311_vm2, %v1116_v63  ;;  %1942 = vmatprep.mubr.msk.bf16.mxu0 %vm2093_vm1, %v2092_v0  ;;  %v1118_v5 = vpack.c.bf16 %v1089_v3, %v1088_v31 }
  0xae   : > { %2012 = vmatprep.mubr.msk.bf16.mxu1 %vm2093_vm1, %v2092_v0 }
  0xb4   : > { %1943 = vmatmul.mubr.msk.bf16.gmra.mrb[80].mxu0 %vm311_vm2, %v2212_v37  ;;  %v1090_v37 = vld [vmem:[%s2155_s27 + $0x62] sm:$0xff] }
  0xb5   : > { %2013 = vmatmul.mubr.msk.bf16.gmra.mrb[80].mxu1 %vm311_vm2, %v1117_v2  ;;  %1946 = vmatprep.mubr.msk.bf16.mxu0 %vm2093_vm1, %v2092_v0  ;;  %v1119_v7 = vpack.c.bf16 %v1091_v6, %v1090_v37  ;;  %v1107_v2 = vld [vmem:[%s2155_s27 + $0xea] sm:$0xff] }
  0xb6   : > { %2016 = vmatprep.mubr.msk.bf16.mxu1 %vm2093_vm1, %v2092_v0 }
  0xbc   : > { %1947 = vmatmul.mubr.msk.bf16.gmra.mrb[84].mxu0 %vm311_vm2, %v2225_v43  ;;  %v1092_v43 = vld [vmem:[%s2155_s27 + $0x72] sm:$0xff] }
  0xbd   : > { %2017 = vmatmul.mubr.msk.bf16.gmra.mrb[84].mxu1 %vm311_vm2, %v1118_v5  ;;  %1950 = vmatprep.mubr.msk.bf16.mxu0 %vm2093_vm1, %v2092_v0  ;;  %v1120_v9 = vpack.c.bf16 %v1093_v8, %v1092_v43 }
  0xbe   : > { %2020 = vmatprep.mubr.msk.bf16.mxu1 %vm2093_vm1, %v2092_v0 }
  0xc4   : > { %1951 = vmatmul.mubr.msk.bf16.gmra.mrb[88].mxu0 %vm311_vm2, %v2238_v49  ;;  %v1094_v49 = vld [vmem:[%s2155_s27 + $0x82] sm:$0xff] }
  0xc5   : > { %2021 = vmatmul.mubr.msk.bf16.gmra.mrb[88].mxu1 %vm311_vm2, %v1119_v7  ;;  %1954 = vmatprep.mubr.msk.bf16.mxu0 %vm2093_vm1, %v2092_v0  ;;  %v1121_v12 = vpack.c.bf16 %v1095_v11, %v1094_v49  ;;  %v1108_v11 = vld [vmem:[%s2155_s27 + $0xf2] sm:$0xff] }
  0xc6   : > { %2024 = vmatprep.mubr.msk.bf16.mxu1 %vm2093_vm1, %v2092_v0 }
  0xcc   : > { %1955 = vmatmul.mubr.msk.bf16.gmra.mrb[92].mxu0 %vm311_vm2, %v2251_v55  ;;  %v1096_v55 = vld [vmem:[%s2155_s27 + $0x92] sm:$0xff] }
  0xcd   : > { %2025 = vmatmul.mubr.msk.bf16.gmra.mrb[92].mxu1 %vm311_vm2, %v1120_v9  ;;  %1958 = vmatprep.mubr.msk.bf16.mxu0 %vm2093_vm1, %v2092_v0  ;;  %v1122_v14 = vpack.c.bf16 %v1097_v13, %v1096_v55 }
  0xce   : > { %2028 = vmatprep.mubr.msk.bf16.mxu1 %vm2093_vm1, %v2092_v0 }
  0xd4   : > { %1959 = vmatmul.mubr.msk.bf16.gmra.mrb[96].mxu0 %vm311_vm2, %v2264_v61  ;;  %v1098_v61 = vld [vmem:[%s2155_s27 + $0xa2] sm:$0xff] }
  0xd5   : > { %2029 = vmatmul.mubr.msk.bf16.gmra.mrb[96].mxu1 %vm311_vm2, %v1121_v12  ;;  %1962 = vmatprep.mubr.msk.bf16.mxu0 %vm2093_vm1, %v2092_v0  ;;  %v1123_v17 = vpack.c.bf16 %v1099_v15, %v1098_v61  ;;  %v1109_v12 = vld [vmem:[%s2155_s27 + $0xfa] sm:$0xff] }
  0xd6   : > { %2032 = vmatprep.mubr.msk.bf16.mxu1 %vm2093_vm1, %v2092_v0 }
  0xdc   : > { %1963 = vmatmul.mubr.msk.bf16.gmra.mrb[100].mxu0 %vm311_vm2, %v2277_v4  ;;  %v1100_v4 = vld [vmem:[%s2155_s27 + $0xb2] sm:$0xff] }
  0xdd   : > { %2033 = vmatmul.mubr.msk.bf16.gmra.mrb[100].mxu1 %vm311_vm2, %v1122_v14  ;;  %1966 = vmatprep.mubr.msk.bf16.mxu0 %vm2093_vm1, %v2092_v0 }
  0xde   : > { %2036 = vmatprep.mubr.msk.bf16.mxu1 %vm2093_vm1, %v2092_v0 }
  0xe4   : > { %1967 = vmatmul.mubr.msk.bf16.gmra.mrb[104].mxu0 %vm311_vm2, %v2290_v10  ;;  %v1124_v10 = vpack.c.bf16 %v1101_v18, %v1100_v4 }
  0xe5   : > { %2037 = vmatmul.mubr.msk.bf16.gmra.mrb[104].mxu1 %vm311_vm2, %v1123_v17  ;;  %1970 = vmatprep.mubr.msk.bf16.mxu0 %vm2093_vm1, %v2092_v0 }
  0xe6   : > { %2040 = vmatprep.mubr.msk.bf16.mxu1 %vm2093_vm1, %v2092_v0 }
  0xe7   : > { %v401_v20 = vpop.f32.mrb[0].mxu0 }
  0xe8   : > { %v629_v21 = vpop.f32.mrb[0].mxu1  ;;  %v1792_v22 = vpop.f32.mrb[1].mxu0 }
  0xe9   : > { %v2469_v24 = vadd.f32 %v629_v21, %v401_v20  ;;  %v1862_v26 = vpop.f32.mrb[1].mxu1  ;;  %v404_v27 = vpop.f32.mrb[2].mxu0  ;;  %v1110_v22 = vld [vmem:[%s2155_s27 + $0x102] sm:$0xff] }
  0xea   : > { %v632_v28 = vpop.f32.mrb[2].mxu1  ;;  %v1793_v29 = vpop.f32.mrb[3].mxu0  ;;  %v1111_v26 = vld [vmem:[%s2155_s27 + $0x10a] sm:$0xff] }
  0xeb   : > { %v2471_v32 = vadd.f32 %v632_v28, %v404_v27  ;;  %v1863_v33 = vpop.f32.mrb[3].mxu1 }
  0xec   : > { %1971 = vmatmul.mubr.msk.bf16.gmra.mrb[108].mxu0 %vm311_vm2, %v2303_v16  ;;  %v1125_v16 = vpack.c.bf16 %v1103_v35, %v1102_v34  ;;  %v1129_v34 = vpack.c.bf16 %v1111_v26, %v1110_v22 }
  0xed   : > { %2041 = vmatmul.mubr.msk.bf16.gmra.mrb[108].mxu1 %vm311_vm2, %v1124_v10  ;;  %1974 = vmatprep.mubr.msk.bf16.mxu0 %vm2093_vm1, %v2092_v0 }
  0xee   : > { %2044 = vmatprep.mubr.msk.bf16.mxu1 %vm2093_vm1, %v2092_v0 }
  0xef   : > { %v409_v36 = vpop.f32.mrb[4].mxu0 }
  0xf0   : > { %v637_v39 = vpop.f32.mrb[4].mxu1  ;;  %v1796_v40 = vpop.f32.mrb[5].mxu0 }
  0xf1   : > { %v2482_v41 = vadd.f32 %v637_v39, %v409_v36  ;;  %v1866_v42 = vpop.f32.mrb[5].mxu1  ;;  %v412_v44 = vpop.f32.mrb[6].mxu0 }
  0xf2   : > { %v640_v46 = vpop.f32.mrb[6].mxu1  ;;  %v1797_v47 = vpop.f32.mrb[7].mxu0  ;;  %v796_v42 = vld [vmem:[%s2155_s27 + $0x111] sm:$0xff] }
  0xf3   : > { %v2484_v48 = vadd.f32 %v640_v46, %v412_v44  ;;  %v1867_v50 = vpop.f32.mrb[7].mxu1  ;;  %v797_v44 = vld [vmem:[%s2155_s27 + $0x119] sm:$0xff] }
  0xf4   : > { %1975 = vmatmul.mubr.msk.bf16.gmra.mrb[112].mxu0 %vm311_vm2, %v2316_v23  ;;  %v1126_v23 = vpack.c.bf16 %v1105_v53, %v1104_v51  ;;  %v1113_v46 = vld [vmem:[%s2155_s27 + $0x11a] sm:$0xff]  ;;  %v814_v53 = vpack.c.bf16 %v797_v44, %v796_v42 }
  0xf5   : > { %2045 = vmatmul.mubr.msk.bf16.gmra.mrb[112].mxu1 %vm311_vm2, %v1125_v16  ;;  %1978 = vmatprep.mubr.msk.bf16.mxu0 %vm2093_vm1, %v2092_v0  ;;  %v1112_v16 = vld [vmem:[%s2155_s27 + $0x112] sm:$0xff] }
  0xf6   : > { %2048 = vmatprep.mubr.msk.bf16.mxu1 %vm2093_vm1, %v2092_v0 }
  0xf7   : > { %v417_v54 = vpop.f32.mrb[8].mxu0 }
  0xf8   : > { %v645_v56 = vpop.f32.mrb[8].mxu1  ;;  %v1800_v57 = vpop.f32.mrb[9].mxu0 }
  0xf9   : > { %v2495_v58 = vadd.f32 %v645_v56, %v417_v54  ;;  %v1870_v59 = vpop.f32.mrb[9].mxu1  ;;  %v420_v60 = vpop.f32.mrb[10].mxu0  ;;  %v1130_v57 = vpack.c.bf16 %v1113_v46, %v1112_v16 }
  0xfa   : > { %v648_v19 = vpop.f32.mrb[10].mxu1  ;;  %v1801_v62 = vpop.f32.mrb[11].mxu0 }
  0xfb   : > { %v2497_v63 = vadd.f32 %v648_v19, %v420_v60  ;;  %v1871_v25 = vpop.f32.mrb[11].mxu1 }
  0xfc   : > { %1979 = vmatmul.mubr.msk.bf16.gmra.mrb[116].mxu0 %vm311_vm2, %v2329_v30  ;;  %v1127_v30 = vpack.c.bf16 %v1107_v2, %v1106_v1 }
  0xfd   : > { %2049 = vmatmul.mubr.msk.bf16.gmra.mrb[116].mxu1 %vm311_vm2, %v1126_v23  ;;  %1982 = vmatprep.mubr.msk.bf16.mxu0 %vm2093_vm1, %v2092_v0 }
  0xfe   : > { %2052 = vmatprep.mubr.msk.bf16.mxu1 %vm2093_vm1, %v2092_v0 }
  0xff   : > { %v425_v31 = vpop.f32.mrb[12].mxu0 }
 0x100   : > { %v653_v3 = vpop.f32.mrb[12].mxu1  ;;  %v1804_v5 = vpop.f32.mrb[13].mxu0 }
 0x101   : > { %v2508_v37 = vadd.f32 %v653_v3, %v425_v31  ;;  %v1874_v6 = vpop.f32.mrb[13].mxu1  ;;  %v428_v7 = vpop.f32.mrb[14].mxu0 }
 0x102   : > { %v656_v43 = vpop.f32.mrb[14].mxu1  ;;  %v1805_v8 = vpop.f32.mrb[15].mxu0 }
 0x103   : > { %v2510_v9 = vadd.f32 %v656_v43, %v428_v7  ;;  %v1875_v49 = vpop.f32.mrb[15].mxu1 }
 0x104   : > { %1983 = vmatmul.mubr.msk.bf16.gmra.mrb[120].mxu0 %vm311_vm2, %v2342_v38  ;;  %v1128_v38 = vpack.c.bf16 %v1109_v12, %v1108_v11 }
 0x105   : > { %2053 = vmatmul.mubr.msk.bf16.gmra.mrb[120].mxu1 %vm311_vm2, %v1127_v30  ;;  %1986 = vmatprep.mubr.msk.bf16.mxu0 %vm2093_vm1, %v2092_v0 }
 0x106   : > { %2056 = vmatprep.mubr.msk.bf16.mxu1 %vm2093_vm1, %v2092_v0 }
 0x107   : > { %v433_v55 = vpop.f32.mrb[16].mxu0 }
 0x108   : > { %v661_v13 = vpop.f32.mrb[16].mxu1  ;;  %v1808_v14 = vpop.f32.mrb[17].mxu0 }
 0x109   : > { %v2521_v61 = vadd.f32 %v661_v13, %v433_v55  ;;  %v1878_v15 = vpop.f32.mrb[17].mxu1  ;;  %v436_v17 = vpop.f32.mrb[18].mxu0 }
 0x10a   : > { %v664_v4 = vpop.f32.mrb[18].mxu1  ;;  %v1809_v18 = vpop.f32.mrb[19].mxu0 }
 0x10b   : > { %v2523_v20 = vadd.f32 %v664_v4, %v436_v17  ;;  %v1879_v21 = vpop.f32.mrb[19].mxu1 }
 0x10c   : > { %1987 = vmatmul.mubr.msk.bf16.gmra.mrb[124].mxu0 %vm311_vm2, %v2355_v45 }
 0x10d   : > { %2057 = vmatmul.mubr.msk.bf16.gmra.mrb[124].mxu1 %vm311_vm2, %v1128_v38  ;;  %1990 = vmatprep.mubr.msk.bf16.mxu0 %vm2093_vm1, %v2092_v0 }
 0x10e   : > { %2060 = vmatprep.mubr.msk.bf16.mxu1 %vm2093_vm1, %v2092_v0 }
 0x10f   : > { %v441_v27 = vpop.f32.mrb[20].mxu0 }
 0x110   : > { %v669_v10 = vpop.f32.mrb[20].mxu1  ;;  %v1812_v28 = vpop.f32.mrb[21].mxu0 }
 0x111   : > { %v2534_v29 = vadd.f32 %v669_v10, %v441_v27  ;;  %v1882_v45 = vpop.f32.mrb[21].mxu1  ;;  %v444_v33 = vpop.f32.mrb[22].mxu0 }
 0x112   : > { %v672_v35 = vpop.f32.mrb[22].mxu1  ;;  %v1813_v36 = vpop.f32.mrb[23].mxu0 }
 0x113   : > { %v2536_v39 = vadd.f32 %v672_v35, %v444_v33  ;;  %v1883_v40 = vpop.f32.mrb[23].mxu1 }
 0x114   : > { %1991 = vmatmul.mubr.msk.bf16.gmra.mrb[128].mxu0 %vm311_vm2, %v2368_v52 }
 0x115   : > { %2061 = vmatmul.mubr.msk.bf16.gmra.mrb[128].mxu1 %vm311_vm2, %v1129_v34  ;;  %1994 = vmatprep.mubr.msk.bf16.mxu0 %vm2093_vm1, %v2092_v0 }
 0x116   : > { %2064 = vmatprep.mubr.msk.bf16.mxu1 %vm2093_vm1, %v2092_v0 }
 0x117   : > { %v449_v47 = vpop.f32.mrb[24].mxu0 }
 0x118   : > { %v677_v50 = vpop.f32.mrb[24].mxu1  ;;  %v1816_v51 = vpop.f32.mrb[25].mxu0 }
 0x119   : > { %v2549_v54 = vadd.f32 %v677_v50, %v449_v47  ;;  %v1886_v56 = vpop.f32.mrb[25].mxu1  ;;  %v452_v52 = vpop.f32.mrb[26].mxu0 }
 0x11a   : > { %v680_v59 = vpop.f32.mrb[26].mxu1  ;;  %v1817_v60 = vpop.f32.mrb[27].mxu0 }
 0x11b   : > { %v2551_v23 = vadd.f32 %v680_v59, %v452_v52  ;;  %v1887_v19 = vpop.f32.mrb[27].mxu1 }
 0x11c   : > { %1995 = vmatmul.mubr.msk.bf16.gmra.mrb[132].mxu0 %vm311_vm2, %v814_v53 }
 0x11d   : > { %2065 = vmatmul.mubr.msk.bf16.gmra.mrb[132].mxu1 %vm311_vm2, %v1130_v57 }
 0x11f   : > { %v457_v0 = vpop.f32.mrb[28].mxu0 }
 0x120   : > { %v685_v62 = vpop.f32.mrb[28].mxu1  ;;  %v1820_v25 = vpop.f32.mrb[29].mxu0 }
 0x121   : > { %v2555_v1 = vadd.f32 %v685_v62, %v457_v0  ;;  %v1890_v2 = vpop.f32.mrb[29].mxu1  ;;  %v460_v31 = vpop.f32.mrb[30].mxu0 }
 0x122   : > { %v688_v3 = vpop.f32.mrb[30].mxu1  ;;  %v1821_v5 = vpop.f32.mrb[31].mxu0 }
 0x123   : > { %v2557_v6 = vadd.f32 %v688_v3, %v460_v31  ;;  %v1891_v7 = vpop.f32.mrb[31].mxu1 }
 0x127   : > { %v465_v30 = vpop.f32.mrb[32].mxu0 }
 0x128   : > { %v693_v43 = vpop.f32.mrb[32].mxu1  ;;  %v1824_v8 = vpop.f32.mrb[33].mxu0 }
 0x129   : > { %v2559_v49 = vadd.f32 %v693_v43, %v465_v30  ;;  %v1894_v11 = vpop.f32.mrb[33].mxu1  ;;  %v468_v12 = vpop.f32.mrb[34].mxu0 }
 0x12a   : > { %v696_v55 = vpop.f32.mrb[34].mxu1  ;;  %v1825_v13 = vpop.f32.mrb[35].mxu0 }
 0x12b   : > { %v2561_v14 = vadd.f32 %v696_v55, %v468_v12  ;;  %v1895_v15 = vpop.f32.mrb[35].mxu1 }
 0x12f   : > { %v473_v17 = vpop.f32.mrb[36].mxu0 }
 0x130   : > { %v701_v38 = vpop.f32.mrb[36].mxu1  ;;  %v1828_v4 = vpop.f32.mrb[37].mxu0 }
 0x131   : > { %v2563_v18 = vadd.f32 %v701_v38, %v473_v17  ;;  %v1898_v21 = vpop.f32.mrb[37].mxu1  ;;  %v476_v22 = vpop.f32.mrb[38].mxu0 }
 0x132   : > { %v704_v26 = vpop.f32.mrb[38].mxu1  ;;  %v1829_v27 = vpop.f32.mrb[39].mxu0 }
 0x133   : > { %v2565_v10 = vadd.f32 %v704_v26, %v476_v22  ;;  %v1899_v28 = vpop.f32.mrb[39].mxu1 }
 0x137   : > { %v481_v45 = vpop.f32.mrb[40].mxu0 }
 0x138   : > { %v709_v33 = vpop.f32.mrb[40].mxu1  ;;  %v1832_v34 = vpop.f32.mrb[41].mxu0 }
 0x139   : > { %v2567_v35 = vadd.f32 %v709_v33, %v481_v45  ;;  %v1902_v36 = vpop.f32.mrb[41].mxu1  ;;  %v484_v40 = vpop.f32.mrb[42].mxu0 }
 0x13a   : > { %v712_v42 = vpop.f32.mrb[42].mxu1  ;;  %v1833_v44 = vpop.f32.mrb[43].mxu0 }
 0x13b   : > { %v2569_v16 = vadd.f32 %v712_v42, %v484_v40  ;;  %v1903_v46 = vpop.f32.mrb[43].mxu1 }
 0x13f   : > { %v489_v47 = vpop.f32.mrb[44].mxu0 }
 0x140   : > { %v717_v50 = vpop.f32.mrb[44].mxu1  ;;  %v1836_v51 = vpop.f32.mrb[45].mxu0 }
 0x141   : > { %v2571_v53 = vadd.f32 %v717_v50, %v489_v47  ;;  %v1906_v56 = vpop.f32.mrb[45].mxu1  ;;  %v492_v52 = vpop.f32.mrb[46].mxu0 }
 0x142   : > { %v720_v57 = vpop.f32.mrb[46].mxu1  ;;  %v1837_v59 = vpop.f32.mrb[47].mxu0 }
 0x143   : > { %v2573_v60 = vadd.f32 %v720_v57, %v492_v52  ;;  %v1907_v19 = vpop.f32.mrb[47].mxu1 }
 0x147   : > { %v497_v0 = vpop.f32.mrb[48].mxu0 }
 0x148   : > { %v725_v62 = vpop.f32.mrb[48].mxu1  ;;  %v1840_v25 = vpop.f32.mrb[49].mxu0 }
 0x149   : > { %v2575_v2 = vadd.f32 %v725_v62, %v497_v0  ;;  %v1910_v31 = vpop.f32.mrb[49].mxu1  ;;  %v500_v3 = vpop.f32.mrb[50].mxu0 }
 0x14a   : > { %v728_v5 = vpop.f32.mrb[50].mxu1  ;;  %v1841_v7 = vpop.f32.mrb[51].mxu0 }
 0x14b   : > { %v2577_v30 = vadd.f32 %v728_v5, %v500_v3  ;;  %v1911_v43 = vpop.f32.mrb[51].mxu1 }
 0x14f   : > { %v505_v8 = vpop.f32.mrb[52].mxu0 }
 0x150   : > { %v733_v11 = vpop.f32.mrb[52].mxu1  ;;  %v1844_v12 = vpop.f32.mrb[53].mxu0 }
 0x151   : > { %v2579_v55 = vadd.f32 %v733_v11, %v505_v8  ;;  %v1914_v13 = vpop.f32.mrb[53].mxu1  ;;  %v508_v15 = vpop.f32.mrb[54].mxu0 }
 0x152   : > { %v736_v17 = vpop.f32.mrb[54].mxu1  ;;  %v1845_v38 = vpop.f32.mrb[55].mxu0 }
 0x153   : > { %v2581_v4 = vadd.f32 %v736_v17, %v508_v15  ;;  %v1915_v21 = vpop.f32.mrb[55].mxu1  ;;  %v2599_v38 = vld [vmem:[%s2713_s2] ss:$0 sm:$0xff] }
 0x157   : > { %v513_v22 = vpop.f32.mrb[56].mxu0 }
 0x158   : > { %v741_v26 = vpop.f32.mrb[56].mxu1  ;;  %v1848_v27 = vpop.f32.mrb[57].mxu0 }
 0x159   : > { %v2583_v28 = vadd.f32 %v741_v26, %v513_v22  ;;  %v1918_v45 = vpop.f32.mrb[57].mxu1  ;;  %v516_v33 = vpop.f32.mrb[58].mxu0 }
 0x15a   : > { %v744_v34 = vpop.f32.mrb[58].mxu1  ;;  %v1849_v36 = vpop.f32.mrb[59].mxu0 }
 0x15b   : > { %v2585_v40 = vadd.f32 %v744_v34, %v516_v33  ;;  %v1919_v42 = vpop.f32.mrb[59].mxu1 }
 0x15f   : > { %v521_v44 = vpop.f32.mrb[60].mxu0 }
 0x160   : > { %v749_v46 = vpop.f32.mrb[60].mxu1  ;;  %v1852_v47 = vpop.f32.mrb[61].mxu0 }
 0x161   : > { %v2587_v50 = vadd.f32 %v749_v46, %v521_v44  ;;  %v1922_v51 = vpop.f32.mrb[61].mxu1  ;;  %v524_v56 = vpop.f32.mrb[62].mxu0 }
 0x162   : > { %v752_v52 = vpop.f32.mrb[62].mxu1  ;;  %v1853_v57 = vpop.f32.mrb[63].mxu0 }
 0x163   : > { %v2589_v59 = vadd.f32 %v752_v52, %v524_v56  ;;  %v1923_v19 = vpop.f32.mrb[63].mxu1 }
 0x167   : > { %v529_v0 = vpop.f32.mrb[64].mxu0 }
 0x168   : > { %v757_v62 = vpop.f32.mrb[64].mxu1  ;;  %v1856_v25 = vpop.f32.mrb[65].mxu0 }
 0x169   : > { %v2591_v31 = vadd.f32 %v757_v62, %v529_v0  ;;  %v1926_v3 = vpop.f32.mrb[65].mxu1  ;;  %v532_v5 = vpop.f32.mrb[66].mxu0 }
 0x16a   : > { %v760_v7 = vpop.f32.mrb[66].mxu1  ;;  %v1857_v43 = vpop.f32.mrb[67].mxu0 }
 0x16b   : > { %v2593_v8 = vadd.f32 %v760_v7, %v532_v5  ;;  %v1927_v11 = vpop.f32.mrb[67].mxu1 }
 0x16f   : > { %v911_v12 = vpop.f32.mrb[68].mxu0 }
 0x170   : > { %v1046_v13 = vadd.f32 %v911_v12, %v2469_v24  ;;  %v1227_v15 = vpop.f32.mrb[68].mxu1  ;;  %v1932_v17 = vpop.f32.mrb[69].mxu0 }
 0x171   : > { %v2002_v21 = vpop.f32.mrb[69].mxu1  ;;  %v914_v22 = vpop.f32.mrb[70].mxu0 }
 0x172   : > { %v1362_v26 = vadd.f32 %v1227_v15, %v1046_v13  ;;  %v1047_v27 = vadd.f32 %v914_v22, %v2471_v32  ;;  %v1230_v45 = vpop.f32.mrb[70].mxu1  ;;  %v1933_v33 = vpop.f32.mrb[71].mxu0 }
 0x173   : > { %v2003_v34 = vpop.f32.mrb[71].mxu1 }
 0x174   : > { %v1403_v36 = vadd.f32 %v2599_v38, %v1362_v26  ;;  %v1363_v42 = vadd.f32 %v1230_v45, %v1047_v27 }
 0x176   : > { %vm1437_vm3 = vcmp.ge.f32.partialorder %v1403_v36, 0.0  ;;  %v1471_v24 = vmul.f32 0.2, %v1403_v36  ;;  %v1404_v44 = vadd.f32 %v2599_v38, %v1363_v42 }
 0x177   : > { %v919_v46 = vpop.f32.mrb[72].mxu0 }
 0x178   : > { %v1505_v47 = vsel %vm1437_vm3, %v1403_v36, %v1471_v24  ;;  %vm1438_vm4 = vcmp.ge.f32.partialorder %v1404_v44, 0.0  ;;  %v1472_v32 = vmul.f32 0.2, %v1404_v44  ;;  %v1048_v51 = vadd.f32 %v919_v46, %v2482_v41  ;;  %v1235_v56 = vpop.f32.mrb[72].mxu1  ;;  %v1936_v52 = vpop.f32.mrb[73].mxu0 }
 0x179   : > { %1539 = vst [vmem:[%s2607_s7] sm:$0xff] %v1505_v47  ;;  %v2006_v57 = vpop.f32.mrb[73].mxu1  ;;  %v922_v19 = vpop.f32.mrb[74].mxu0 }
 0x17a   : > { %v1506_v0 = vsel %vm1438_vm4, %v1404_v44, %v1472_v32  ;;  %v1364_v62 = vadd.f32 %v1235_v56, %v1048_v51  ;;  %v1049_v25 = vadd.f32 %v922_v19, %v2484_v48  ;;  %v1238_v3 = vpop.f32.mrb[74].mxu1  ;;  %v1937_v5 = vpop.f32.mrb[75].mxu0 }
 0x17b   : > { %1540 = vst [vmem:[%s2607_s7 + $0x8] sm:$0xff] %v1506_v0  ;;  %v2007_v7 = vpop.f32.mrb[75].mxu1 }
 0x17c   : > { %v1405_v43 = vadd.f32 %v2599_v38, %v1364_v62  ;;  %v1365_v11 = vadd.f32 %v1238_v3, %v1049_v25 }
 0x17e   : > { %vm1439_vm5 = vcmp.ge.f32.partialorder %v1405_v43, 0.0  ;;  %v1473_v12 = vmul.f32 0.2, %v1405_v43  ;;  %v1406_v41 = vadd.f32 %v2599_v38, %v1365_v11 }
 0x17f   : > { %v927_v13 = vpop.f32.mrb[76].mxu0 }
 0x180   : > { %v1507_v15 = vsel %vm1439_vm5, %v1405_v43, %v1473_v12  ;;  %vm1440_vm6 = vcmp.ge.f32.partialorder %v1406_v41, 0.0  ;;  %v1474_v17 = vmul.f32 0.2, %v1406_v41  ;;  %v1050_v21 = vadd.f32 %v927_v13, %v2495_v58  ;;  %v1243_v48 = vpop.f32.mrb[76].mxu1  ;;  %v1940_v22 = vpop.f32.mrb[77].mxu0 }
 0x181   : > { %1541 = vst [vmem:[%s2607_s7 + $0x10] sm:$0xff] %v1507_v15  ;;  %v2010_v26 = vpop.f32.mrb[77].mxu1  ;;  %v930_v27 = vpop.f32.mrb[78].mxu0 }
 0x182   : > { %v1508_v45 = vsel %vm1440_vm6, %v1406_v41, %v1474_v17  ;;  %v1366_v33 = vadd.f32 %v1243_v48, %v1050_v21  ;;  %v1051_v34 = vadd.f32 %v930_v27, %v2497_v63  ;;  %v1246_v36 = vpop.f32.mrb[78].mxu1  ;;  %v1941_v42 = vpop.f32.mrb[79].mxu0 }
 0x183   : > { %1542 = vst [vmem:[%s2607_s7 + $0x18] sm:$0xff] %v1508_v45  ;;  %v2011_v24 = vpop.f32.mrb[79].mxu1 }
 0x184   : > { %v1407_v44 = vadd.f32 %v2599_v38, %v1366_v33  ;;  %v1367_v46 = vadd.f32 %v1246_v36, %v1051_v34 }
 0x186   : > { %vm1441_vm7 = vcmp.ge.f32.partialorder %v1407_v44, 0.0  ;;  %v1475_v47 = vmul.f32 0.2, %v1407_v44  ;;  %v1408_v58 = vadd.f32 %v2599_v38, %v1367_v46 }
 0x187   : > { %v935_v32 = vpop.f32.mrb[80].mxu0 }
 0x188   : > { %v1509_v51 = vsel %vm1441_vm7, %v1407_v44, %v1475_v47  ;;  %vm1442_vm8 = vcmp.ge.f32.partialorder %v1408_v58, 0.0  ;;  %v1476_v56 = vmul.f32 0.2, %v1408_v58  ;;  %v1052_v52 = vadd.f32 %v935_v32, %v2508_v37  ;;  %v1251_v63 = vpop.f32.mrb[80].mxu1  ;;  %v1944_v57 = vpop.f32.mrb[81].mxu0 }
 0x189   : > { %1543 = vst [vmem:[%s2607_s7 + $0x20] sm:$0xff] %v1509_v51  ;;  %v2014_v19 = vpop.f32.mrb[81].mxu1  ;;  %v938_v0 = vpop.f32.mrb[82].mxu0 }
 0x18a   : > { %v1510_v62 = vsel %vm1442_vm8, %v1408_v58, %v1476_v56  ;;  %v1368_v25 = vadd.f32 %v1251_v63, %v1052_v52  ;;  %v1053_v3 = vadd.f32 %v938_v0, %v2510_v9  ;;  %v1254_v5 = vpop.f32.mrb[82].mxu1  ;;  %v1945_v7 = vpop.f32.mrb[83].mxu0 }
 0x18b   : > { %1544 = vst [vmem:[%s2607_s7 + $0x28] sm:$0xff] %v1510_v62  ;;  %v2015_v43 = vpop.f32.mrb[83].mxu1 }
 0x18c   : > { %v1409_v11 = vadd.f32 %v2599_v38, %v1368_v25  ;;  %v1369_v12 = vadd.f32 %v1254_v5, %v1053_v3 }
 0x18e   : > { %vm1443_vm9 = vcmp.ge.f32.partialorder %v1409_v11, 0.0  ;;  %v1477_v41 = vmul.f32 0.2, %v1409_v11  ;;  %v1410_v37 = vadd.f32 %v2599_v38, %v1369_v12 }
 0x18f   : > { %v943_v13 = vpop.f32.mrb[84].mxu0 }
 0x190   : > { %v1511_v15 = vsel %vm1443_vm9, %v1409_v11, %v1477_v41  ;;  %vm1444_vm10 = vcmp.ge.f32.partialorder %v1410_v37, 0.0  ;;  %v1478_v17 = vmul.f32 0.2, %v1410_v37  ;;  %v1054_v21 = vadd.f32 %v943_v13, %v2521_v61  ;;  %v1259_v9 = vpop.f32.mrb[84].mxu1  ;;  %v1948_v48 = vpop.f32.mrb[85].mxu0 }
 0x191   : > { %1545 = vst [vmem:[%s2607_s7 + $0x30] sm:$0xff] %v1511_v15  ;;  %v2018_v22 = vpop.f32.mrb[85].mxu1  ;;  %v946_v26 = vpop.f32.mrb[86].mxu0 }
 0x192   : > { %v1512_v27 = vsel %vm1444_vm10, %v1410_v37, %v1478_v17  ;;  %v1370_v45 = vadd.f32 %v1259_v9, %v1054_v21  ;;  %v1055_v33 = vadd.f32 %v946_v26, %v2523_v20  ;;  %v1262_v34 = vpop.f32.mrb[86].mxu1  ;;  %v1949_v36 = vpop.f32.mrb[87].mxu0 }
 0x193   : > { %1546 = vst [vmem:[%s2607_s7 + $0x38] sm:$0xff] %v1512_v27  ;;  %v2019_v42 = vpop.f32.mrb[87].mxu1 }
 0x194   : > { %v1411_v24 = vadd.f32 %v2599_v38, %v1370_v45  ;;  %v1371_v44 = vadd.f32 %v1262_v34, %v1055_v33 }
 0x196   : > { %vm1445_vm11 = vcmp.ge.f32.partialorder %v1411_v24, 0.0  ;;  %v1479_v46 = vmul.f32 0.2, %v1411_v24  ;;  %v1412_v61 = vadd.f32 %v2599_v38, %v1371_v44 }
 0x197   : > { %v951_v47 = vpop.f32.mrb[88].mxu0 }
 0x198   : > { %v1513_v58 = vsel %vm1445_vm11, %v1411_v24, %v1479_v46  ;;  %vm1446_vm12 = vcmp.ge.f32.partialorder %v1412_v61, 0.0  ;;  %v1480_v32 = vmul.f32 0.2, %v1412_v61  ;;  %v1056_v51 = vadd.f32 %v951_v47, %v2534_v29  ;;  %v1267_v20 = vpop.f32.mrb[88].mxu1  ;;  %v1952_v56 = vpop.f32.mrb[89].mxu0 }
 0x199   : > { %1547 = vst [vmem:[%s2607_s7 + $0x40] sm:$0xff] %v1513_v58  ;;  %v2022_v52 = vpop.f32.mrb[89].mxu1  ;;  %v954_v63 = vpop.f32.mrb[90].mxu0 }
 0x19a   : > { %v1514_v57 = vsel %vm1446_vm12, %v1412_v61, %v1480_v32  ;;  %v1372_v19 = vadd.f32 %v1267_v20, %v1056_v51  ;;  %v1057_v0 = vadd.f32 %v954_v63, %v2536_v39  ;;  %v1270_v62 = vpop.f32.mrb[90].mxu1  ;;  %v1953_v25 = vpop.f32.mrb[91].mxu0 }
 0x19b   : > { %1548 = vst [vmem:[%s2607_s7 + $0x48] sm:$0xff] %v1514_v57  ;;  %v2023_v3 = vpop.f32.mrb[91].mxu1 }
 0x19c   : > { %v1413_v5 = vadd.f32 %v2599_v38, %v1372_v19  ;;  %v1373_v7 = vadd.f32 %v1270_v62, %v1057_v0 }
 0x19e   : > { %vm1447_vm13 = vcmp.ge.f32.partialorder %v1413_v5, 0.0  ;;  %v1481_v43 = vmul.f32 0.2, %v1413_v5  ;;  %v1414_v29 = vadd.f32 %v2599_v38, %v1373_v7 }
 0x19f   : > { %v959_v11 = vpop.f32.mrb[92].mxu0 }
 0x1a0   : > { %v1515_v12 = vsel %vm1447_vm13, %v1413_v5, %v1481_v43  ;;  %vm1448_vm14 = vcmp.ge.f32.partialorder %v1414_v29, 0.0  ;;  %v1482_v41 = vmul.f32 0.2, %v1414_v29  ;;  %v1058_v37 = vadd.f32 %v959_v11, %v2549_v54  ;;  %v1275_v39 = vpop.f32.mrb[92].mxu1  ;;  %v1956_v13 = vpop.f32.mrb[93].mxu0 }
 0x1a1   : > { %1549 = vst [vmem:[%s2607_s7 + $0x50] sm:$0xff] %v1515_v12  ;;  %v2026_v15 = vpop.f32.mrb[93].mxu1  ;;  %v962_v17 = vpop.f32.mrb[94].mxu0 }
 0x1a2   : > { %v1516_v21 = vsel %vm1448_vm14, %v1414_v29, %v1482_v41  ;;  %v1374_v9 = vadd.f32 %v1275_v39, %v1058_v37  ;;  %v1059_v48 = vadd.f32 %v962_v17, %v2551_v23  ;;  %v1278_v22 = vpop.f32.mrb[94].mxu1  ;;  %v1957_v26 = vpop.f32.mrb[95].mxu0 }
 0x1a3   : > { %1550 = vst [vmem:[%s2607_s7 + $0x58] sm:$0xff] %v1516_v21  ;;  %v2027_v27 = vpop.f32.mrb[95].mxu1 }
 0x1a4   : > { %v1415_v45 = vadd.f32 %v2599_v38, %v1374_v9  ;;  %v1375_v33 = vadd.f32 %v1278_v22, %v1059_v48 }
 0x1a6   : > { %vm1449_vm15 = vcmp.ge.f32.partialorder %v1415_v45, 0.0  ;;  %v1483_v34 = vmul.f32 0.2, %v1415_v45  ;;  %v1416_v54 = vadd.f32 %v2599_v38, %v1375_v33 }
 0x1a7   : > { %v967_v36 = vpop.f32.mrb[96].mxu0 }
 0x1a8   : > { %v1517_v42 = vsel %vm1449_vm15, %v1415_v45, %v1483_v34  ;;  %vm1450_vm0 = vcmp.ge.f32.partialorder %v1416_v54, 0.0  ;;  %v1484_v24 = vmul.f32 0.2, %v1416_v54  ;;  %v1060_v44 = vadd.f32 %v967_v36, %v2555_v1  ;;  %v1283_v23 = vpop.f32.mrb[96].mxu1  ;;  %v1960_v46 = vpop.f32.mrb[97].mxu0 }
 0x1a9   : > { %1551 = vst [vmem:[%s2607_s7 + $0x60] sm:$0xff] %v1517_v42  ;;  %v2030_v61 = vpop.f32.mrb[97].mxu1  ;;  %v970_v47 = vpop.f32.mrb[98].mxu0 }
 0x1aa   : > { %v1518_v58 = vsel %vm1450_vm0, %v1416_v54, %v1484_v24  ;;  %v1376_v32 = vadd.f32 %v1283_v23, %v1060_v44  ;;  %v1061_v51 = vadd.f32 %v970_v47, %v2557_v6  ;;  %v1286_v20 = vpop.f32.mrb[98].mxu1  ;;  %v1961_v56 = vpop.f32.mrb[99].mxu0 }
 0x1ab   : > { %1552 = vst [vmem:[%s2607_s7 + $0x68] sm:$0xff] %v1518_v58  ;;  %v2031_v52 = vpop.f32.mrb[99].mxu1 }
 0x1ac   : > { %v1417_v63 = vadd.f32 %v2599_v38, %v1376_v32  ;;  %v1377_v57 = vadd.f32 %v1286_v20, %v1061_v51 }
 0x1ae   : > { %vm1451_vm1 = vcmp.ge.f32.partialorder %v1417_v63, 0.0  ;;  %v1485_v19 = vmul.f32 0.2, %v1417_v63  ;;  %v1418_v1 = vadd.f32 %v2599_v38, %v1377_v57 }
 0x1af   : > { %v975_v0 = vpop.f32.mrb[100].mxu0 }
 0x1b0   : > { %v1519_v62 = vsel %vm1451_vm1, %v1417_v63, %v1485_v19  ;;  %vm1452_vm2 = vcmp.ge.f32.partialorder %v1418_v1, 0.0  ;;  %v1486_v25 = vmul.f32 0.2, %v1418_v1  ;;  %v1062_v3 = vadd.f32 %v975_v0, %v2559_v49  ;;  %v1291_v6 = vpop.f32.mrb[100].mxu1  ;;  %v1964_v5 = vpop.f32.mrb[101].mxu0 }
 0x1b1   : > { %1553 = vst [vmem:[%s2607_s7 + $0x70] sm:$0xff] %v1519_v62  ;;  %v2034_v7 = vpop.f32.mrb[101].mxu1  ;;  %v978_v43 = vpop.f32.mrb[102].mxu0 }
 0x1b2   : > { %v1520_v29 = vsel %vm1452_vm2, %v1418_v1, %v1486_v25  ;;  %v1378_v11 = vadd.f32 %v1291_v6, %v1062_v3  ;;  %v1063_v12 = vadd.f32 %v978_v43, %v2561_v14  ;;  %v1294_v41 = vpop.f32.mrb[102].mxu1  ;;  %v1965_v37 = vpop.f32.mrb[103].mxu0 }
 0x1b3   : > { %1554 = vst [vmem:[%s2607_s7 + $0x78] sm:$0xff] %v1520_v29  ;;  %v2035_v39 = vpop.f32.mrb[103].mxu1 }
 0x1b4   : > { %v1419_v13 = vadd.f32 %v2599_v38, %v1378_v11  ;;  %v1379_v15 = vadd.f32 %v1294_v41, %v1063_v12 }
 0x1b6   : > { %vm1453_vm3 = vcmp.ge.f32.partialorder %v1419_v13, 0.0  ;;  %v1487_v17 = vmul.f32 0.2, %v1419_v13  ;;  %v1420_v49 = vadd.f32 %v2599_v38, %v1379_v15 }
 0x1b7   : > { %v983_v21 = vpop.f32.mrb[104].mxu0 }
 0x1b8   : > { %v1521_v9 = vsel %vm1453_vm3, %v1419_v13, %v1487_v17  ;;  %vm1454_vm4 = vcmp.ge.f32.partialorder %v1420_v49, 0.0  ;;  %v1488_v48 = vmul.f32 0.2, %v1420_v49  ;;  %v1064_v22 = vadd.f32 %v983_v21, %v2563_v18  ;;  %v1299_v14 = vpop.f32.mrb[104].mxu1  ;;  %v1968_v26 = vpop.f32.mrb[105].mxu0 }
 0x1b9   : > { %1555 = vst [vmem:[%s2607_s7 + $0x80] sm:$0xff] %v1521_v9  ;;  %v2038_v27 = vpop.f32.mrb[105].mxu1  ;;  %v986_v45 = vpop.f32.mrb[106].mxu0 }
 0x1ba   : > { %v1522_v33 = vsel %vm1454_vm4, %v1420_v49, %v1488_v48  ;;  %v1380_v34 = vadd.f32 %v1299_v14, %v1064_v22  ;;  %v1065_v54 = vadd.f32 %v986_v45, %v2565_v10  ;;  %v1302_v36 = vpop.f32.mrb[106].mxu1  ;;  %v1969_v42 = vpop.f32.mrb[107].mxu0 }
 0x1bb   : > { %1556 = vst [vmem:[%s2607_s7 + $0x88] sm:$0xff] %v1522_v33  ;;  %v2039_v24 = vpop.f32.mrb[107].mxu1 }
 0x1bc   : > { %v1421_v44 = vadd.f32 %v2599_v38, %v1380_v34  ;;  %v1381_v23 = vadd.f32 %v1302_v36, %v1065_v54 }
 0x1be   : > { %vm1455_vm5 = vcmp.ge.f32.partialorder %v1421_v44, 0.0  ;;  %v1489_v46 = vmul.f32 0.2, %v1421_v44  ;;  %v1422_v18 = vadd.f32 %v2599_v38, %v1381_v23 }
 0x1bf   : > { %v991_v61 = vpop.f32.mrb[108].mxu0 }
 0x1c0   : > { %v1523_v47 = vsel %vm1455_vm5, %v1421_v44, %v1489_v46  ;;  %vm1456_vm6 = vcmp.ge.f32.partialorder %v1422_v18, 0.0  ;;  %v1490_v58 = vmul.f32 0.2, %v1422_v18  ;;  %v1066_v32 = vadd.f32 %v991_v61, %v2567_v35  ;;  %v1307_v10 = vpop.f32.mrb[108].mxu1  ;;  %v1972_v51 = vpop.f32.mrb[109].mxu0 }
 0x1c1   : > { %1557 = vst [vmem:[%s2607_s7 + $0x90] sm:$0xff] %v1523_v47  ;;  %v2042_v20 = vpop.f32.mrb[109].mxu1  ;;  %v994_v56 = vpop.f32.mrb[110].mxu0 }
 0x1c2   : > { %v1524_v52 = vsel %vm1456_vm6, %v1422_v18, %v1490_v58  ;;  %v1382_v63 = vadd.f32 %v1307_v10, %v1066_v32  ;;  %v1067_v57 = vadd.f32 %v994_v56, %v2569_v16  ;;  %v1310_v19 = vpop.f32.mrb[110].mxu1  ;;  %v1973_v1 = vpop.f32.mrb[111].mxu0 }
 0x1c3   : > { %1558 = vst [vmem:[%s2607_s7 + $0x98] sm:$0xff] %v1524_v52  ;;  %v2043_v0 = vpop.f32.mrb[111].mxu1 }
 0x1c4   : > { %v1423_v62 = vadd.f32 %v2599_v38, %v1382_v63  ;;  %v1383_v25 = vadd.f32 %v1310_v19, %v1067_v57 }
 0x1c6   : > { %vm1457_vm7 = vcmp.ge.f32.partialorder %v1423_v62, 0.0  ;;  %v1491_v3 = vmul.f32 0.2, %v1423_v62  ;;  %v1424_v35 = vadd.f32 %v2599_v38, %v1383_v25 }
 0x1c7   : > { %v999_v6 = vpop.f32.mrb[112].mxu0 }
 0x1c8   : > { %v1525_v5 = vsel %vm1457_vm7, %v1423_v62, %v1491_v3  ;;  %vm1458_vm8 = vcmp.ge.f32.partialorder %v1424_v35, 0.0  ;;  %v1492_v7 = vmul.f32 0.2, %v1424_v35  ;;  %v1068_v43 = vadd.f32 %v999_v6, %v2571_v53  ;;  %v1315_v16 = vpop.f32.mrb[112].mxu1  ;;  %v1976_v29 = vpop.f32.mrb[113].mxu0 }
 0x1c9   : > { %1559 = vst [vmem:[%s2607_s7 + $0xa0] sm:$0xff] %v1525_v5  ;;  %v2046_v11 = vpop.f32.mrb[113].mxu1  ;;  %v1002_v12 = vpop.f32.mrb[114].mxu0 }
 0x1ca   : > { %v1526_v41 = vsel %vm1458_vm8, %v1424_v35, %v1492_v7  ;;  %v1384_v37 = vadd.f32 %v1315_v16, %v1068_v43  ;;  %v1069_v39 = vadd.f32 %v1002_v12, %v2573_v60  ;;  %v1318_v13 = vpop.f32.mrb[114].mxu1  ;;  %v1977_v15 = vpop.f32.mrb[115].mxu0 }
 0x1cb   : > { %1560 = vst [vmem:[%s2607_s7 + $0xa8] sm:$0xff] %v1526_v41  ;;  %v2047_v17 = vpop.f32.mrb[115].mxu1 }
 0x1cc   : > { %v1425_v49 = vadd.f32 %v2599_v38, %v1384_v37  ;;  %v1385_v21 = vadd.f32 %v1318_v13, %v1069_v39 }
 0x1ce   : > { %vm1459_vm9 = vcmp.ge.f32.partialorder %v1425_v49, 0.0  ;;  %v1493_v9 = vmul.f32 0.2, %v1425_v49  ;;  %v1426_v53 = vadd.f32 %v2599_v38, %v1385_v21 }
 0x1cf   : > { %v1007_v48 = vpop.f32.mrb[116].mxu0 }
 0x1d0   : > { %v1527_v22 = vsel %vm1459_vm9, %v1425_v49, %v1493_v9  ;;  %vm1460_vm10 = vcmp.ge.f32.partialorder %v1426_v53, 0.0  ;;  %v1494_v14 = vmul.f32 0.2, %v1426_v53  ;;  %v1070_v26 = vadd.f32 %v1007_v48, %v2575_v2  ;;  %v1323_v60 = vpop.f32.mrb[116].mxu1  ;;  %v1980_v27 = vpop.f32.mrb[117].mxu0 }
 0x1d1   : > { %1561 = vst [vmem:[%s2607_s7 + $0xb0] sm:$0xff] %v1527_v22  ;;  %v2050_v45 = vpop.f32.mrb[117].mxu1  ;;  %v1010_v33 = vpop.f32.mrb[118].mxu0 }
 0x1d2   : > { %v1528_v34 = vsel %vm1460_vm10, %v1426_v53, %v1494_v14  ;;  %v1386_v54 = vadd.f32 %v1323_v60, %v1070_v26  ;;  %v1071_v36 = vadd.f32 %v1010_v33, %v2577_v30  ;;  %v1326_v42 = vpop.f32.mrb[118].mxu1  ;;  %v1981_v24 = vpop.f32.mrb[119].mxu0 }
 0x1d3   : > { %1562 = vst [vmem:[%s2607_s7 + $0xb8] sm:$0xff] %v1528_v34  ;;  %v2051_v44 = vpop.f32.mrb[119].mxu1 }
 0x1d4   : > { %v1427_v23 = vadd.f32 %v2599_v38, %v1386_v54  ;;  %v1387_v46 = vadd.f32 %v1326_v42, %v1071_v36 }
 0x1d6   : > { %vm1461_vm11 = vcmp.ge.f32.partialorder %v1427_v23, 0.0  ;;  %v1495_v18 = vmul.f32 0.2, %v1427_v23  ;;  %v1428_v2 = vadd.f32 %v2599_v38, %v1387_v46 }
 0x1d7   : > { %v1015_v61 = vpop.f32.mrb[120].mxu0 }
 0x1d8   : > { %v1529_v47 = vsel %vm1461_vm11, %v1427_v23, %v1495_v18  ;;  %vm1462_vm12 = vcmp.ge.f32.partialorder %v1428_v2, 0.0  ;;  %v1496_v58 = vmul.f32 0.2, %v1428_v2  ;;  %v1072_v32 = vadd.f32 %v1015_v61, %v2579_v55  ;;  %v1331_v30 = vpop.f32.mrb[120].mxu1  ;;  %v1984_v10 = vpop.f32.mrb[121].mxu0 }
 0x1d9   : > { %1563 = vst [vmem:[%s2607_s7 + $0xc0] sm:$0xff] %v1529_v47  ;;  %v2054_v51 = vpop.f32.mrb[121].mxu1  ;;  %v1018_v20 = vpop.f32.mrb[122].mxu0 }
 0x1da   : > { %v1530_v56 = vsel %vm1462_vm12, %v1428_v2, %v1496_v58  ;;  %v1388_v52 = vadd.f32 %v1331_v30, %v1072_v32  ;;  %v1073_v63 = vadd.f32 %v1018_v20, %v2581_v4  ;;  %v1334_v57 = vpop.f32.mrb[122].mxu1  ;;  %v1985_v19 = vpop.f32.mrb[123].mxu0 }
 0x1db   : > { %1564 = vst [vmem:[%s2607_s7 + $0xc8] sm:$0xff] %v1530_v56  ;;  %v2055_v1 = vpop.f32.mrb[123].mxu1 }
 0x1dc   : > { %v1429_v0 = vadd.f32 %v2599_v38, %v1388_v52  ;;  %v1389_v62 = vadd.f32 %v1334_v57, %v1073_v63 }
 0x1de   : > { %vm1463_vm13 = vcmp.ge.f32.partialorder %v1429_v0, 0.0  ;;  %v1497_v25 = vmul.f32 0.2, %v1429_v0  ;;  %v1430_v55 = vadd.f32 %v2599_v38, %v1389_v62 }
 0x1df   : > { %v1023_v3 = vpop.f32.mrb[124].mxu0 }
 0x1e0   : > { %v1531_v35 = vsel %vm1463_vm13, %v1429_v0, %v1497_v25  ;;  %vm1464_vm14 = vcmp.ge.f32.partialorder %v1430_v55, 0.0  ;;  %v1498_v6 = vmul.f32 0.2, %v1430_v55  ;;  %v1074_v5 = vadd.f32 %v1023_v3, %v2583_v28  ;;  %v1339_v4 = vpop.f32.mrb[124].mxu1  ;;  %v1988_v7 = vpop.f32.mrb[125].mxu0 }
 0x1e1   : > { %1565 = vst [vmem:[%s2607_s7 + $0xd0] sm:$0xff] %v1531_v35  ;;  %v2058_v43 = vpop.f32.mrb[125].mxu1  ;;  %v1026_v16 = vpop.f32.mrb[126].mxu0 }
 0x1e2   : > { %v1532_v29 = vsel %vm1464_vm14, %v1430_v55, %v1498_v6  ;;  %v1390_v11 = vadd.f32 %v1339_v4, %v1074_v5  ;;  %v1075_v12 = vadd.f32 %v1026_v16, %v2585_v40  ;;  %v1342_v41 = vpop.f32.mrb[126].mxu1  ;;  %v1989_v37 = vpop.f32.mrb[127].mxu0 }
 0x1e3   : > { %1566 = vst [vmem:[%s2607_s7 + $0xd8] sm:$0xff] %v1532_v29  ;;  %v2059_v39 = vpop.f32.mrb[127].mxu1 }
 0x1e4   : > { %v1431_v13 = vadd.f32 %v2599_v38, %v1390_v11  ;;  %v1391_v15 = vadd.f32 %v1342_v41, %v1075_v12 }
 0x1e6   : > { %vm1465_vm15 = vcmp.ge.f32.partialorder %v1431_v13, 0.0  ;;  %v1499_v17 = vmul.f32 0.2, %v1431_v13  ;;  %v1432_v28 = vadd.f32 %v2599_v38, %v1391_v15 }
 0x1e7   : > { %v1031_v49 = vpop.f32.mrb[128].mxu0 }
 0x1e8   : > { %v1533_v21 = vsel %vm1465_vm15, %v1431_v13, %v1499_v17  ;;  %vm1466_vm0 = vcmp.ge.f32.partialorder %v1432_v28, 0.0  ;;  %v1500_v9 = vmul.f32 0.2, %v1432_v28  ;;  %v1076_v53 = vadd.f32 %v1031_v49, %v2587_v50  ;;  %v1347_v40 = vpop.f32.mrb[128].mxu1  ;;  %v1992_v48 = vpop.f32.mrb[129].mxu0 }
 0x1e9   : > { %1567 = vst [vmem:[%s2607_s7 + $0xe0] sm:$0xff] %v1533_v21  ;;  %v2062_v22 = vpop.f32.mrb[129].mxu1  ;;  %v1034_v14 = vpop.f32.mrb[130].mxu0 }
 0x1ea   : > { %v1534_v26 = vsel %vm1466_vm0, %v1432_v28, %v1500_v9  ;;  %v1392_v60 = vadd.f32 %v1347_v40, %v1076_v53  ;;  %v1077_v27 = vadd.f32 %v1034_v14, %v2589_v59  ;;  %v1350_v45 = vpop.f32.mrb[130].mxu1  ;;  %v1993_v33 = vpop.f32.mrb[131].mxu0 }
 0x1eb   : > { %1568 = vst [vmem:[%s2607_s7 + $0xe8] sm:$0xff] %v1534_v26  ;;  %v2063_v34 = vpop.f32.mrb[131].mxu1 }
 0x1ec   : > { %v1433_v54 = vadd.f32 %v2599_v38, %v1392_v60  ;;  %v1393_v36 = vadd.f32 %v1350_v45, %v1077_v27 }
 0x1ee   : > { %vm1467_vm1 = vcmp.ge.f32.partialorder %v1433_v54, 0.0  ;;  %v1501_v42 = vmul.f32 0.2, %v1433_v54  ;;  %v1434_v50 = vadd.f32 %v2599_v38, %v1393_v36 }
 0x1ef   : > { %v1039_v24 = vpop.f32.mrb[132].mxu0 }
 0x1f0   : > { %v1535_v44 = vsel %vm1467_vm1, %v1433_v54, %v1501_v42  ;;  %vm1468_vm2 = vcmp.ge.f32.partialorder %v1434_v50, 0.0  ;;  %v1502_v23 = vmul.f32 0.2, %v1434_v50  ;;  %v1078_v46 = vadd.f32 %v1039_v24, %v2591_v31  ;;  %v1355_v59 = vpop.f32.mrb[132].mxu1  ;;  %v1996_v18 = vpop.f32.mrb[133].mxu0 }
 0x1f1   : > { %1569 = vst [vmem:[%s2607_s7 + $0xf0] sm:$0xff] %v1535_v44  ;;  %v2066_v2 = vpop.f32.mrb[133].mxu1  ;;  %v1042_v61 = vpop.f32.mrb[134].mxu0 }
 0x1f2   : > { %v1536_v47 = vsel %vm1468_vm2, %v1434_v50, %v1502_v23  ;;  %v1394_v58 = vadd.f32 %v1355_v59, %v1078_v46  ;;  %v1079_v32 = vadd.f32 %v1042_v61, %v2593_v8  ;;  %v1358_v30 = vpop.f32.mrb[134].mxu1  ;;  %v1997_v10 = vpop.f32.mrb[135].mxu0 }
 0x1f3   : > { %1570 = vst [vmem:[%s2607_s7 + $0xf8] sm:$0xff] %v1536_v47  ;;  %v2067_v51 = vpop.f32.mrb[135].mxu1 }
 0x1f4   : > { %v1435_v20 = vadd.f32 %v2599_v38, %v1394_v58  ;;  %v1395_v56 = vadd.f32 %v1358_v30, %v1079_v32 }
 0x1f6   : > { %vm1469_vm3 = vcmp.ge.f32.partialorder %v1435_v20, 0.0  ;;  %v1503_v31 = vmul.f32 0.2, %v1435_v20  ;;  %v1436_v52 = vadd.f32 %v2599_v38, %v1395_v56 }
 0x1f8   : > { %v1537_v63 = vsel %vm1469_vm3, %v1435_v20, %v1503_v31  ;;  %vm1470_vm4 = vcmp.ge.f32.partialorder %v1436_v52, 0.0  ;;  %v1504_v57 = vmul.f32 0.2, %v1436_v52 }
 0x1f9   : > { %1571 = vst [vmem:[%s2607_s7 + $0x100] sm:$0xff] %v1537_v63 }
 0x1fa   : > { %v1538_v19 = vsel %vm1470_vm4, %v1436_v52, %v1504_v57 }
 0x1fb   : > { %1572 = vst [vmem:[%s2607_s7 + $0x108] sm:$0xff] %v1538_v19 }
 0x1fc PF: > { %s14_s15 = sadd.s32 1, %s2090_s15  }
 0x1fd   : > { %p11_p4 = scmp.ge.s32.totalorder %s14_s15, 4  }
 0x1ff   :  { %13 = sbr.rel (!%p11_p4) target bundleno = 1 (0x1), region = 69 }

// kernel: cyclegan_discriminator.6
= control target key start
LH: loop header
LB: loop body
LE: loop exit
PB: predicated region body
PF: predicated region fallthrough
CT: control target
= control target key end

     0   :  { %s1162_s15 = smov 0   ;;  %s1422_s0 = inlined_call_operand.vmem [shape: f32[2,82,32], index: 0, kind: input, shape index: {}]   ;;  %s1423_s1 = inlined_call_operand.vmem [shape: bf16[4,32,128], index: 1, kind: input, shape index: {}]   ;;  %s1424_s2 = inlined_call_operand.vmem [shape: f32[1,128], index: 2, kind: input, shape index: {}]   ;;  %s1425_s3 = inlined_call_operand.vmem [shape: f32[72,1], index: 3, kind: input, shape index: {}]   ;;  %s1426_s4 = inlined_call_operand.vmem [shape: f32[2,72,128], index: 4, kind: output, shape index: {}]  }
   0x1 LB: > { %s927_s16 = sadd.s32 4294967295, %s1132_s15   ;;  %p931_p0 = scmp.ge.s32.totalorder %s1132_s15, 1  ;;  %s1132_s15 = sphi %s1162_s15, %s14_s15  }
   0x2   : > { %p162_p1 = scmp.lt.s32.totalorder %s1132_s15, 3 }
   0x4   : > { %p163_p2 = pnand %p931_p0, %p162_p1 }
   0x5   : > { %v1116_v0 = vld [vmem:[%s1423_s1 + $0x10] sm:$0xff] (!%p163_p2)   ;;  %v1134_v1 = vmov (!%p163_p2), 0.0   ;;  %v1117_v2 = vld [vmem:[%s1423_s1] sm:$0xff] (!%p163_p2)   ;;  %v1118_v3 = vld [vmem:[%s1423_s1 + $0x18] sm:$0xff] (!%p163_p2)   ;;  %vm1135_vm0 = vmmov (!%p163_p2), 0   ;;  %p188_p3 = scmp.lt.s32.totalorder (!%p163_p2), %s927_s16, 1 }
   0x6   : > { %166 = sbr.rel (%p163_p2) target bundleno = 390 (0x186), region = 36  ;;  %1005 = vmatprep.subr.bf16.mxu0 (!%p163_p2), %v1134_v1  ;;  %1029 = vmatprep.subr.bf16.mxu1 (!%p163_p2), %v1134_v1  ;;  %v1119_v4 = vld [vmem:[%s1423_s1 + $0x8] sm:$0xff] (!%p163_p2)   ;;  %v1136_v5 = vmov (!%p163_p2), 0   ;;  %v1120_v6 = vld [vmem:[%s1423_s1 + $0x20] sm:$0xff] (!%p163_p2)   ;;  %v707_v8 = vld [vmem:[%s1425_s3 + $0x10] sm:$0xff] (!%p163_p2)  ;;  %vm248_vm1 = vcmask (!%p163_p2), 261120  }
   0x7   : > { %1006 = vmatpush3.bf16.msra.mxu0 (!%p163_p2), %v1116_v0  ;;  %1009 = vmatprep.mubr.msk.bf16.mxu0 (!%p163_p2), %vm1135_vm0, %v1134_v1  ;;  %v705_v7 = vld [vmem:[%s1425_s3] sm:$0xff] (!%p163_p2)  ;;  %v1121_v14 = vld [vmem:[%s1423_s1 + $0x30] sm:$0xff] (!%p163_p2)   ;;  %v1122_v16 = vld [vmem:[%s1423_s1 + $0x28] sm:$0xff] (!%p163_p2)  }
   0x8   : > { %1030 = vmatpush3.bf16.msra.mxu1 (!%p163_p2), %v1117_v2  ;;  %1007 = vmatprep.subr.bf16.mxu0 (!%p163_p2), %v1134_v1  ;;  %v706_v19 = vld [vmem:[%s1425_s3 + $0x8] sm:$0xff] (!%p163_p2)  ;;  %v1123_v22 = vld [vmem:[%s1423_s1 + $0x38] sm:$0xff] (!%p163_p2)   ;;  %v709_v25 = vld [vmem:[%s1425_s3 + $0x20] sm:$0xff] (!%p163_p2) }
   0x9   : > { %1031 = vmatprep.subr.bf16.mxu1 (!%p163_p2), %v1134_v1  ;;  %1033 = vmatprep.mubr.msk.bf16.mxu1 (!%p163_p2), %vm1135_vm0, %v1134_v1  ;;  %v708_v26 = vld [vmem:[%s1425_s3 + $0x18] sm:$0xff] (!%p163_p2)  ;;  %v710_v27 = vld [vmem:[%s1425_s3 + $0x28] sm:$0xff] (!%p163_p2)  ;;  %v711_v30 = vld [vmem:[%s1425_s3 + $0x30] sm:$0xff] (!%p163_p2) }
   0xa   : > { %1114 = vset.pattern.permute.xlu0 (!%p163_p2), %v1136_v5  ;;  %1115 = vset.pattern.permute.xlu1 (!%p163_p2), %v1136_v5  ;;  %v712_v34 = vld [vmem:[%s1425_s3 + $0x38] sm:$0xff] (!%p163_p2)  ;;  %v713_v36 = vld [vmem:[%s1425_s3 + $0x40] sm:$0xff] (!%p163_p2) }
   0xb   : > { %1008 = vmatpush3.bf16.msra.mxu0 (!%p163_p2), %v1118_v3  ;;  %716 = vperm.xlu0 (!%p163_p2), %1114, %v705_v7  }
   0xc   : > { %1032 = vmatpush3.bf16.msra.mxu1 (!%p163_p2), %v1119_v4  ;;  %1053 = vmatprep.subr.bf16.mxu0 (!%p163_p2), %v1134_v1 }
   0xd   : > { %s1428_s16 = smov (!%p188_p3, %s927_s16), 1  ;;  %1077 = vmatprep.subr.bf16.mxu1 %v1134_v1  ;;  %726 = vperm.xlu1 %1115, %v707_v8  }
   0xe   : > { %s1101_s25 = smul.u32 88, %s1428_s16 }
   0xf   : > { %721 = vperm.xlu0 %1114, %v706_v19   ;;  %s1102_s7 = smul.u32 72, %s1428_s16 }
  0x10   : > { %s1197_s28 = scalar_lea.vmem %s1422_s0, %s1101_s25 }
  0x11   : > { %v217_v9 = vld [vmem:[%s1197_s28 + $0x1] sm:$0xff]  ;;  %v1211_v10 = vld [vmem:[%s1197_s28 + $0x9] sm:$0xff]  ;;  %v1225_v17 = vld [vmem:[%s1197_s28 + $0x11] sm:$0xff]  ;;  %731 = vperm.xlu1 %1115, %v708_v26   ;;  %s197_s16 = scalar_lea.vmem %s1426_s4, %s1102_s7 }
  0x12   : > { %v199_v11 = vld [vmem:[%s1197_s28] sm:$0xff]  ;;  %v226_v12 = vpack.c.bf16 %v1211_v10, %v217_v9  ;;  %v200_v13 = vld [vmem:[%s1197_s28 + $0x8] sm:$0xff]  ;;  %v201_v20 = vld [vmem:[%s1197_s28 + $0x10] sm:$0xff]  ;;  %v444_v49 = vpack.c.bf16 %v1225_v17, %v1211_v10 }
  0x13   : > { %v208_v15 = vpack.c.bf16 %v200_v13, %v199_v11  ;;  %v1228_v18 = vld [vmem:[%s1197_s28 + $0x19] sm:$0xff]  ;;  %736 = vperm.xlu0 %1114, %v709_v25   ;;  %v221_v28 = vld [vmem:[%s1197_s28 + $0x21] sm:$0xff]  ;;  %v222_v29 = vld [vmem:[%s1197_s28 + $0x29] sm:$0xff] }
  0x14   : > { %1010 = vmatmul.mubr.msk.bf16.vlgmr.msra.gmra.mrb[0].mxu0 %vm248_vm1, %v226_v12  ;;  %v202_v21 = vld [vmem:[%s1197_s28 + $0x18] sm:$0xff]  ;;  %v227_v23 = vpack.c.bf16 %v1228_v18, %v1225_v17  ;;  %v203_v31 = vld [vmem:[%s1197_s28 + $0x20] sm:$0xff]  ;;  %v204_v32 = vld [vmem:[%s1197_s28 + $0x28] sm:$0xff]  ;;  %v228_v33 = vpack.c.bf16 %v222_v29, %v221_v28  ;;  %v445_v53 = vpack.c.bf16 %v221_v28, %v1228_v18 }
  0x15   : > { %1034 = vmatmul.mubr.msk.bf16.vlgmr.msra.gmra.mrb[0].mxu1 %vm248_vm1, %v208_v15  ;;  %1054 = vmatpush3.bf16.msra.mxu0 %v1120_v6  ;;  %v209_v24 = vpack.c.bf16 %v202_v21, %v201_v20  ;;  %v210_v35 = vpack.c.bf16 %v204_v32, %v203_v31  ;;  %v223_v37 = vld [vmem:[%s1197_s28 + $0x31] sm:$0xff]  ;;  %v224_v38 = vld [vmem:[%s1197_s28 + $0x39] sm:$0xff]  ;;  %v225_v43 = vld [vmem:[%s1197_s28 + $0x41] sm:$0xff] }
  0x16   : > { %1078 = vmatpush3.bf16.msra.mxu1 %v1121_v14  ;;  %1013 = vmatprep.mubr.msk.bf16.mxu0 %vm1135_vm0, %v1134_v1  ;;  %v205_v39 = vld [vmem:[%s1197_s28 + $0x30] sm:$0xff]  ;;  %v206_v40 = vld [vmem:[%s1197_s28 + $0x38] sm:$0xff]  ;;  %v229_v41 = vpack.c.bf16 %v224_v38, %v223_v37  ;;  %v207_v44 = vld [vmem:[%s1197_s28 + $0x40] sm:$0xff]  ;;  %v230_v45 = vpack.c.bf16 %v225_v43, %v225_v43  ;;  %v446_v57 = vpack.c.bf16 %v223_v37, %v222_v29 }
  0x17   : > { %1037 = vmatprep.mubr.msk.bf16.mxu1 %vm1135_vm0, %v1134_v1  ;;  %1055 = vmatprep.subr.bf16.mxu0 %v1134_v1  ;;  %v211_v42 = vpack.c.bf16 %v206_v40, %v205_v39  ;;  %v212_v46 = vpack.c.bf16 %v207_v44, %v207_v44  ;;  %v562_v47 = vld [vmem:[%s1197_s28 + $0xa] sm:$0xff]  ;;  %v563_v48 = vld [vmem:[%s1197_s28 + $0x12] sm:$0xff]  ;;  %v564_v51 = vld [vmem:[%s1197_s28 + $0x1a] sm:$0xff]  ;;  %v447_v61 = vpack.c.bf16 %v225_v43, %v224_v38 }
  0x18   : > { %1079 = vmatprep.subr.bf16.mxu1 %v1134_v1  ;;  %741 = vperm.xlu1 %1115, %v710_v27   ;;  %v571_v50 = vpack.c.bf16 %v563_v48, %v562_v47  ;;  %v565_v52 = vld [vmem:[%s1197_s28 + $0x22] sm:$0xff]  ;;  %v566_v55 = vld [vmem:[%s1197_s28 + $0x2a] sm:$0xff]  ;;  %v567_v56 = vld [vmem:[%s1197_s28 + $0x32] sm:$0xff] }
  0x19   : > { %1056 = vmatpush3.bf16.msra.mxu0 %v1122_v16  ;;  %746 = vperm.xlu0 %1114, %v711_v30   ;;  %v572_v54 = vpack.c.bf16 %v565_v52, %v564_v51  ;;  %v573_v58 = vpack.c.bf16 %v567_v56, %v566_v55  ;;  %v568_v59 = vld [vmem:[%s1197_s28 + $0x3a] sm:$0xff]  ;;  %v569_v60 = vld [vmem:[%s1197_s28 + $0x42] sm:$0xff]  ;;  %v570_v0 = vld [vmem:[%s1197_s28 + $0x4a] sm:$0xff] }
  0x1a   : > { %1080 = vmatpush3.bf16.msra.mxu1 %v1123_v22  ;;  %v574_v62 = vpack.c.bf16 %v569_v60, %v568_v59  ;;  %v443_v63 = vld [vmem:[%s1197_s28 + $0x49] sm:$0xff]  ;;  %v575_v3 = vpack.c.bf16 %v570_v0, %v570_v0 }
  0x1b   : > { %v448_v2 = vpack.c.bf16 %v443_v63, %v443_v63 }
  0x1c   : > { %1014 = vmatmul.mubr.msk.bf16.gmra.mrb[4].mxu0 %vm248_vm1, %v227_v23  ;;  %751 = vperm.xlu1 %1115, %v712_v34  }
  0x1d   : > { %1038 = vmatmul.mubr.msk.bf16.gmra.mrb[4].mxu1 %vm248_vm1, %v209_v24  ;;  %1017 = vmatprep.mubr.msk.bf16.mxu0 %vm1135_vm0, %v1134_v1 }
  0x1e   : > { %1041 = vmatprep.mubr.msk.bf16.mxu1 %vm1135_vm0, %v1134_v1  ;;  %756 = vperm.xlu0 %1114, %v713_v36  }
  0x24   : > { %1018 = vmatmul.mubr.msk.bf16.gmra.mrb[8].mxu0 %vm248_vm1, %v228_v33 }
  0x25   : > { %1042 = vmatmul.mubr.msk.bf16.gmra.mrb[8].mxu1 %vm248_vm1, %v210_v35  ;;  %1021 = vmatprep.mubr.msk.bf16.mxu0 %vm1135_vm0, %v1134_v1 }
  0x26   : > { %1045 = vmatprep.mubr.msk.bf16.mxu1 %vm1135_vm0, %v1134_v1 }
  0x2c   : > { %1022 = vmatmul.mubr.msk.bf16.gmra.mrb[12].mxu0 %vm248_vm1, %v229_v41 }
  0x2d   : > { %1046 = vmatmul.mubr.msk.bf16.gmra.mrb[12].mxu1 %vm248_vm1, %v211_v42  ;;  %1025 = vmatprep.mubr.msk.bf16.mxu0 %vm1135_vm0, %v1134_v1 }
  0x2e   : > { %1049 = vmatprep.mubr.msk.bf16.mxu1 %vm1135_vm0, %v1134_v1 }
  0x34   : > { %1026 = vmatmul.mubr.msk.bf16.gmra.mrb[16].mxu0 %vm248_vm1, %v230_v45 }
  0x35   : > { %1050 = vmatmul.mubr.msk.bf16.gmra.mrb[16].mxu1 %vm248_vm1, %v212_v46  ;;  %1057 = vmatprep.mubr.msk.bf16.mxu0 %vm1135_vm0, %v1134_v1 }
  0x36   : > { %1081 = vmatprep.mubr.msk.bf16.mxu1 %vm1135_vm0, %v1134_v1 }
  0x3c   : > { %1058 = vmatmul.mubr.msk.bf16.vlgmr.msra.gmra.mrb[20].mxu0 %vm248_vm1, %v444_v49 }
  0x3d   : > { %1082 = vmatmul.mubr.msk.bf16.vlgmr.msra.gmra.mrb[20].mxu1 %vm248_vm1, %v571_v50  ;;  %1061 = vmatprep.mubr.msk.bf16.mxu0 %vm1135_vm0, %v1134_v1 }
  0x3e   : > { %1085 = vmatprep.mubr.msk.bf16.mxu1 %vm1135_vm0, %v1134_v1 }
  0x44   : > { %1062 = vmatmul.mubr.msk.bf16.gmra.mrb[24].mxu0 %vm248_vm1, %v445_v53 }
  0x45   : > { %1086 = vmatmul.mubr.msk.bf16.gmra.mrb[24].mxu1 %vm248_vm1, %v572_v54  ;;  %1065 = vmatprep.mubr.msk.bf16.mxu0 %vm1135_vm0, %v1134_v1 }
  0x46   : > { %1089 = vmatprep.mubr.msk.bf16.mxu1 %vm1135_vm0, %v1134_v1 }
  0x4c   : > { %1066 = vmatmul.mubr.msk.bf16.gmra.mrb[28].mxu0 %vm248_vm1, %v446_v57  ;;  %v1352_v57 = vld [vmem:[%s1424_s2] ss:$0 sm:$0xff] }
  0x4d   : > { %1090 = vmatmul.mubr.msk.bf16.gmra.mrb[28].mxu1 %vm248_vm1, %v573_v58  ;;  %1069 = vmatprep.mubr.msk.bf16.mxu0 %vm1135_vm0, %v1134_v1 }
  0x4e   : > { %1093 = vmatprep.mubr.msk.bf16.mxu1 %vm1135_vm0, %v1134_v1 }
  0x54   : > { %1070 = vmatmul.mubr.msk.bf16.gmra.mrb[32].mxu0 %vm248_vm1, %v447_v61 }
  0x55   : > { %1094 = vmatmul.mubr.msk.bf16.gmra.mrb[32].mxu1 %vm248_vm1, %v574_v62  ;;  %1073 = vmatprep.mubr.msk.bf16.mxu0 %vm1135_vm0, %v1134_v1 }
  0x56   : > { %1097 = vmatprep.mubr.msk.bf16.mxu1 %vm1135_vm0, %v1134_v1 }
  0x5c   : > { %1074 = vmatmul.mubr.msk.bf16.gmra.mrb[36].mxu0 %vm248_vm1, %v448_v2 }
  0x5d   : > { %1098 = vmatmul.mubr.msk.bf16.gmra.mrb[36].mxu1 %vm248_vm1, %v575_v3 }
  0x8a   : > { %v1347_v53 = vpop.permute.xlu0 %716 }
  0xe7   : > { %v298_v4 = vpop.f32.mrb[0].mxu0 }
  0xe8   : > { %v397_v5 = vpop.f32.mrb[0].mxu1  ;;  %v1011_v6 = vpop.f32.mrb[1].mxu0 }
  0xe9   : > { %v398_v7 = vadd.f32 %v397_v5, %v298_v4  ;;  %v1035_v8 = vpop.f32.mrb[1].mxu1  ;;  %v301_v9 = vpop.f32.mrb[2].mxu0 }
  0xea   : > { %v400_v10 = vpop.f32.mrb[2].mxu1  ;;  %v1012_v11 = vpop.f32.mrb[3].mxu0 }
  0xeb   : > { %v401_v12 = vadd.f32 %v400_v10, %v301_v9  ;;  %v1036_v13 = vpop.f32.mrb[3].mxu1  ;;  %v1357_v4 = vpop.permute.xlu0 %721 }
  0xef   : > { %v306_v14 = vpop.f32.mrb[4].mxu0 }
  0xf0   : > { %v405_v15 = vpop.f32.mrb[4].mxu1  ;;  %v1015_v1 = vpop.f32.mrb[5].mxu0 }
  0xf1   : > { %v406_v16 = vadd.f32 %v405_v15, %v306_v14  ;;  %v1039_v17 = vpop.f32.mrb[5].mxu1  ;;  %v309_v18 = vpop.f32.mrb[6].mxu0 }
  0xf2   : > { %v408_v19 = vpop.f32.mrb[6].mxu1  ;;  %v1016_v20 = vpop.f32.mrb[7].mxu0 }
  0xf3   : > { %v409_v21 = vadd.f32 %v408_v19, %v309_v18  ;;  %v1040_v22 = vpop.f32.mrb[7].mxu1 }
  0xf7   : > { %v314_v23 = vpop.f32.mrb[8].mxu0 }
  0xf8   : > { %v413_v24 = vpop.f32.mrb[8].mxu1  ;;  %v1019_v25 = vpop.f32.mrb[9].mxu0 }
  0xf9   : > { %v1337_v26 = vadd.f32 %v413_v24, %v314_v23  ;;  %v1043_v27 = vpop.f32.mrb[9].mxu1  ;;  %v317_v28 = vpop.f32.mrb[10].mxu0 }
  0xfa   : > { %v416_v29 = vpop.f32.mrb[10].mxu1  ;;  %v1020_v30 = vpop.f32.mrb[11].mxu0 }
  0xfb   : > { %v1339_v31 = vadd.f32 %v416_v29, %v317_v28  ;;  %v1044_v32 = vpop.f32.mrb[11].mxu1 }
  0xff   : > { %v322_v33 = vpop.f32.mrb[12].mxu0 }
 0x100   : > { %v421_v34 = vpop.f32.mrb[12].mxu1  ;;  %v1023_v35 = vpop.f32.mrb[13].mxu0 }
 0x101   : > { %v1341_v36 = vadd.f32 %v421_v34, %v322_v33  ;;  %v1047_v37 = vpop.f32.mrb[13].mxu1  ;;  %v325_v38 = vpop.f32.mrb[14].mxu0 }
 0x102   : > { %v424_v39 = vpop.f32.mrb[14].mxu1  ;;  %v1024_v40 = vpop.f32.mrb[15].mxu0 }
 0x103   : > { %v1343_v41 = vadd.f32 %v424_v39, %v325_v38  ;;  %v1048_v42 = vpop.f32.mrb[15].mxu1 }
 0x107   : > { %v330_v43 = vpop.f32.mrb[16].mxu0 }
 0x108   : > { %v429_v44 = vpop.f32.mrb[16].mxu1  ;;  %v1027_v45 = vpop.f32.mrb[17].mxu0 }
 0x109   : > { %v1345_v46 = vadd.f32 %v429_v44, %v330_v43  ;;  %v1051_v47 = vpop.f32.mrb[17].mxu1  ;;  %v333_v48 = vpop.f32.mrb[18].mxu0 }
 0x10a   : > { %v432_v49 = vpop.f32.mrb[18].mxu1  ;;  %v1028_v50 = vpop.f32.mrb[19].mxu0 }
 0x10b   : > { %v1052_v51 = vpop.f32.mrb[19].mxu1  ;;  %v1383_v45 = vpop.permute.xlu0 %736 }
 0x10f   : > { %v515_v52 = vpop.f32.mrb[20].mxu0 }
 0x110   : > { %v553_v54 = vadd.f32 %v515_v52, %v398_v7  ;;  %v642_v55 = vpop.f32.mrb[20].mxu1  ;;  %v1059_v56 = vpop.f32.mrb[21].mxu0 }
 0x111   : > { %v1083_v58 = vpop.f32.mrb[21].mxu1  ;;  %v518_v59 = vpop.f32.mrb[22].mxu0 }
 0x112   : > { %v680_v60 = vadd.f32 %v642_v55, %v553_v54  ;;  %v554_v61 = vadd.f32 %v518_v59, %v401_v12  ;;  %v645_v62 = vpop.f32.mrb[22].mxu1  ;;  %v1060_v63 = vpop.f32.mrb[23].mxu0 }
 0x113   : > { %v1084_v0 = vpop.f32.mrb[23].mxu1  ;;  %v1362_v7 = vpop.permute.xlu1 %726 }
 0x114   : > { %v1355_v2 = vadd.f32 %v1352_v57, %v680_v60  ;;  %v681_v3 = vadd.f32 %v645_v62, %v554_v61 }
 0x116   : > { %v1360_v5 = vadd.f32 %v1352_v57, %v681_v3  ;;  %v759_v8 = vmul.f32 %v1347_v53, %v1355_v2 }
 0x117   : > { %v523_v6 = vpop.f32.mrb[24].mxu0  ;;  %v1371_v24 = vpop.permute.xlu1 %731 }
 0x118   : > { %v760_v9 = vmul.f32 %v1357_v4, %v1360_v5  ;;  %v555_v10 = vadd.f32 %v523_v6, %v406_v16  ;;  %v650_v11 = vpop.f32.mrb[24].mxu1  ;;  %v1063_v12 = vpop.f32.mrb[25].mxu0 }
 0x119   : > { %v1087_v13 = vpop.f32.mrb[25].mxu1  ;;  %v526_v14 = vpop.f32.mrb[26].mxu0 }
 0x11a   : > { %v768_v15 = vadd.f32 %v760_v9, %v759_v8  ;;  %v682_v1 = vadd.f32 %v650_v11, %v555_v10  ;;  %v556_v17 = vadd.f32 %v526_v14, %v409_v21  ;;  %v653_v18 = vpop.f32.mrb[26].mxu1  ;;  %v1064_v19 = vpop.f32.mrb[27].mxu0 }
 0x11b   : > { %v1088_v20 = vpop.f32.mrb[27].mxu1  ;;  %v1387_v48 = vpop.permute.xlu1 %741 }
 0x11c   : > { %v1369_v22 = vadd.f32 %v1352_v57, %v682_v1  ;;  %v683_v23 = vadd.f32 %v653_v18, %v556_v17  ;;  %v747_v6 = vpop.permute.xlu0 %746 }
 0x11e   : > { %v1374_v25 = vadd.f32 %v1352_v57, %v683_v23  ;;  %v761_v16 = vmul.f32 %v1362_v7, %v1369_v22 }
 0x11f   : > { %v531_v27 = vpop.f32.mrb[28].mxu0  ;;  %v752_v10 = vpop.permute.xlu1 %751 }
 0x120   : > { %v769_v28 = vadd.f32 %v768_v15, %v761_v16  ;;  %v762_v21 = vmul.f32 %v1371_v24, %v1374_v25  ;;  %v557_v29 = vadd.f32 %v531_v27, %v1337_v26  ;;  %v658_v30 = vpop.f32.mrb[28].mxu1  ;;  %v1067_v32 = vpop.f32.mrb[29].mxu0 }
 0x121   : > { %v1091_v33 = vpop.f32.mrb[29].mxu1  ;;  %v534_v34 = vpop.f32.mrb[30].mxu0 }
 0x122   : > { %v770_v35 = vadd.f32 %v769_v28, %v762_v21  ;;  %v684_v37 = vadd.f32 %v658_v30, %v557_v29  ;;  %v558_v38 = vadd.f32 %v534_v34, %v1339_v31  ;;  %v661_v39 = vpop.f32.mrb[30].mxu1  ;;  %v1068_v40 = vpop.f32.mrb[31].mxu0 }
 0x123   : > { %v1092_v42 = vpop.f32.mrb[31].mxu1  ;;  %v757_v27 = vpop.permute.xlu0 %756 }
 0x124   : > { %v700_v43 = vadd.f32 %v1352_v57, %v684_v37  ;;  %v685_v44 = vadd.f32 %v661_v39, %v558_v38 }
 0x126   : > { %v763_v47 = vmul.f32 %v1383_v45, %v700_v43  ;;  %v701_v26 = vadd.f32 %v1352_v57, %v685_v44 }
 0x127   : > { %v539_v49 = vpop.f32.mrb[32].mxu0 }
 0x128   : > { %v764_v50 = vmul.f32 %v1387_v48, %v701_v26  ;;  %v771_v51 = vadd.f32 %v770_v35, %v763_v47  ;;  %v559_v31 = vadd.f32 %v539_v49, %v1341_v36  ;;  %v666_v52 = vpop.f32.mrb[32].mxu1  ;;  %v1071_v54 = vpop.f32.mrb[33].mxu0 }
 0x129   : > { %v1095_v55 = vpop.f32.mrb[33].mxu1  ;;  %v542_v56 = vpop.f32.mrb[34].mxu0 }
 0x12a   : > { %v772_v58 = vadd.f32 %v771_v51, %v764_v50  ;;  %v686_v59 = vadd.f32 %v666_v52, %v559_v31  ;;  %v560_v60 = vadd.f32 %v542_v56, %v1343_v41  ;;  %v669_v61 = vpop.f32.mrb[34].mxu1  ;;  %v1072_v62 = vpop.f32.mrb[35].mxu0 }
 0x12b   : > { %v1096_v63 = vpop.f32.mrb[35].mxu1 }
 0x12c   : > { %v702_v0 = vadd.f32 %v1352_v57, %v686_v59  ;;  %v687_v3 = vadd.f32 %v669_v61, %v560_v60 }
 0x12e   : > { %v765_v8 = vmul.f32 %v747_v6, %v702_v0  ;;  %v703_v9 = vadd.f32 %v1352_v57, %v687_v3 }
 0x12f   : > { %v547_v36 = vpop.f32.mrb[36].mxu0 }
 0x130   : > { %v773_v11 = vadd.f32 %v772_v58, %v765_v8  ;;  %v766_v12 = vmul.f32 %v752_v10, %v703_v9  ;;  %v561_v13 = vadd.f32 %v547_v36, %v1345_v46  ;;  %v674_v14 = vpop.f32.mrb[36].mxu1  ;;  %v1075_v15 = vpop.f32.mrb[37].mxu0 }
 0x131   : > { %v1099_v1 = vpop.f32.mrb[37].mxu1  ;;  %v550_v41 = vpop.f32.mrb[38].mxu0 }
 0x132   : > { %v774_v17 = vadd.f32 %v773_v11, %v766_v12  ;;  %v688_v18 = vadd.f32 %v674_v14, %v561_v13  ;;  %v677_v19 = vpop.f32.mrb[38].mxu1  ;;  %v1076_v20 = vpop.f32.mrb[39].mxu0 }
 0x133   : > { %v1100_v23 = vpop.f32.mrb[39].mxu1 }
 0x134   : > { %v704_v16 = vadd.f32 %v1352_v57, %v688_v18 }
 0x136   : > { %v767_v28 = vmul.f32 %v757_v27, %v704_v16 }
 0x138   : > { %v775_v21 = vadd.f32 %v774_v17, %v767_v28 }
 0x13a   : > { %v776_v29 = vrot.slane %v775_v21, 4 }
 0x13c   : > { %v777_v30 = vadd.f32 %v776_v29, %v775_v21 }
 0x13e   : > { %v778_v32 = vrot.slane %v777_v30, 2 }
 0x140   : > { %v779_v33 = vadd.f32 %v778_v32, %v777_v30 }
 0x142   : > { %v780_v34 = vrot.slane %v779_v33, 1 }
 0x144   : > { %v781_v46 = vadd.f32 %v780_v34, %v779_v33 }
 0x146   : > { %v782_v35 = vmul.f32 0.015625, %v781_v46 }
 0x148   : > { %v783_v37 = vsub.f32 %v1355_v2, %v782_v35  ;;  %v784_v38 = vsub.f32 %v1360_v5, %v782_v35  ;;  %v785_v39 = vsub.f32 %v1369_v22, %v782_v35  ;;  %v786_v40 = vsub.f32 %v1374_v25, %v782_v35 }
 0x149   : > { %v787_v42 = vsub.f32 %v700_v43, %v782_v35  ;;  %v788_v57 = vsub.f32 %v701_v26, %v782_v35  ;;  %v789_v44 = vsub.f32 %v702_v0, %v782_v35  ;;  %v790_v47 = vsub.f32 %v703_v9, %v782_v35 }
 0x14a   : > { %v791_v49 = vsub.f32 %v704_v16, %v782_v35  ;;  %v792_v50 = vmul.f32 %v783_v37, %v783_v37  ;;  %v793_v51 = vmul.f32 %v784_v38, %v784_v38  ;;  %v794_v31 = vmul.f32 %v785_v39, %v785_v39 }
 0x14b   : > { %v795_v52 = vmul.f32 %v786_v40, %v786_v40  ;;  %v796_v2 = vmul.f32 %v787_v42, %v787_v42  ;;  %v797_v22 = vmul.f32 %v788_v57, %v788_v57  ;;  %v798_v26 = vmul.f32 %v789_v44, %v789_v44 }
 0x14c   : > { %v801_v54 = vmul.f32 %v792_v50, %v1347_v53  ;;  %v802_v55 = vmul.f32 %v793_v51, %v1357_v4  ;;  %v803_v5 = vmul.f32 %v794_v31, %v1362_v7  ;;  %v799_v60 = vmul.f32 %v790_v47, %v790_v47 }
 0x14d   : > { %v804_v25 = vmul.f32 %v795_v52, %v1371_v24  ;;  %v805_v58 = vmul.f32 %v796_v2, %v1383_v45  ;;  %v806_v61 = vmul.f32 %v797_v22, %v1387_v48  ;;  %v800_v63 = vmul.f32 %v791_v49, %v791_v49 }
 0x14e   : > { %v810_v56 = vadd.f32 %v802_v55, %v801_v54  ;;  %v807_v53 = vmul.f32 %v798_v26, %v747_v6  ;;  %v808_v4 = vmul.f32 %v799_v60, %v752_v10 }
 0x14f   : > { %v809_v7 = vmul.f32 %v800_v63, %v757_v27 }
 0x150   : > { %v811_v43 = vadd.f32 %v810_v56, %v803_v5 }
 0x152   : > { %v812_v59 = vadd.f32 %v811_v43, %v804_v25 }
 0x154   : > { %v813_v62 = vadd.f32 %v812_v59, %v805_v58 }
 0x156   : > { %v814_v0 = vadd.f32 %v813_v62, %v806_v61 }
 0x158   : > { %v815_v3 = vadd.f32 %v814_v0, %v807_v53 }
 0x15a   : > { %v816_v8 = vadd.f32 %v815_v3, %v808_v4 }
 0x15c   : > { %v817_v9 = vadd.f32 %v816_v8, %v809_v7 }
 0x15e   : > { %v818_v36 = vrot.slane %v817_v9, 4 }
 0x160   : > { %v819_v24 = vadd.f32 %v818_v36, %v817_v9 }
 0x162   : > { %v820_v11 = vrot.slane %v819_v24, 2 }
 0x164   : > { %v821_v12 = vadd.f32 %v820_v11, %v819_v24 }
 0x166   : > { %v822_v13 = vrot.slane %v821_v12, 1 }
 0x168   : > { %v823_v45 = vadd.f32 %v822_v13, %v821_v12 }
 0x16a   : > { %v824_v14 = vmul.f32 0.015625, %v823_v45 }
 0x16c   : > { %v825_v15 = vadd.f32 1e-05, %v824_v14 }
 0x16e   : > { %1124 = vrsqrt.f32 %v825_v15 }
 0x178   : > { %v1125_v48 = vpop.eup %1124 }
 0x179   : > { %v827_v1 = vmul.f32 %v1125_v48, %v783_v37  ;;  %v828_v6 = vmul.f32 %v1125_v48, %v784_v38  ;;  %v829_v41 = vmul.f32 %v1125_v48, %v785_v39  ;;  %v830_v17 = vmul.f32 %v1125_v48, %v786_v40 }
 0x17a   : > { %v831_v10 = vmul.f32 %v1125_v48, %v787_v42  ;;  %v832_v18 = vmul.f32 %v1125_v48, %v788_v57  ;;  %v833_v19 = vmul.f32 %v1125_v48, %v789_v44  ;;  %v834_v20 = vmul.f32 %v1125_v48, %v790_v47 }
 0x17b   : > { %v835_v23 = vmul.f32 %v1125_v48, %v791_v49  ;;  %vm836_vm2 = vcmp.ge.f32.partialorder %v827_v1, 0.0  ;;  %vm837_vm3 = vcmp.ge.f32.partialorder %v828_v6, 0.0  ;;  %vm838_vm4 = vcmp.ge.f32.partialorder %v829_v41, 0.0 }
 0x17c   : > { %vm839_vm5 = vcmp.ge.f32.partialorder %v830_v17, 0.0  ;;  %vm840_vm6 = vcmp.ge.f32.partialorder %v831_v10, 0.0  ;;  %vm841_vm7 = vcmp.ge.f32.partialorder %v832_v18, 0.0  ;;  %vm842_vm8 = vcmp.ge.f32.partialorder %v833_v19, 0.0 }
 0x17d   : > { %vm843_vm9 = vcmp.ge.f32.partialorder %v834_v20, 0.0  ;;  %vm844_vm10 = vcmp.ge.f32.partialorder %v835_v23, 0.0  ;;  %v845_v16 = vmul.f32 0.2, %v827_v1  ;;  %v846_v27 = vmul.f32 0.2, %v828_v6 }
 0x17e   : > { %v847_v28 = vmul.f32 0.2, %v829_v41  ;;  %v848_v21 = vmul.f32 0.2, %v830_v17  ;;  %v849_v29 = vmul.f32 0.2, %v831_v10 }
 0x17f   : > { %v850_v30 = vmul.f32 0.2, %v832_v18  ;;  %v851_v32 = vmul.f32 0.2, %v833_v19  ;;  %v852_v33 = vmul.f32 0.2, %v834_v20  ;;  %v854_v34 = vsel %vm836_vm2, %v827_v1, %v845_v16 }
 0x180   : > { %v853_v46 = vmul.f32 0.2, %v835_v23  ;;  %v855_v35 = vsel %vm837_vm3, %v828_v6, %v846_v27  ;;  %v856_v37 = vsel %vm838_vm4, %v829_v41, %v847_v28  ;;  %v857_v38 = vsel %vm839_vm5, %v830_v17, %v848_v21  ;;  %863 = vst [vmem:[%s197_s16] sm:$0xff] %v854_v34 }
 0x181   : > { %v858_v39 = vsel %vm840_vm6, %v831_v10, %v849_v29  ;;  %v859_v40 = vsel %vm841_vm7, %v832_v18, %v850_v30  ;;  %v860_v42 = vsel %vm842_vm8, %v833_v19, %v851_v32  ;;  %v861_v57 = vsel %vm843_vm9, %v834_v20, %v852_v33  ;;  %864 = vst [vmem:[%s197_s16 + $0x8] sm:$0xff] %v855_v35 }
 0x182   : > { %865 = vst [vmem:[%s197_s16 + $0x10] sm:$0xff] %v856_v37  ;;  %866 = vst [vmem:[%s197_s16 + $0x18] sm:$0xff] %v857_v38  ;;  %v862_v44 = vsel %vm844_vm10, %v835_v23, %v853_v46 }
 0x183   : > { %867 = vst [vmem:[%s197_s16 + $0x20] sm:$0xff] %v858_v39  ;;  %868 = vst [vmem:[%s197_s16 + $0x28] sm:$0xff] %v859_v40 }
 0x184   : > { %869 = vst [vmem:[%s197_s16 + $0x30] sm:$0xff] %v860_v42  ;;  %870 = vst [vmem:[%s197_s16 + $0x38] sm:$0xff] %v861_v57 }
 0x185   : > { %871 = vst [vmem:[%s197_s16 + $0x40] sm:$0xff] %v862_v44 }
 0x186 PF: > { %s14_s15 = sadd.s32 1, %s1132_s15  }
 0x187   : > { %p11_p4 = scmp.ge.s32.totalorder %s14_s15, 4  }
 0x189   :  { %13 = sbr.rel (!%p11_p4) target bundleno = 1 (0x1), region = 69 }

// kernel: cyclegan_discriminator.7
= control target key start
LH: loop header
LB: loop body
LE: loop exit
PB: predicated region body
PF: predicated region fallthrough
CT: control target
= control target key end

     0   :  { %s902_s15 = smov 0   ;;  %s1007_s0 = inlined_call_operand.vmem [shape: f32[2,26,64], index: 0, kind: input, shape index: {}]   ;;  %s1008_s1 = inlined_call_operand.vmem [shape: bf16[4,64,128], index: 1, kind: input, shape index: {}]   ;;  %s1009_s2 = inlined_call_operand.vmem [shape: f32[1,128], index: 2, kind: input, shape index: {}]   ;;  %s1010_s3 = inlined_call_operand.vmem [shape: f32[20,1], index: 3, kind: input, shape index: {}]   ;;  %s1011_s4 = inlined_call_operand.vmem [shape: f32[2,20,128], index: 4, kind: output, shape index: {}]  }
   0x1 LB: > { %s706_s16 = sadd.s32 4294967295, %s874_s15   ;;  %p710_p0 = scmp.ge.s32.totalorder %s874_s15, 1  ;;  %s874_s15 = sphi %s902_s15, %s14_s15  }
   0x2   : > { %p162_p1 = scmp.lt.s32.totalorder %s874_s15, 3 }
   0x4   : > { %p163_p2 = pnand %p710_p0, %p162_p1 }
   0x5   : > { %v850_v0 = vld [vmem:[%s1008_s1 + $0x20] sm:$0xff] (!%p163_p2)   ;;  %p188_p3 = scmp.lt.s32.totalorder (!%p163_p2), %s706_s16, 1  ;;  %v852_v2 = vld [vmem:[%s1008_s1 + $0x28] sm:$0xff] (!%p163_p2)   ;;  %v854_v4 = vld [vmem:[%s1008_s1 + $0x30] sm:$0xff] (!%p163_p2)   ;;  %v876_v6 = vmov (!%p163_p2), 0   ;;  %vm250_vm0 = vcmask (!%p163_p2), 523264  }
   0x6   : > { %166 = sbr.rel (%p163_p2) target bundleno = 323 (0x143), region = 36  ;;  %v851_v1 = vld [vmem:[%s1008_s1] sm:$0xff] (!%p163_p2)   ;;  %790 = vmatprep.subr.bf16.mxu0 (!%p163_p2), %v850_v0  ;;  %v853_v3 = vld [vmem:[%s1008_s1 + $0x8] sm:$0xff] (!%p163_p2)   ;;  %v855_v5 = vld [vmem:[%s1008_s1 + $0x10] sm:$0xff] (!%p163_p2)   ;;  %848 = vset.pattern.permute.xlu0 (!%p163_p2), %v876_v6  ;;  %vm605_vm1 = vcmask (!%p163_p2), 1043456  }
   0x7   : > { %802 = vmatprep.subr.bf16.mxu1 (!%p163_p2), %v851_v1  ;;  %791 = vmatpush3.bf16.msra.mxu0 (!%p163_p2), %v850_v0  ;;  %v856_v7 = vld [vmem:[%s1008_s1 + $0x38] sm:$0xff] (!%p163_p2)   ;;  %v858_v17 = vld [vmem:[%s1008_s1 + $0x40] sm:$0xff] (!%p163_p2)   ;;  %v860_v21 = vld [vmem:[%s1008_s1 + $0x48] sm:$0xff] (!%p163_p2)  }
   0x8   : > { %803 = vmatpush3.bf16.msra.mxu1 (!%p163_p2), %v851_v1  ;;  %792 = vmatprep.subr.bf16.mxu0 (!%p163_p2), %v852_v2  ;;  %v857_v11 = vld [vmem:[%s1008_s1 + $0x18] sm:$0xff] (!%p163_p2)   ;;  %v859_v18 = vld [vmem:[%s1008_s1 + $0x60] sm:$0xff] (!%p163_p2)   ;;  %v861_v22 = vld [vmem:[%s1008_s1 + $0x68] sm:$0xff] (!%p163_p2)  }
   0x9   : > { %804 = vmatprep.subr.bf16.mxu1 (!%p163_p2), %v853_v3  ;;  %849 = vset.pattern.permute.xlu1 (!%p163_p2), %v876_v6  ;;  %v862_v28 = vld [vmem:[%s1008_s1 + $0x50] sm:$0xff] (!%p163_p2)   ;;  %v583_v30 = vld [vmem:[%s1010_s3] sm:$0xff] (!%p163_p2)  ;;  %v584_v33 = vld [vmem:[%s1010_s3 + $0x8] sm:$0xff] (!%p163_p2) }
   0xa   : > { %v585_v31 = vld [vmem:[%s1010_s3 + $0x10] sm:$0xf] (!%p163_p2)  ;;  %588 = vperm.xlu0 (!%p163_p2), %848, %v583_v30   ;;  %v864_v34 = vld [vmem:[%s1008_s1 + $0x58] sm:$0xff] (!%p163_p2)   ;;  %v762_v58 = vld [vmem:[%s1009_s2] ss:$0 sm:$0xff] (!%p163_p2) }
   0xb   : > { %793 = vmatpush3.bf16.msra.mxu0 (!%p163_p2), %v852_v2  ;;  %v863_v32 = vld [vmem:[%s1008_s1 + $0x70] sm:$0xff] (!%p163_p2)   ;;  %598 = vperm.xlu1 (!%p163_p2), %849, %v585_v31   ;;  %v865_v35 = vld [vmem:[%s1008_s1 + $0x78] sm:$0xff] (!%p163_p2)  }
   0xc   : > { %805 = vmatpush3.bf16.msra.mxu1 (!%p163_p2), %v853_v3  ;;  %794 = vmatprep.subr.bf16.mxu0 (!%p163_p2), %v854_v4 }
   0xd   : > { %s1013_s16 = smov (!%p188_p3, %s706_s16), 1  ;;  %806 = vmatprep.subr.bf16.mxu1 %v855_v5 }
   0xe   : > { %s765_s27 = sshll.u32 %s1013_s16, 5  ;;  %593 = vperm.xlu0 %848, %v584_v33   ;;  %s838_s11 = smul.u32 24, %s1013_s16 }
   0xf   : > { %s934_s6 = scalar_lea.vmem %s1007_s0, %s765_s27  ;;  %795 = vmatpush3.bf16.msra.mxu0 %v854_v4 }
  0x10   : > { %v212_v8 = vld [vmem:[%s934_s6 + $0x1] sm:$0xff]  ;;  %v213_v9 = vld [vmem:[%s934_s6 + $0x9] sm:$0xff]  ;;  %v214_v15 = vld [vmem:[%s934_s6 + $0x11] sm:$0xf]  ;;  %807 = vmatpush3.bf16.msra.mxu1 %v855_v5  ;;  %796 = vmatprep.subr.bf16.mxu0 %v856_v7  ;;  %s197_s14 = scalar_lea.vmem %s1011_s4, %s838_s11 }
  0x11   : > { %v199_v10 = vld [vmem:[%s934_s6] sm:$0xff]  ;;  %v215_v12 = vpack.c.bf16 %v213_v9, %v212_v8  ;;  %v200_v13 = vld [vmem:[%s934_s6 + $0x8] sm:$0xff]  ;;  %v201_v16 = vld [vmem:[%s934_s6 + $0x10] sm:$0xf]  ;;  %808 = vmatprep.subr.bf16.mxu1 %v857_v11  ;;  %v216_v19 = vpack.c.bf16 %v214_v15, %v214_v15 }
  0x12   : > { %v202_v14 = vpack.c.bf16 %v200_v13, %v199_v10  ;;  %v203_v20 = vpack.c.bf16 %v201_v16, %v201_v16  ;;  %v383_v23 = vld [vmem:[%s934_s6 + $0x5] sm:$0xff]  ;;  %v384_v24 = vld [vmem:[%s934_s6 + $0xd] sm:$0xff]  ;;  %v385_v36 = vld [vmem:[%s934_s6 + $0x15] sm:$0xf] }
  0x13   : > { %798 = vmatprep.mubr.msk.bf16.mxu0 %vm250_vm0, %v215_v12  ;;  %797 = vmatpush3.bf16.msra.mxu0 %v856_v7  ;;  %v478_v25 = vld [vmem:[%s934_s6 + $0x6] sm:$0xff]  ;;  %v386_v26 = vpack.c.bf16 %v384_v24, %v383_v23  ;;  %v479_v27 = vld [vmem:[%s934_s6 + $0xe] sm:$0xff]  ;;  %v480_v37 = vld [vmem:[%s934_s6 + $0x16] sm:$0xf]  ;;  %v387_v38 = vpack.c.bf16 %v385_v36, %v385_v36 }
  0x14   : > { %810 = vmatprep.mubr.msk.bf16.mxu1 %vm250_vm0, %v202_v14  ;;  %809 = vmatpush3.bf16.msra.mxu1 %v857_v11  ;;  %v481_v29 = vpack.c.bf16 %v479_v27, %v478_v25  ;;  %v482_v39 = vpack.c.bf16 %v480_v37, %v480_v37 }
  0x15   : > { %814 = vmatprep.subr.bf16.mxu0 %v858_v17  ;;  %826 = vmatprep.subr.bf16.mxu1 %v859_v18 }
  0x16   : > { %799 = vmatmul.mubr.msk.bf16.vlgmr.msra.gmra.mrb[0].mxu0 %vm250_vm0, %v216_v19 }
  0x17   : > { %811 = vmatmul.mubr.msk.bf16.vlgmr.msra.gmra.mrb[0].mxu1 %vm250_vm0, %v203_v20  ;;  %815 = vmatpush3.bf16.msra.mxu0 %v858_v17 }
  0x18   : > { %827 = vmatpush3.bf16.msra.mxu1 %v859_v18  ;;  %816 = vmatprep.subr.bf16.mxu0 %v860_v21 }
  0x19   : > { %828 = vmatprep.subr.bf16.mxu1 %v861_v22  ;;  %822 = vmatprep.mubr.msk.bf16.mxu0 %vm250_vm0, %v386_v26 }
  0x1a   : > { %834 = vmatprep.mubr.msk.bf16.mxu1 %vm250_vm0, %v481_v29 }
  0x1b   : > { %817 = vmatpush3.bf16.msra.mxu0 %v860_v21 }
  0x1c   : > { %829 = vmatpush3.bf16.msra.mxu1 %v861_v22  ;;  %818 = vmatprep.subr.bf16.mxu0 %v862_v28 }
  0x1d   : > { %830 = vmatprep.subr.bf16.mxu1 %v863_v32 }
  0x1f   : > { %819 = vmatpush3.bf16.msra.mxu0 %v862_v28 }
  0x20   : > { %831 = vmatpush3.bf16.msra.mxu1 %v863_v32  ;;  %820 = vmatprep.subr.bf16.mxu0 %v864_v34 }
  0x21   : > { %832 = vmatprep.subr.bf16.mxu1 %v865_v35 }
  0x23   : > { %821 = vmatpush3.bf16.msra.mxu0 %v864_v34 }
  0x24   : > { %833 = vmatpush3.bf16.msra.mxu1 %v865_v35 }
  0x26   : > { %823 = vmatmul.mubr.msk.bf16.vlgmr.msra.gmra.mrb[4].mxu0 %vm250_vm0, %v387_v38 }
  0x27   : > { %835 = vmatmul.mubr.msk.bf16.vlgmr.msra.gmra.mrb[4].mxu1 %vm250_vm0, %v482_v39 }
  0x89   : > { %v589_v52 = vpop.permute.xlu0 %588 }
  0x8a   : > { %v599_v5 = vpop.permute.xlu1 %598 }
  0x8d   : > { %v594_v7 = vpop.permute.xlu0 %593 }
  0xe9   : > { %v800_v40 = vpop.f32.mrb[0].mxu0 }
  0xea   : > { %v812_v41 = vpop.f32.mrb[0].mxu1  ;;  %v291_v42 = vpop.f32.mrb[1].mxu0 }
  0xeb   : > { %v378_v43 = vadd.f32 %v812_v41, %v800_v40  ;;  %v369_v44 = vpop.f32.mrb[1].mxu1  ;;  %v801_v45 = vpop.f32.mrb[2].mxu0 }
  0xec   : > { %v370_v46 = vadd.f32 %v369_v44, %v291_v42  ;;  %v813_v47 = vpop.f32.mrb[2].mxu1  ;;  %v294_v48 = vpop.f32.mrb[3].mxu0 }
  0xed   : > { %v372_v49 = vpop.f32.mrb[3].mxu1 }
  0xee   : > { %v373_v50 = vadd.f32 %v372_v49, %v294_v48 }
  0xf9   : > { %v824_v51 = vpop.f32.mrb[4].mxu0 }
  0xfa   : > { %v477_v53 = vadd.f32 %v824_v51, %v378_v43  ;;  %v836_v54 = vpop.f32.mrb[4].mxu1  ;;  %v461_v55 = vpop.f32.mrb[5].mxu0 }
  0xfb   : > { %v475_v56 = vadd.f32 %v461_v55, %v370_v46  ;;  %v556_v57 = vpop.f32.mrb[5].mxu1  ;;  %v825_v59 = vpop.f32.mrb[6].mxu0 }
  0xfc   : > { %v572_v60 = vadd.f32 %v836_v54, %v477_v53  ;;  %v837_v61 = vpop.f32.mrb[6].mxu1  ;;  %v464_v62 = vpop.f32.mrb[7].mxu0 }
  0xfd   : > { %v570_v63 = vadd.f32 %v556_v57, %v475_v56  ;;  %v476_v0 = vadd.f32 %v464_v62, %v373_v50  ;;  %v559_v1 = vpop.f32.mrb[7].mxu1 }
  0xfe   : > { %v582_v2 = vadd.f32 %v762_v58, %v572_v60 }
  0xff   : > { %v580_v3 = vadd.f32 %v762_v58, %v570_v63  ;;  %v571_v4 = vadd.f32 %v559_v1, %v476_v0 }
 0x100   : > { %v603_v8 = vmul.f32 %v599_v5, %v582_v2 }
 0x101   : > { %v581_v6 = vadd.f32 %v762_v58, %v571_v4  ;;  %v601_v9 = vmul.f32 %v589_v52, %v580_v3 }
 0x102   : > { %v606_v12 = vsel %vm605_vm1, %v603_v8, 0.0 }
 0x103   : > { %v602_v10 = vmul.f32 %v594_v7, %v581_v6 }
 0x105   : > { %v604_v11 = vadd.f32 %v602_v10, %v601_v9 }
 0x107   : > { %v607_v13 = vadd.f32 %v606_v12, %v604_v11 }
 0x109   : > { %v608_v14 = vrot.slane %v607_v13, 4 }
 0x10b   : > { %v609_v15 = vadd.f32 %v608_v14, %v607_v13 }
 0x10d   : > { %v610_v16 = vrot.slane %v609_v15, 2 }
 0x10f   : > { %v611_v17 = vadd.f32 %v610_v16, %v609_v15 }
 0x111   : > { %v612_v18 = vrot.slane %v611_v17, 1 }
 0x113   : > { %v613_v19 = vadd.f32 %v612_v18, %v611_v17 }
 0x115   : > { %v614_v20 = vmul.f32 0.0625, %v613_v19 }
 0x117   : > { %v615_v21 = vsub.f32 %v580_v3, %v614_v20  ;;  %v616_v22 = vsub.f32 %v581_v6, %v614_v20  ;;  %v617_v23 = vsub.f32 %v582_v2, %v614_v20 }
 0x119   : > { %v618_v24 = vmul.f32 %v615_v21, %v615_v21  ;;  %v619_v25 = vmul.f32 %v616_v22, %v616_v22  ;;  %v620_v26 = vmul.f32 %v617_v23, %v617_v23 }
 0x11b   : > { %v621_v27 = vmul.f32 %v618_v24, %v589_v52  ;;  %v622_v28 = vmul.f32 %v619_v25, %v594_v7  ;;  %v623_v29 = vmul.f32 %v620_v26, %v599_v5 }
 0x11d   : > { %v624_v30 = vadd.f32 %v622_v28, %v621_v27  ;;  %v625_v31 = vsel %vm605_vm1, %v623_v29, 0.0 }
 0x11f   : > { %v626_v32 = vadd.f32 %v625_v31, %v624_v30 }
 0x121   : > { %v627_v33 = vrot.slane %v626_v32, 4 }
 0x123   : > { %v628_v34 = vadd.f32 %v627_v33, %v626_v32 }
 0x125   : > { %v629_v35 = vrot.slane %v628_v34, 2 }
 0x127   : > { %v630_v36 = vadd.f32 %v629_v35, %v628_v34 }
 0x129   : > { %v631_v37 = vrot.slane %v630_v36, 1 }
 0x12b   : > { %v632_v38 = vadd.f32 %v631_v37, %v630_v36 }
 0x12d   : > { %v633_v39 = vmul.f32 0.0625, %v632_v38 }
 0x12f   : > { %v634_v40 = vadd.f32 1e-05, %v633_v39 }
 0x131   : > { %866 = vrsqrt.f32 %v634_v40 }
 0x13b   : > { %v867_v41 = vpop.eup %866 }
 0x13c   : > { %v636_v42 = vmul.f32 %v867_v41, %v615_v21  ;;  %v637_v43 = vmul.f32 %v867_v41, %v616_v22  ;;  %v638_v44 = vmul.f32 %v867_v41, %v617_v23 }
 0x13e   : > { %vm639_vm2 = vcmp.ge.f32.partialorder %v636_v42, 0.0  ;;  %vm640_vm3 = vcmp.ge.f32.partialorder %v637_v43, 0.0  ;;  %vm641_vm4 = vcmp.ge.f32.partialorder %v638_v44, 0.0  ;;  %v642_v45 = vmul.f32 0.2, %v636_v42 }
 0x13f   : > { %v643_v46 = vmul.f32 0.2, %v637_v43  ;;  %v644_v47 = vmul.f32 0.2, %v638_v44 }
 0x140   : > { %v645_v48 = vsel %vm639_vm2, %v636_v42, %v642_v45 }
 0x141   : > { %v646_v49 = vsel %vm640_vm3, %v637_v43, %v643_v46  ;;  %v647_v50 = vsel %vm641_vm4, %v638_v44, %v644_v47  ;;  %648 = vst [vmem:[%s197_s14] sm:$0xff] %v645_v48 }
 0x142   : > { %649 = vst [vmem:[%s197_s14 + $0x8] sm:$0xff] %v646_v49  ;;  %650 = vst [vmem:[%s197_s14 + $0x10] sm:$0xf] %v647_v50 }
 0x143 PF: > { %s14_s15 = sadd.s32 1, %s874_s15  }
 0x144   : > { %p11_p4 = scmp.ge.s32.totalorder %s14_s15, 4  }
 0x146   :  { %13 = sbr.rel (!%p11_p4) target bundleno = 1 (0x1), region = 69 }

// kernel: cyclegan_discriminator.8
= control target key start
LH: loop header
LB: loop body
LE: loop exit
PB: predicated region body
PF: predicated region fallthrough
CT: control target
= control target key end

     0   :  { %s1997_s15 = smov 0   ;;  %s2228_s0 = inlined_call_operand.vmem [shape: f32[2,39,32], index: 0, kind: input, shape index: {}]   ;;  %s2229_s1 = inlined_call_operand.vmem [shape: bf16[16,32,128], index: 1, kind: input, shape index: {}]   ;;  %s2230_s2 = inlined_call_operand.vmem [shape: f32[1,128], index: 2, kind: input, shape index: {}]   ;;  %s2231_s3 = inlined_call_operand.vmem [shape: f32[18,1], index: 3, kind: input, shape index: {}]   ;;  %s2232_s4 = inlined_call_operand.vmem [shape: f32[2,18,128], index: 4, kind: output, shape index: {}]  }
   0x1 LB: > { %s1590_s16 = sadd.s32 4294967295, %s1969_s15   ;;  %p1594_p0 = scmp.ge.s32.totalorder %s1969_s15, 1  ;;  %s1969_s15 = sphi %s1997_s15, %s14_s15  }
   0x2   : > { %p162_p1 = scmp.lt.s32.totalorder %s1969_s15, 3 }
   0x4   : > { %p163_p2 = pnand %p1594_p0, %p162_p1 }
   0x5   : > { %v1929_v0 = vld [vmem:[%s2229_s1 + $0x10] sm:$0xff] (!%p163_p2)   ;;  %p188_p3 = scmp.lt.s32.totalorder (!%p163_p2), %s1590_s16, 1  ;;  %v1930_v1 = vld [vmem:[%s2229_s1] sm:$0xff] (!%p163_p2)   ;;  %v1931_v2 = vld [vmem:[%s2229_s1 + $0x18] sm:$0xff] (!%p163_p2)   ;;  %v1971_v6 = vmov (!%p163_p2), 0   ;;  %vm230_vm0 = vcmask (!%p163_p2), 261120  }
   0x6   : > { %166 = sbr.rel (%p163_p2) target bundleno = 362 (0x16a), region = 36  ;;  %1788 = vmatprep.subr.bf16.mxu0 (!%p163_p2), %v1929_v0  ;;  %1796 = vmatprep.subr.bf16.mxu1 (!%p163_p2), %v1930_v1  ;;  %v1932_v3 = vld [vmem:[%s2229_s1 + $0x8] sm:$0xff] (!%p163_p2)   ;;  %v1933_v4 = vld [vmem:[%s2229_s1 + $0x20] sm:$0xff] (!%p163_p2)   ;;  %v1934_v5 = vld [vmem:[%s2229_s1 + $0x30] sm:$0xff] (!%p163_p2)   ;;  %vm1489_vm1 = vcmask (!%p163_p2), 1041408  }
   0x7   : > { %1789 = vmatpush3.bf16.msra.mxu0 (!%p163_p2), %v1929_v0  ;;  %1797 = vmatpush3.bf16.msra.mxu1 (!%p163_p2), %v1930_v1  ;;  %v1935_v10 = vld [vmem:[%s2229_s1 + $0x28] sm:$0xff] (!%p163_p2)   ;;  %v1936_v18 = vld [vmem:[%s2229_s1 + $0x38] sm:$0xff] (!%p163_p2)   ;;  %v1937_v27 = vld [vmem:[%s2229_s1 + $0x40] sm:$0xff] (!%p163_p2)  }
   0x8   : > { %1790 = vmatprep.subr.bf16.mxu0 (!%p163_p2), %v1931_v2  ;;  %1798 = vmatprep.subr.bf16.mxu1 (!%p163_p2), %v1932_v3  ;;  %v1938_v28 = vld [vmem:[%s2229_s1 + $0x50] sm:$0xff] (!%p163_p2)   ;;  %v1939_v34 = vld [vmem:[%s2229_s1 + $0x48] sm:$0xff] (!%p163_p2)   ;;  %v1940_v36 = vld [vmem:[%s2229_s1 + $0x58] sm:$0xff] (!%p163_p2)  }
   0x9   : > { %1927 = vset.pattern.permute.xlu0 (!%p163_p2), %v1971_v6  ;;  %1928 = vset.pattern.permute.xlu1 (!%p163_p2), %v1971_v6  ;;  %v1941_v41 = vld [vmem:[%s2229_s1 + $0x60] sm:$0xff] (!%p163_p2)   ;;  %v1942_v42 = vld [vmem:[%s2229_s1 + $0x70] sm:$0xff] (!%p163_p2)   ;;  %v1943_v47 = vld [vmem:[%s2229_s1 + $0x68] sm:$0xff] (!%p163_p2)  }
   0xa   : > { %v1944_v48 = vld [vmem:[%s2229_s1 + $0x78] sm:$0xff] (!%p163_p2)   ;;  %v1945_v53 = vld [vmem:[%s2229_s1 + $0x80] sm:$0xff] (!%p163_p2)   ;;  %v1946_v54 = vld [vmem:[%s2229_s1 + $0x90] sm:$0xff] (!%p163_p2)  }
   0xb   : > { %1791 = vmatpush3.bf16.msra.mxu0 (!%p163_p2), %v1931_v2  ;;  %1799 = vmatpush3.bf16.msra.mxu1 (!%p163_p2), %v1932_v3  ;;  %v1947_v61 = vld [vmem:[%s2229_s1 + $0x88] sm:$0xff] (!%p163_p2)   ;;  %v1948_v62 = vld [vmem:[%s2229_s1 + $0x98] sm:$0xff] (!%p163_p2)   ;;  %v1949_v3 = vld [vmem:[%s2229_s1 + $0xa0] sm:$0xff] (!%p163_p2)  }
   0xc   : > { %1804 = vmatprep.subr.bf16.mxu0 (!%p163_p2), %v1933_v4  ;;  %1812 = vmatprep.subr.bf16.mxu1 (!%p163_p2), %v1934_v5 }
   0xd   : > { %s2234_s16 = smov (!%p188_p3, %s1590_s16), 1 }
   0xe   : > { %s1916_s25 = smul.u32 40, %s2234_s16 }
   0xf   : > { %s1917_s22 = smul.u32 24, %s2234_s16 }
  0x10   : > { %s2029_s6 = scalar_lea.vmem %s2228_s0, %s1916_s25 }
  0x11   : > { %v208_v7 = vld [vmem:[%s2029_s6 + $0x1] sm:$0xff]  ;;  %v2033_v8 = vld [vmem:[%s2029_s6 + $0x9] sm:$0xff]  ;;  %v210_v13 = vld [vmem:[%s2029_s6 + $0x11] sm:$0x3]  ;;  %s197_s25 = scalar_lea.vmem %s2232_s4, %s1917_s22 }
  0x12   : > { %v199_v9 = vld [vmem:[%s2029_s6] sm:$0xff]  ;;  %v211_v11 = vpack.c.bf16 %v2033_v8, %v208_v7  ;;  %v2041_v12 = vld [vmem:[%s2029_s6 + $0x8] sm:$0xff]  ;;  %v201_v14 = vld [vmem:[%s2029_s6 + $0x10] sm:$0x3]  ;;  %v212_v16 = vpack.c.bf16 %v210_v13, %v210_v13 }
  0x13   : > { %v202_v15 = vpack.c.bf16 %v2041_v12, %v199_v9  ;;  %v203_v17 = vpack.c.bf16 %v201_v14, %v201_v14  ;;  %v351_v19 = vld [vmem:[%s2029_s6 + $0x2] sm:$0xff]  ;;  %v352_v20 = vld [vmem:[%s2029_s6 + $0xa] sm:$0xff]  ;;  %v353_v24 = vld [vmem:[%s2029_s6 + $0x12] sm:$0x3] }
  0x14   : > { %1792 = vmatprep.mubr.msk.bf16.mxu0 %vm230_vm0, %v211_v11  ;;  %v430_v21 = vld [vmem:[%s2029_s6 + $0x3] sm:$0xff]  ;;  %v354_v22 = vpack.c.bf16 %v352_v20, %v351_v19  ;;  %v431_v23 = vld [vmem:[%s2029_s6 + $0xb] sm:$0xff]  ;;  %v432_v26 = vld [vmem:[%s2029_s6 + $0x13] sm:$0x3]  ;;  %v355_v29 = vpack.c.bf16 %v353_v24, %v353_v24 }
  0x15   : > { %1800 = vmatprep.mubr.msk.bf16.mxu1 %vm230_vm0, %v202_v15  ;;  %1793 = vmatmul.mubr.msk.bf16.vlgmr.msra.gmra.mrb[0].mxu0 %vm230_vm0, %v212_v16  ;;  %v433_v25 = vpack.c.bf16 %v431_v23, %v430_v21  ;;  %v434_v30 = vpack.c.bf16 %v432_v26, %v432_v26  ;;  %v509_v31 = vld [vmem:[%s2029_s6 + $0x6] sm:$0xff]  ;;  %v2069_v32 = vld [vmem:[%s2029_s6 + $0xe] sm:$0xff]  ;;  %v511_v39 = vld [vmem:[%s2029_s6 + $0x16] sm:$0x3] }
  0x16   : > { %1801 = vmatmul.mubr.msk.bf16.vlgmr.msra.gmra.mrb[0].mxu1 %vm230_vm0, %v203_v17  ;;  %1805 = vmatpush3.bf16.msra.mxu0 %v1933_v4  ;;  %v588_v33 = vld [vmem:[%s2029_s6 + $0x7] sm:$0xff]  ;;  %v2076_v35 = vld [vmem:[%s2029_s6 + $0xf] sm:$0xff]  ;;  %v512_v37 = vpack.c.bf16 %v2069_v32, %v509_v31  ;;  %v590_v40 = vld [vmem:[%s2029_s6 + $0x17] sm:$0x3]  ;;  %v513_v43 = vpack.c.bf16 %v511_v39, %v511_v39 }
  0x17   : > { %1813 = vmatpush3.bf16.msra.mxu1 %v1934_v5  ;;  %1806 = vmatprep.subr.bf16.mxu0 %v1935_v10  ;;  %v591_v38 = vpack.c.bf16 %v2076_v35, %v588_v33  ;;  %v668_v44 = vld [vmem:[%s2029_s6 + $0x10] sm:$0xff]  ;;  %v592_v45 = vpack.c.bf16 %v590_v40, %v590_v40  ;;  %v669_v51 = vld [vmem:[%s2029_s6 + $0x18] sm:$0x3]  ;;  %v827_v1 = vld [vmem:[%s2029_s6 + $0x1c] sm:$0x3] }
  0x18   : > { %1814 = vmatprep.subr.bf16.mxu1 %v1936_v18  ;;  %1808 = vmatprep.mubr.msk.bf16.mxu0 %vm230_vm0, %v354_v22  ;;  %v747_v46 = vld [vmem:[%s2029_s6 + $0x11] sm:$0xff]  ;;  %v670_v49 = vpack.c.bf16 %v668_v44, %v2041_v12  ;;  %v748_v52 = vld [vmem:[%s2029_s6 + $0x19] sm:$0x3]  ;;  %v671_v57 = vpack.c.bf16 %v669_v51, %v669_v51  ;;  %v906_v2 = vld [vmem:[%s2029_s6 + $0x1d] sm:$0x3]  ;;  %v829_v5 = vpack.c.bf16 %v827_v1, %v827_v1 }
  0x19   : > { %1816 = vmatprep.mubr.msk.bf16.mxu1 %vm230_vm0, %v433_v25  ;;  %v749_v50 = vpack.c.bf16 %v747_v46, %v2033_v8  ;;  %v825_v55 = vld [vmem:[%s2029_s6 + $0xc] sm:$0xff]  ;;  %v2118_v56 = vld [vmem:[%s2029_s6 + $0x14] sm:$0xff]  ;;  %v750_v59 = vpack.c.bf16 %v748_v52, %v748_v52  ;;  %v908_v7 = vpack.c.bf16 %v906_v2, %v906_v2  ;;  %v985_v13 = vld [vmem:[%s2029_s6 + $0x1e] sm:$0x3] }
  0x1a   : > { %1807 = vmatpush3.bf16.msra.mxu0 %v1935_v10  ;;  %v904_v58 = vld [vmem:[%s2029_s6 + $0xd] sm:$0xff]  ;;  %v2123_v60 = vld [vmem:[%s2029_s6 + $0x15] sm:$0xff]  ;;  %v828_v63 = vpack.c.bf16 %v2118_v56, %v825_v55  ;;  %v1064_v14 = vld [vmem:[%s2029_s6 + $0x1f] sm:$0x3]  ;;  %v987_v19 = vpack.c.bf16 %v985_v13, %v985_v13 }
  0x1b   : > { %1815 = vmatpush3.bf16.msra.mxu1 %v1936_v18  ;;  %1820 = vmatprep.subr.bf16.mxu0 %v1937_v27  ;;  %v907_v0 = vpack.c.bf16 %v2123_v60, %v904_v58  ;;  %v1950_v4 = vld [vmem:[%s2229_s1 + $0xb0] sm:$0xff]   ;;  %v1951_v9 = vld [vmem:[%s2229_s1 + $0xa8] sm:$0xff]   ;;  %v1952_v10 = vld [vmem:[%s2229_s1 + $0xb8] sm:$0xff]   ;;  %v1066_v22 = vpack.c.bf16 %v1064_v14, %v1064_v14 }
  0x1c   : > { %1828 = vmatprep.subr.bf16.mxu1 %v1938_v28  ;;  %v984_v6 = vld [vmem:[%s2029_s6 + $0x16] sm:$0xff]  ;;  %v1953_v15 = vld [vmem:[%s2229_s1 + $0xc0] sm:$0xff]   ;;  %v1469_v18 = vld [vmem:[%s2231_s3 + $0x10] sm:$0x3] }
  0x1d   : > { %1809 = vmatmul.mubr.msk.bf16.vlgmr.msra.gmra.mrb[4].mxu0 %vm230_vm0, %v355_v29  ;;  %v1063_v8 = vld [vmem:[%s2029_s6 + $0x17] sm:$0xff]  ;;  %v986_v11 = vpack.c.bf16 %v984_v6, %v2069_v32  ;;  %v1467_v17 = vld [vmem:[%s2231_s3] sm:$0xff]  ;;  %1482 = vperm.xlu1 %1928, %v1469_v18   ;;  %v1468_v25 = vld [vmem:[%s2231_s3 + $0x8] sm:$0xff] }
  0x1e   : > { %1817 = vmatmul.mubr.msk.bf16.vlgmr.msra.gmra.mrb[4].mxu1 %vm230_vm0, %v434_v30  ;;  %1821 = vmatpush3.bf16.msra.mxu0 %v1937_v27  ;;  %v1065_v12 = vpack.c.bf16 %v1063_v8, %v2076_v35  ;;  %v1954_v16 = vld [vmem:[%s2229_s1 + $0xd0] sm:$0xff]   ;;  %v1142_v21 = vld [vmem:[%s2029_s6 + $0x1a] sm:$0xff]  ;;  %v1955_v26 = vld [vmem:[%s2229_s1 + $0xc8] sm:$0xff]  }
  0x1f   : > { %1829 = vmatpush3.bf16.msra.mxu1 %v1938_v28  ;;  %1822 = vmatprep.subr.bf16.mxu0 %v1939_v34  ;;  %v1141_v20 = vld [vmem:[%s2029_s6 + $0x12] sm:$0xff]  ;;  %v1221_v24 = vld [vmem:[%s2029_s6 + $0x1b] sm:$0xff]  ;;  %v1222_v31 = vld [vmem:[%s2029_s6 + $0x23] sm:$0x3] }
  0x20   : > { %1830 = vmatprep.subr.bf16.mxu1 %v1940_v36  ;;  %1824 = vmatprep.mubr.msk.bf16.mxu0 %vm230_vm0, %v512_v37  ;;  %v1220_v23 = vld [vmem:[%s2029_s6 + $0x13] sm:$0xff]  ;;  %v1144_v28 = vpack.c.bf16 %v1142_v21, %v1141_v20  ;;  %v1143_v30 = vld [vmem:[%s2029_s6 + $0x22] sm:$0x3] }
  0x21   : > { %1832 = vmatprep.mubr.msk.bf16.mxu1 %vm230_vm0, %v591_v38  ;;  %1472 = vperm.xlu0 %1927, %v1467_v17   ;;  %v1956_v27 = vld [vmem:[%s2229_s1 + $0xd8] sm:$0xff]   ;;  %v1223_v29 = vpack.c.bf16 %v1221_v24, %v1220_v23  ;;  %v1957_v32 = vld [vmem:[%s2229_s1 + $0xe0] sm:$0xff]   ;;  %v1958_v33 = vld [vmem:[%s2229_s1 + $0xf0] sm:$0xff]  }
  0x22   : > { %1823 = vmatpush3.bf16.msra.mxu0 %v1939_v34  ;;  %v1145_v34 = vpack.c.bf16 %v1143_v30, %v1143_v30  ;;  %v1300_v35 = vld [vmem:[%s2029_s6 + $0x1c] sm:$0xff]  ;;  %v1959_v38 = vld [vmem:[%s2229_s1 + $0xe8] sm:$0xff]  }
  0x23   : > { %1831 = vmatpush3.bf16.msra.mxu1 %v1940_v36  ;;  %1836 = vmatprep.subr.bf16.mxu0 %v1941_v41  ;;  %v1224_v36 = vpack.c.bf16 %v1222_v31, %v1222_v31  ;;  %v1379_v37 = vld [vmem:[%s2029_s6 + $0x1d] sm:$0xff]  ;;  %v1302_v40 = vpack.c.bf16 %v1300_v35, %v2118_v56 }
  0x24   : > { %1844 = vmatprep.subr.bf16.mxu1 %v1942_v42  ;;  %v1960_v39 = vld [vmem:[%s2229_s1 + $0xf8] sm:$0xff]  }
  0x25   : > { %1825 = vmatmul.mubr.msk.bf16.vlgmr.msra.gmra.mrb[8].mxu0 %vm230_vm0, %v513_v43  ;;  %1477 = vperm.xlu0 %1927, %v1468_v25   ;;  %v1380_v43 = vld [vmem:[%s2029_s6 + $0x25] sm:$0x3] }
  0x26   : > { %1833 = vmatmul.mubr.msk.bf16.vlgmr.msra.gmra.mrb[8].mxu1 %vm230_vm0, %v592_v45  ;;  %1837 = vmatpush3.bf16.msra.mxu0 %v1941_v41  ;;  %v1381_v41 = vpack.c.bf16 %v1379_v37, %v2123_v60  ;;  %v1382_v45 = vpack.c.bf16 %v1380_v43, %v1380_v43 }
  0x27   : > { %1845 = vmatpush3.bf16.msra.mxu1 %v1942_v42  ;;  %1838 = vmatprep.subr.bf16.mxu0 %v1943_v47  ;;  %v1301_v42 = vld [vmem:[%s2029_s6 + $0x24] sm:$0x3] }
  0x28   : > { %1846 = vmatprep.subr.bf16.mxu1 %v1944_v48  ;;  %1840 = vmatprep.mubr.msk.bf16.mxu0 %vm230_vm0, %v670_v49  ;;  %v1303_v44 = vpack.c.bf16 %v1301_v42, %v1301_v42 }
  0x29   : > { %1848 = vmatprep.mubr.msk.bf16.mxu1 %vm230_vm0, %v749_v50 }
  0x2a   : > { %1839 = vmatpush3.bf16.msra.mxu0 %v1943_v47 }
  0x2b   : > { %1847 = vmatpush3.bf16.msra.mxu1 %v1944_v48  ;;  %1852 = vmatprep.subr.bf16.mxu0 %v1945_v53 }
  0x2c   : > { %1860 = vmatprep.subr.bf16.mxu1 %v1946_v54 }
  0x2d   : > { %1841 = vmatmul.mubr.msk.bf16.vlgmr.msra.gmra.mrb[12].mxu0 %vm230_vm0, %v671_v57 }
  0x2e   : > { %1849 = vmatmul.mubr.msk.bf16.vlgmr.msra.gmra.mrb[12].mxu1 %vm230_vm0, %v750_v59  ;;  %1853 = vmatpush3.bf16.msra.mxu0 %v1945_v53 }
  0x2f   : > { %1861 = vmatpush3.bf16.msra.mxu1 %v1946_v54  ;;  %1854 = vmatprep.subr.bf16.mxu0 %v1947_v61 }
  0x30   : > { %1862 = vmatprep.subr.bf16.mxu1 %v1948_v62  ;;  %1856 = vmatprep.mubr.msk.bf16.mxu0 %vm230_vm0, %v828_v63 }
  0x31   : > { %1864 = vmatprep.mubr.msk.bf16.mxu1 %vm230_vm0, %v907_v0 }
  0x32   : > { %1855 = vmatpush3.bf16.msra.mxu0 %v1947_v61 }
  0x33   : > { %1863 = vmatpush3.bf16.msra.mxu1 %v1948_v62  ;;  %1868 = vmatprep.subr.bf16.mxu0 %v1949_v3 }
  0x34   : > { %1876 = vmatprep.subr.bf16.mxu1 %v1950_v4 }
  0x35   : > { %1857 = vmatmul.mubr.msk.bf16.vlgmr.msra.gmra.mrb[16].mxu0 %vm230_vm0, %v829_v5 }
  0x36   : > { %1865 = vmatmul.mubr.msk.bf16.vlgmr.msra.gmra.mrb[16].mxu1 %vm230_vm0, %v908_v7  ;;  %1869 = vmatpush3.bf16.msra.mxu0 %v1949_v3 }
  0x37   : > { %1877 = vmatpush3.bf16.msra.mxu1 %v1950_v4  ;;  %1870 = vmatprep.subr.bf16.mxu0 %v1951_v9 }
  0x38   : > { %1878 = vmatprep.subr.bf16.mxu1 %v1952_v10  ;;  %1872 = vmatprep.mubr.msk.bf16.mxu0 %vm230_vm0, %v986_v11 }
  0x39   : > { %1880 = vmatprep.mubr.msk.bf16.mxu1 %vm230_vm0, %v1065_v12 }
  0x3a   : > { %1871 = vmatpush3.bf16.msra.mxu0 %v1951_v9 }
  0x3b   : > { %1879 = vmatpush3.bf16.msra.mxu1 %v1952_v10  ;;  %1884 = vmatprep.subr.bf16.mxu0 %v1953_v15 }
  0x3c   : > { %1892 = vmatprep.subr.bf16.mxu1 %v1954_v16 }
  0x3d   : > { %1873 = vmatmul.mubr.msk.bf16.vlgmr.msra.gmra.mrb[20].mxu0 %vm230_vm0, %v987_v19 }
  0x3e   : > { %1881 = vmatmul.mubr.msk.bf16.vlgmr.msra.gmra.mrb[20].mxu1 %vm230_vm0, %v1066_v22  ;;  %1885 = vmatpush3.bf16.msra.mxu0 %v1953_v15 }
  0x3f   : > { %1893 = vmatpush3.bf16.msra.mxu1 %v1954_v16  ;;  %1886 = vmatprep.subr.bf16.mxu0 %v1955_v26 }
  0x40   : > { %1894 = vmatprep.subr.bf16.mxu1 %v1956_v27  ;;  %1888 = vmatprep.mubr.msk.bf16.mxu0 %vm230_vm0, %v1144_v28 }
  0x41   : > { %1896 = vmatprep.mubr.msk.bf16.mxu1 %vm230_vm0, %v1223_v29 }
  0x42   : > { %1887 = vmatpush3.bf16.msra.mxu0 %v1955_v26 }
  0x43   : > { %1895 = vmatpush3.bf16.msra.mxu1 %v1956_v27  ;;  %1900 = vmatprep.subr.bf16.mxu0 %v1957_v32 }
  0x44   : > { %1908 = vmatprep.subr.bf16.mxu1 %v1958_v33 }
  0x45   : > { %1889 = vmatmul.mubr.msk.bf16.vlgmr.msra.gmra.mrb[24].mxu0 %vm230_vm0, %v1145_v34 }
  0x46   : > { %1897 = vmatmul.mubr.msk.bf16.vlgmr.msra.gmra.mrb[24].mxu1 %vm230_vm0, %v1224_v36  ;;  %1901 = vmatpush3.bf16.msra.mxu0 %v1957_v32 }
  0x47   : > { %1909 = vmatpush3.bf16.msra.mxu1 %v1958_v33  ;;  %1902 = vmatprep.subr.bf16.mxu0 %v1959_v38 }
  0x48   : > { %1910 = vmatprep.subr.bf16.mxu1 %v1960_v39  ;;  %1904 = vmatprep.mubr.msk.bf16.mxu0 %vm230_vm0, %v1302_v40 }
  0x49   : > { %1912 = vmatprep.mubr.msk.bf16.mxu1 %vm230_vm0, %v1381_v41 }
  0x4a   : > { %1903 = vmatpush3.bf16.msra.mxu0 %v1959_v38 }
  0x4b   : > { %1911 = vmatpush3.bf16.msra.mxu1 %v1960_v39 }
  0x4d   : > { %1905 = vmatmul.mubr.msk.bf16.vlgmr.msra.gmra.mrb[28].mxu0 %vm230_vm0, %v1303_v44 }
  0x4e   : > { %1913 = vmatmul.mubr.msk.bf16.vlgmr.msra.gmra.mrb[28].mxu1 %vm230_vm0, %v1382_v45 }
  0xe8   : > { %v1794_v46 = vpop.f32.mrb[0].mxu0 }
  0xe9   : > { %v1802_v47 = vpop.f32.mrb[0].mxu1  ;;  %v271_v48 = vpop.f32.mrb[1].mxu0 }
  0xea   : > { %v346_v49 = vadd.f32 %v1802_v47, %v1794_v46  ;;  %v337_v50 = vpop.f32.mrb[1].mxu1  ;;  %v1795_v51 = vpop.f32.mrb[2].mxu0 }
  0xeb   : > { %v338_v52 = vadd.f32 %v337_v50, %v271_v48  ;;  %v1803_v53 = vpop.f32.mrb[2].mxu1  ;;  %v274_v54 = vpop.f32.mrb[3].mxu0 }
  0xec   : > { %v340_v55 = vpop.f32.mrb[3].mxu1 }
  0xed   : > { %v341_v56 = vadd.f32 %v340_v55, %v274_v54 }
  0xf0   : > { %v1810_v57 = vpop.f32.mrb[4].mxu0 }
  0xf1   : > { %v429_v58 = vadd.f32 %v1810_v57, %v346_v49  ;;  %v1818_v59 = vpop.f32.mrb[4].mxu1  ;;  %v413_v60 = vpop.f32.mrb[5].mxu0 }
  0xf2   : > { %v427_v61 = vadd.f32 %v413_v60, %v338_v52  ;;  %v492_v62 = vpop.f32.mrb[5].mxu1  ;;  %v1811_v63 = vpop.f32.mrb[6].mxu0 }
  0xf3   : > { %v508_v0 = vadd.f32 %v1818_v59, %v429_v58  ;;  %v1819_v1 = vpop.f32.mrb[6].mxu1  ;;  %v416_v2 = vpop.f32.mrb[7].mxu0 }
  0xf4   : > { %v506_v3 = vadd.f32 %v492_v62, %v427_v61  ;;  %v428_v4 = vadd.f32 %v416_v2, %v341_v56  ;;  %v495_v5 = vpop.f32.mrb[7].mxu1 }
  0xf6   : > { %v507_v6 = vadd.f32 %v495_v5, %v428_v4 }
  0xf8   : > { %v1826_v7 = vpop.f32.mrb[8].mxu0 }
  0xf9   : > { %v587_v8 = vadd.f32 %v1826_v7, %v508_v0  ;;  %v1834_v9 = vpop.f32.mrb[8].mxu1  ;;  %v571_v10 = vpop.f32.mrb[9].mxu0 }
  0xfa   : > { %v585_v11 = vadd.f32 %v571_v10, %v506_v3  ;;  %v650_v12 = vpop.f32.mrb[9].mxu1  ;;  %v1827_v13 = vpop.f32.mrb[10].mxu0 }
  0xfb   : > { %v666_v14 = vadd.f32 %v1834_v9, %v587_v8  ;;  %v1835_v15 = vpop.f32.mrb[10].mxu1  ;;  %v574_v16 = vpop.f32.mrb[11].mxu0 }
  0xfc   : > { %v664_v17 = vadd.f32 %v650_v12, %v585_v11  ;;  %v586_v18 = vadd.f32 %v574_v16, %v507_v6  ;;  %v653_v19 = vpop.f32.mrb[11].mxu1 }
  0xfe   : > { %v665_v20 = vadd.f32 %v653_v19, %v586_v18 }
 0x100   : > { %v1842_v21 = vpop.f32.mrb[12].mxu0 }
 0x101   : > { %v745_v22 = vadd.f32 %v1842_v21, %v666_v14  ;;  %v1850_v23 = vpop.f32.mrb[12].mxu1  ;;  %v729_v24 = vpop.f32.mrb[13].mxu0 }
 0x102   : > { %v743_v25 = vadd.f32 %v729_v24, %v664_v17  ;;  %v808_v26 = vpop.f32.mrb[13].mxu1  ;;  %v1843_v27 = vpop.f32.mrb[14].mxu0 }
 0x103   : > { %v824_v28 = vadd.f32 %v1850_v23, %v745_v22  ;;  %v1851_v29 = vpop.f32.mrb[14].mxu1  ;;  %v732_v30 = vpop.f32.mrb[15].mxu0 }
 0x104   : > { %v822_v31 = vadd.f32 %v808_v26, %v743_v25  ;;  %v744_v32 = vadd.f32 %v732_v30, %v665_v20  ;;  %v811_v33 = vpop.f32.mrb[15].mxu1  ;;  %v1473_v14 = vpop.permute.xlu0 %1472  ;;  %v1721_v20 = vld [vmem:[%s2230_s2] ss:$0 sm:$0xff] }
 0x106   : > { %v823_v34 = vadd.f32 %v811_v33, %v744_v32 }
 0x108   : > { %v1858_v35 = vpop.f32.mrb[16].mxu0 }
 0x109   : > { %v903_v36 = vadd.f32 %v1858_v35, %v824_v28  ;;  %v1866_v37 = vpop.f32.mrb[16].mxu1  ;;  %v887_v38 = vpop.f32.mrb[17].mxu0 }
 0x10a   : > { %v901_v39 = vadd.f32 %v887_v38, %v822_v31  ;;  %v966_v40 = vpop.f32.mrb[17].mxu1  ;;  %v1859_v41 = vpop.f32.mrb[18].mxu0 }
 0x10b   : > { %v982_v42 = vadd.f32 %v1866_v37, %v903_v36  ;;  %v1867_v43 = vpop.f32.mrb[18].mxu1  ;;  %v890_v44 = vpop.f32.mrb[19].mxu0 }
 0x10c   : > { %v980_v45 = vadd.f32 %v966_v40, %v901_v39  ;;  %v902_v46 = vadd.f32 %v890_v44, %v823_v34  ;;  %v969_v47 = vpop.f32.mrb[19].mxu1  ;;  %v1483_v31 = vpop.permute.xlu1 %1482 }
 0x10d   : > { %v1478_v34 = vpop.permute.xlu0 %1477 }
 0x10e   : > { %v981_v48 = vadd.f32 %v969_v47, %v902_v46 }
 0x110   : > { %v1874_v49 = vpop.f32.mrb[20].mxu0 }
 0x111   : > { %v1061_v50 = vadd.f32 %v1874_v49, %v982_v42  ;;  %v1882_v51 = vpop.f32.mrb[20].mxu1  ;;  %v1045_v52 = vpop.f32.mrb[21].mxu0 }
 0x112   : > { %v1059_v53 = vadd.f32 %v1045_v52, %v980_v45  ;;  %v1124_v54 = vpop.f32.mrb[21].mxu1  ;;  %v1875_v55 = vpop.f32.mrb[22].mxu0 }
 0x113   : > { %v1140_v56 = vadd.f32 %v1882_v51, %v1061_v50  ;;  %v1883_v57 = vpop.f32.mrb[22].mxu1  ;;  %v1048_v58 = vpop.f32.mrb[23].mxu0 }
 0x114   : > { %v1138_v59 = vadd.f32 %v1124_v54, %v1059_v53  ;;  %v1060_v60 = vadd.f32 %v1048_v58, %v981_v48  ;;  %v1127_v61 = vpop.f32.mrb[23].mxu1 }
 0x116   : > { %v1139_v62 = vadd.f32 %v1127_v61, %v1060_v60 }
 0x118   : > { %v1890_v63 = vpop.f32.mrb[24].mxu0 }
 0x119   : > { %v1219_v0 = vadd.f32 %v1890_v63, %v1140_v56  ;;  %v1898_v1 = vpop.f32.mrb[24].mxu1  ;;  %v1203_v2 = vpop.f32.mrb[25].mxu0 }
 0x11a   : > { %v1217_v3 = vadd.f32 %v1203_v2, %v1138_v59  ;;  %v1282_v4 = vpop.f32.mrb[25].mxu1  ;;  %v1891_v5 = vpop.f32.mrb[26].mxu0 }
 0x11b   : > { %v1298_v6 = vadd.f32 %v1898_v1, %v1219_v0  ;;  %v1899_v7 = vpop.f32.mrb[26].mxu1  ;;  %v1206_v8 = vpop.f32.mrb[27].mxu0 }
 0x11c   : > { %v1296_v9 = vadd.f32 %v1282_v4, %v1217_v3  ;;  %v1218_v10 = vadd.f32 %v1206_v8, %v1139_v62  ;;  %v1285_v11 = vpop.f32.mrb[27].mxu1 }
 0x11e   : > { %v1297_v12 = vadd.f32 %v1285_v11, %v1218_v10 }
 0x120   : > { %v1906_v13 = vpop.f32.mrb[28].mxu0 }
 0x121   : > { %v1377_v15 = vadd.f32 %v1906_v13, %v1298_v6  ;;  %v1914_v16 = vpop.f32.mrb[28].mxu1  ;;  %v1361_v17 = vpop.f32.mrb[29].mxu0 }
 0x122   : > { %v1375_v18 = vadd.f32 %v1361_v17, %v1296_v9  ;;  %v1440_v19 = vpop.f32.mrb[29].mxu1  ;;  %v1907_v21 = vpop.f32.mrb[30].mxu0 }
 0x123   : > { %v1456_v22 = vadd.f32 %v1914_v16, %v1377_v15  ;;  %v1915_v23 = vpop.f32.mrb[30].mxu1  ;;  %v1364_v24 = vpop.f32.mrb[31].mxu0 }
 0x124   : > { %v1454_v25 = vadd.f32 %v1440_v19, %v1375_v18  ;;  %v1376_v26 = vadd.f32 %v1364_v24, %v1297_v12  ;;  %v1443_v27 = vpop.f32.mrb[31].mxu1 }
 0x125   : > { %v1466_v28 = vadd.f32 %v1721_v20, %v1456_v22 }
 0x126   : > { %v1464_v29 = vadd.f32 %v1721_v20, %v1454_v25  ;;  %v1455_v30 = vadd.f32 %v1443_v27, %v1376_v26 }
 0x127   : > { %v1487_v33 = vmul.f32 %v1483_v31, %v1466_v28 }
 0x128   : > { %v1465_v32 = vadd.f32 %v1721_v20, %v1455_v30  ;;  %v1485_v35 = vmul.f32 %v1473_v14, %v1464_v29 }
 0x129   : > { %v1490_v38 = vsel %vm1489_vm1, %v1487_v33, 0.0 }
 0x12a   : > { %v1486_v36 = vmul.f32 %v1478_v34, %v1465_v32 }
 0x12c   : > { %v1488_v37 = vadd.f32 %v1486_v36, %v1485_v35 }
 0x12e   : > { %v1491_v39 = vadd.f32 %v1490_v38, %v1488_v37 }
 0x130   : > { %v1492_v40 = vrot.slane %v1491_v39, 4 }
 0x132   : > { %v1493_v41 = vadd.f32 %v1492_v40, %v1491_v39 }
 0x134   : > { %v1494_v42 = vrot.slane %v1493_v41, 2 }
 0x136   : > { %v1495_v43 = vadd.f32 %v1494_v42, %v1493_v41 }
 0x138   : > { %v1496_v44 = vrot.slane %v1495_v43, 1 }
 0x13a   : > { %v1497_v45 = vadd.f32 %v1496_v44, %v1495_v43 }
 0x13c   : > { %v1498_v46 = vmul.f32 0.11111111, %v1497_v45 }
 0x13e   : > { %v1499_v47 = vsub.f32 %v1464_v29, %v1498_v46  ;;  %v1500_v48 = vsub.f32 %v1465_v32, %v1498_v46  ;;  %v1501_v49 = vsub.f32 %v1466_v28, %v1498_v46 }
 0x140   : > { %v1502_v50 = vmul.f32 %v1499_v47, %v1499_v47  ;;  %v1503_v51 = vmul.f32 %v1500_v48, %v1500_v48  ;;  %v1504_v52 = vmul.f32 %v1501_v49, %v1501_v49 }
 0x142   : > { %v1505_v53 = vmul.f32 %v1502_v50, %v1473_v14  ;;  %v1506_v54 = vmul.f32 %v1503_v51, %v1478_v34  ;;  %v1507_v55 = vmul.f32 %v1504_v52, %v1483_v31 }
 0x144   : > { %v1508_v56 = vadd.f32 %v1506_v54, %v1505_v53  ;;  %v1509_v57 = vsel %vm1489_vm1, %v1507_v55, 0.0 }
 0x146   : > { %v1510_v58 = vadd.f32 %v1509_v57, %v1508_v56 }
 0x148   : > { %v1511_v59 = vrot.slane %v1510_v58, 4 }
 0x14a   : > { %v1512_v60 = vadd.f32 %v1511_v59, %v1510_v58 }
 0x14c   : > { %v1513_v61 = vrot.slane %v1512_v60, 2 }
 0x14e   : > { %v1514_v62 = vadd.f32 %v1513_v61, %v1512_v60 }
 0x150   : > { %v1515_v63 = vrot.slane %v1514_v62, 1 }
 0x152   : > { %v1516_v0 = vadd.f32 %v1515_v63, %v1514_v62 }
 0x154   : > { %v1517_v1 = vmul.f32 0.11111111, %v1516_v0 }
 0x156   : > { %v1518_v2 = vadd.f32 1e-05, %v1517_v1 }
 0x158   : > { %1961 = vrsqrt.f32 %v1518_v2 }
 0x162   : > { %v1962_v3 = vpop.eup %1961 }
 0x163   : > { %v1520_v4 = vmul.f32 %v1962_v3, %v1499_v47  ;;  %v1521_v5 = vmul.f32 %v1962_v3, %v1500_v48  ;;  %v1522_v6 = vmul.f32 %v1962_v3, %v1501_v49 }
 0x165   : > { %vm1523_vm2 = vcmp.ge.f32.partialorder %v1520_v4, 0.0  ;;  %vm1524_vm3 = vcmp.ge.f32.partialorder %v1521_v5, 0.0  ;;  %vm1525_vm4 = vcmp.ge.f32.partialorder %v1522_v6, 0.0  ;;  %v1526_v7 = vmul.f32 0.2, %v1520_v4 }
 0x166   : > { %v1527_v8 = vmul.f32 0.2, %v1521_v5  ;;  %v1528_v9 = vmul.f32 0.2, %v1522_v6 }
 0x167   : > { %v1529_v10 = vsel %vm1523_vm2, %v1520_v4, %v1526_v7 }
 0x168   : > { %v1530_v11 = vsel %vm1524_vm3, %v1521_v5, %v1527_v8  ;;  %v1531_v12 = vsel %vm1525_vm4, %v1522_v6, %v1528_v9  ;;  %1532 = vst [vmem:[%s197_s25] sm:$0xff] %v1529_v10 }
 0x169   : > { %1533 = vst [vmem:[%s197_s25 + $0x8] sm:$0xff] %v1530_v11  ;;  %1534 = vst [vmem:[%s197_s25 + $0x10] sm:$0x3] %v1531_v12 }
 0x16a PF: > { %s14_s15 = sadd.s32 1, %s1969_s15  }
 0x16b   : > { %p11_p4 = scmp.ge.s32.totalorder %s14_s15, 4  }
 0x16d   :  { %13 = sbr.rel (!%p11_p4) target bundleno = 1 (0x1), region = 81 }

// kernel: cyclegan_discriminator.9
= control target key start
LH: loop header
LB: loop body
LE: loop exit
PB: predicated region body
PF: predicated region fallthrough
CT: control target
= control target key end

     0   :  { %s2168_s15 = smov 0   ;;  %s2530_s0 = inlined_call_operand.vmem [shape: f32[2,28,64], index: 0, kind: input, shape index: {}]   ;;  %s2531_s1 = inlined_call_operand.vmem [shape: bf16[16,64,128], index: 1, kind: input, shape index: {}]   ;;  %s2532_s2 = inlined_call_operand.vmem [shape: f32[1,128], index: 2, kind: input, shape index: {}]   ;;  %s2533_s3 = inlined_call_operand.vmem [shape: f32[10,1], index: 3, kind: input, shape index: {}]   ;;  %s2534_s4 = inlined_call_operand.vmem [shape: f32[2,10,128], index: 4, kind: output, shape index: {}]  }
   0x1 LB: > { %s1573_s16 = sadd.s32 4294967295, %s2139_s15   ;;  %p1577_p0 = scmp.ge.s32.totalorder %s2139_s15, 1  ;;  %s2139_s15 = sphi %s2168_s15, %s14_s15  }
   0x2   : > { %p162_p1 = scmp.lt.s32.totalorder %s2139_s15, 3 }
   0x4   : > { %p163_p2 = pnand %p1577_p0, %p162_p1 }
   0x5   : > { %v2069_v0 = vld [vmem:[%s2531_s1 + $0x20] sm:$0xff] (!%p163_p2)   ;;  %v2141_v1 = vmov (!%p163_p2), 0.0   ;;  %v2071_v3 = vld [vmem:[%s2531_s1 + $0x28] sm:$0xff] (!%p163_p2)   ;;  %vm2142_vm0 = vmmov (!%p163_p2), 0   ;;  %p188_p3 = scmp.lt.s32.totalorder (!%p163_p2), %s1573_s16, 1  ;;  %v2073_v5 = vld [vmem:[%s2531_s1 + $0x30] sm:$0xff] (!%p163_p2)  }
   0x6   : > { %166 = sbr.rel (%p163_p2) target bundleno = 355 (0x163), region = 36  ;;  %1867 = vmatprep.subr.bf16.mxu0 (!%p163_p2), %v2141_v1  ;;  %1879 = vmatprep.subr.bf16.mxu1 (!%p163_p2), %v2141_v1  ;;  %v2070_v2 = vld [vmem:[%s2531_s1] sm:$0xff] (!%p163_p2)   ;;  %v2072_v4 = vld [vmem:[%s2531_s1 + $0x8] sm:$0xff] (!%p163_p2)   ;;  %v2074_v6 = vld [vmem:[%s2531_s1 + $0x10] sm:$0xff] (!%p163_p2)   ;;  %vm246_vm1 = vcmask (!%p163_p2), 523264  }
   0x7   : > { %1868 = vmatpush3.bf16.msra.mxu0 (!%p163_p2), %v2069_v0  ;;  %1875 = vmatprep.mubr.msk.bf16.mxu0 (!%p163_p2), %vm2142_vm0, %v2141_v1  ;;  %v2075_v7 = vld [vmem:[%s2531_s1 + $0x38] sm:$0xff] (!%p163_p2)   ;;  %v2077_v15 = vld [vmem:[%s2531_s1 + $0x40] sm:$0xff] (!%p163_p2)   ;;  %v2079_v17 = vld [vmem:[%s2531_s1 + $0x48] sm:$0xff] (!%p163_p2)  }
   0x8   : > { %1880 = vmatpush3.bf16.msra.mxu1 (!%p163_p2), %v2070_v2  ;;  %1869 = vmatprep.subr.bf16.mxu0 (!%p163_p2), %v2141_v1  ;;  %v2076_v9 = vld [vmem:[%s2531_s1 + $0x18] sm:$0xff] (!%p163_p2)   ;;  %v2078_v16 = vld [vmem:[%s2531_s1 + $0x60] sm:$0xff] (!%p163_p2)   ;;  %v2080_v18 = vld [vmem:[%s2531_s1 + $0x68] sm:$0xff] (!%p163_p2)  }
   0x9   : > { %1881 = vmatprep.subr.bf16.mxu1 (!%p163_p2), %v2141_v1  ;;  %1887 = vmatprep.mubr.msk.bf16.mxu1 (!%p163_p2), %vm2142_vm0, %v2141_v1  ;;  %v2081_v19 = vld [vmem:[%s2531_s1 + $0x50] sm:$0xff] (!%p163_p2)   ;;  %v2083_v21 = vld [vmem:[%s2531_s1 + $0x58] sm:$0xff] (!%p163_p2)   ;;  %v2085_v29 = vld [vmem:[%s2531_s1 + $0x80] sm:$0xff] (!%p163_p2)  }
   0xa   : > { %v2082_v20 = vld [vmem:[%s2531_s1 + $0x70] sm:$0xff] (!%p163_p2)   ;;  %v2084_v24 = vld [vmem:[%s2531_s1 + $0x78] sm:$0xff] (!%p163_p2)   ;;  %v2086_v30 = vld [vmem:[%s2531_s1 + $0xa0] sm:$0xff] (!%p163_p2)  }
   0xb   : > { %1870 = vmatpush3.bf16.msra.mxu0 (!%p163_p2), %v2071_v3  ;;  %v2087_v31 = vld [vmem:[%s2531_s1 + $0x88] sm:$0xff] (!%p163_p2)   ;;  %v2089_v33 = vld [vmem:[%s2531_s1 + $0x90] sm:$0xff] (!%p163_p2)   ;;  %v2091_v35 = vld [vmem:[%s2531_s1 + $0x98] sm:$0xff] (!%p163_p2)  }
   0xc   : > { %1882 = vmatpush3.bf16.msra.mxu1 (!%p163_p2), %v2072_v4  ;;  %1871 = vmatprep.subr.bf16.mxu0 (!%p163_p2), %v2141_v1  ;;  %v2088_v32 = vld [vmem:[%s2531_s1 + $0xa8] sm:$0xff] (!%p163_p2)   ;;  %v2090_v34 = vld [vmem:[%s2531_s1 + $0xb0] sm:$0xff] (!%p163_p2)   ;;  %v2092_v37 = vld [vmem:[%s2531_s1 + $0xb8] sm:$0xff] (!%p163_p2)  }
   0xd   : > { %s2536_s16 = smov (!%p188_p3, %s1573_s16), 1  ;;  %1883 = vmatprep.subr.bf16.mxu1 %v2141_v1  ;;  %v2093_v43 = vld [vmem:[%s2531_s1 + $0xc0] sm:$0xff]   ;;  %v2095_v45 = vld [vmem:[%s2531_s1 + $0xc8] sm:$0xff]   ;;  %v2097_v47 = vld [vmem:[%s2531_s1 + $0xd0] sm:$0xff]  }
   0xe   : > { %s1785_s26 = sshll.u32 %s2536_s16, 5  ;;  %v2094_v44 = vld [vmem:[%s2531_s1 + $0xe0] sm:$0xff]   ;;  %v2096_v46 = vld [vmem:[%s2531_s1 + $0xe8] sm:$0xff]   ;;  %v2098_v48 = vld [vmem:[%s2531_s1 + $0xf0] sm:$0xff]  }
   0xf   : > { %s2209_s5 = scalar_lea.vmem %s2530_s0, %s1785_s26  ;;  %1872 = vmatpush3.bf16.msra.mxu0 %v2073_v5  ;;  %v2099_v49 = vld [vmem:[%s2531_s1 + $0xd8] sm:$0xff]   ;;  %v2101_v57 = vld [vmem:[%s2531_s1 + $0x100] sm:$0xff]   ;;  %v2103_v59 = vld [vmem:[%s2531_s1 + $0x108] sm:$0xff]  }
  0x10   : > { %v210_v8 = vld [vmem:[%s2209_s5 + $0x1] sm:$0xff]  ;;  %v211_v10 = vld [vmem:[%s2209_s5 + $0x9] sm:$0x3]  ;;  %1884 = vmatpush3.bf16.msra.mxu1 %v2074_v6  ;;  %1873 = vmatprep.subr.bf16.mxu0 %v2141_v1  ;;  %v442_v26 = vld [vmem:[%s2209_s5 + $0xb] sm:$0x3] }
  0x11   : > { %v199_v11 = vld [vmem:[%s2209_s5] sm:$0xff]  ;;  %v200_v12 = vld [vmem:[%s2209_s5 + $0x8] sm:$0x3]  ;;  %1885 = vmatprep.subr.bf16.mxu1 %v2141_v1  ;;  %v212_v13 = vpack.c.bf16 %v211_v10, %v210_v8  ;;  %v360_v23 = vld [vmem:[%s2209_s5 + $0xa] sm:$0x3] }
  0x12   : > { %v201_v14 = vpack.c.bf16 %v200_v12, %v199_v11  ;;  %v359_v22 = vld [vmem:[%s2209_s5 + $0x2] sm:$0xff]  ;;  %v524_v38 = vld [vmem:[%s2209_s5 + $0xd] sm:$0x3]  ;;  %v2100_v51 = vld [vmem:[%s2531_s1 + $0xf8] sm:$0xff]  }
  0x13   : > { %1874 = vmatpush3.bf16.msra.mxu0 %v2075_v7  ;;  %v441_v25 = vld [vmem:[%s2209_s5 + $0x3] sm:$0xff]  ;;  %v361_v27 = vpack.c.bf16 %v360_v23, %v359_v22  ;;  %v606_v40 = vld [vmem:[%s2209_s5 + $0xe] sm:$0x3]  ;;  %v770_v54 = vld [vmem:[%s2209_s5 + $0x10] sm:$0x3] }
  0x14   : > { %1886 = vmatpush3.bf16.msra.mxu1 %v2076_v9  ;;  %1891 = vmatprep.subr.bf16.mxu0 %v2141_v1  ;;  %v443_v28 = vpack.c.bf16 %v442_v26, %v441_v25  ;;  %v523_v36 = vld [vmem:[%s2209_s5 + $0x5] sm:$0xff]  ;;  %v688_v52 = vld [vmem:[%s2209_s5 + $0xf] sm:$0x3]  ;;  %v2107_v63 = vld [vmem:[%s2531_s1 + $0x118] sm:$0xff]  }
  0x15   : > { %1903 = vmatprep.subr.bf16.mxu1 %v2141_v1  ;;  %v605_v39 = vld [vmem:[%s2209_s5 + $0x6] sm:$0xff]  ;;  %v525_v41 = vpack.c.bf16 %v524_v38, %v523_v36  ;;  %v2105_v61 = vld [vmem:[%s2531_s1 + $0x110] sm:$0xff]   ;;  %v2108_v3 = vld [vmem:[%s2531_s1 + $0x138] sm:$0xff]  }
  0x16   : > { %1876 = vmatmul.mubr.msk.bf16.vlgmr.msra.gmra.mrb[0].mxu0 %vm246_vm1, %v212_v13  ;;  %v607_v42 = vpack.c.bf16 %v606_v40, %v605_v39  ;;  %v687_v50 = vld [vmem:[%s2209_s5 + $0x7] sm:$0xff]  ;;  %v2106_v62 = vld [vmem:[%s2531_s1 + $0x130] sm:$0xff]  }
  0x17   : > { %1888 = vmatmul.mubr.msk.bf16.vlgmr.msra.gmra.mrb[0].mxu1 %vm246_vm1, %v201_v14  ;;  %1892 = vmatpush3.bf16.msra.mxu0 %v2077_v15  ;;  %v769_v53 = vld [vmem:[%s2209_s5 + $0x8] sm:$0xff]  ;;  %v689_v55 = vpack.c.bf16 %v688_v52, %v687_v50  ;;  %v2102_v58 = vld [vmem:[%s2531_s1 + $0x120] sm:$0xff]   ;;  %v852_v2 = vld [vmem:[%s2209_s5 + $0x12] sm:$0x3] }
  0x18   : > { %1904 = vmatpush3.bf16.msra.mxu1 %v2078_v16  ;;  %1893 = vmatprep.subr.bf16.mxu0 %v2141_v1  ;;  %v771_v56 = vpack.c.bf16 %v770_v54, %v769_v53  ;;  %v2104_v60 = vld [vmem:[%s2531_s1 + $0x128] sm:$0xff]   ;;  %v934_v5 = vld [vmem:[%s2209_s5 + $0x13] sm:$0x3]  ;;  %v2109_v8 = vld [vmem:[%s2531_s1 + $0x140] sm:$0xff]  }
  0x19   : > { %1905 = vmatprep.subr.bf16.mxu1 %v2141_v1  ;;  %1899 = vmatprep.mubr.msk.bf16.mxu0 %vm2142_vm0, %v2141_v1  ;;  %v851_v0 = vld [vmem:[%s2209_s5 + $0xa] sm:$0xff]  ;;  %v2110_v9 = vld [vmem:[%s2531_s1 + $0x160] sm:$0xff]   ;;  %v2115_v14 = vld [vmem:[%s2531_s1 + $0x158] sm:$0xff]  }
  0x1a   : > { %1911 = vmatprep.mubr.msk.bf16.mxu1 %vm2142_vm0, %v2141_v1  ;;  %v933_v4 = vld [vmem:[%s2209_s5 + $0xb] sm:$0xff]  ;;  %v853_v6 = vpack.c.bf16 %v852_v2, %v851_v0  ;;  %v1016_v16 = vld [vmem:[%s2209_s5 + $0x14] sm:$0x3]  ;;  %v2117_v22 = vld [vmem:[%s2531_s1 + $0x180] sm:$0xff]  }
  0x1b   : > { %1894 = vmatpush3.bf16.msra.mxu0 %v2079_v17  ;;  %v935_v7 = vpack.c.bf16 %v934_v5, %v933_v4  ;;  %v2111_v10 = vld [vmem:[%s2531_s1 + $0x148] sm:$0xff]   ;;  %v2113_v12 = vld [vmem:[%s2531_s1 + $0x150] sm:$0xff]   ;;  %v2116_v17 = vld [vmem:[%s2531_s1 + $0x178] sm:$0xff]  }
  0x1c   : > { %1906 = vmatpush3.bf16.msra.mxu1 %v2080_v18  ;;  %1895 = vmatprep.subr.bf16.mxu0 %v2141_v1  ;;  %v2112_v11 = vld [vmem:[%s2531_s1 + $0x168] sm:$0xff]   ;;  %v2114_v13 = vld [vmem:[%s2531_s1 + $0x170] sm:$0xff]   ;;  %v2118_v23 = vld [vmem:[%s2531_s1 + $0x1a0] sm:$0xff]  }
  0x1d   : > { %1907 = vmatprep.subr.bf16.mxu1 %v2141_v1  ;;  %v1015_v15 = vld [vmem:[%s2209_s5 + $0xc] sm:$0xff]  ;;  %v2125_v36 = vld [vmem:[%s2531_s1 + $0x1c0] sm:$0xff]  }
  0x1e   : > { %v1097_v18 = vld [vmem:[%s2209_s5 + $0xd] sm:$0xff] }
  0x1f   : > { %1896 = vmatpush3.bf16.msra.mxu0 %v2081_v19  ;;  %v1098_v19 = vld [vmem:[%s2209_s5 + $0x15] sm:$0x3]  ;;  %v2120_v25 = vld [vmem:[%s2531_s1 + $0x1a8] sm:$0xff]  }
  0x20   : > { %1908 = vmatpush3.bf16.msra.mxu1 %v2082_v20  ;;  %1897 = vmatprep.subr.bf16.mxu0 %v2141_v1  ;;  %v1017_v20 = vpack.c.bf16 %v1016_v16, %v1015_v15  ;;  %v2121_v26 = vld [vmem:[%s2531_s1 + $0x190] sm:$0xff]   ;;  %v2127_v38 = vld [vmem:[%s2531_s1 + $0x1c8] sm:$0xff]  }
  0x21   : > { %1909 = vmatprep.subr.bf16.mxu1 %v2141_v1  ;;  %v2128_v39 = vld [vmem:[%s2531_s1 + $0x1e8] sm:$0xff]   ;;  %v2129_v40 = vld [vmem:[%s2531_s1 + $0x1d0] sm:$0xff]  }
  0x23   : > { %1898 = vmatpush3.bf16.msra.mxu0 %v2083_v21  ;;  %v1099_v21 = vpack.c.bf16 %v1098_v19, %v1097_v18 }
  0x24   : > { %1910 = vmatpush3.bf16.msra.mxu1 %v2084_v24  ;;  %1915 = vmatprep.subr.bf16.mxu0 %v2141_v1  ;;  %v2119_v24 = vld [vmem:[%s2531_s1 + $0x188] sm:$0xff]  }
  0x25   : > { %1927 = vmatprep.subr.bf16.mxu1 %v2141_v1 }
  0x26   : > { %1900 = vmatmul.mubr.msk.bf16.vlgmr.msra.gmra.mrb[4].mxu0 %vm246_vm1, %v361_v27  ;;  %v2122_v27 = vld [vmem:[%s2531_s1 + $0x1b0] sm:$0xff]  }
  0x27   : > { %1912 = vmatmul.mubr.msk.bf16.vlgmr.msra.gmra.mrb[4].mxu1 %vm246_vm1, %v443_v28  ;;  %1916 = vmatpush3.bf16.msra.mxu0 %v2085_v29  ;;  %v2123_v28 = vld [vmem:[%s2531_s1 + $0x198] sm:$0xff]   ;;  %v1179_v29 = vld [vmem:[%s2209_s5 + $0xf] sm:$0xff] }
  0x28   : > { %1928 = vmatpush3.bf16.msra.mxu1 %v2086_v30  ;;  %1917 = vmatprep.subr.bf16.mxu0 %v2141_v1  ;;  %v1180_v30 = vld [vmem:[%s2209_s5 + $0x17] sm:$0x3] }
  0x29   : > { %1929 = vmatprep.subr.bf16.mxu1 %v2141_v1  ;;  %1923 = vmatprep.mubr.msk.bf16.mxu0 %vm2142_vm0, %v2141_v1 }
  0x2a   : > { %1935 = vmatprep.mubr.msk.bf16.mxu1 %vm2142_vm0, %v2141_v1 }
  0x2b   : > { %1918 = vmatpush3.bf16.msra.mxu0 %v2087_v31  ;;  %v2124_v31 = vld [vmem:[%s2531_s1 + $0x1b8] sm:$0xff]  }
  0x2c   : > { %1930 = vmatpush3.bf16.msra.mxu1 %v2088_v32  ;;  %1919 = vmatprep.subr.bf16.mxu0 %v2141_v1  ;;  %v1261_v32 = vld [vmem:[%s2209_s5 + $0x10] sm:$0xff] }
  0x2d   : > { %1931 = vmatprep.subr.bf16.mxu1 %v2141_v1 }
  0x2f   : > { %1920 = vmatpush3.bf16.msra.mxu0 %v2089_v33  ;;  %v1262_v33 = vld [vmem:[%s2209_s5 + $0x18] sm:$0x3] }
  0x30   : > { %1932 = vmatpush3.bf16.msra.mxu1 %v2090_v34  ;;  %1921 = vmatprep.subr.bf16.mxu0 %v2141_v1  ;;  %v1181_v34 = vpack.c.bf16 %v1180_v30, %v1179_v29 }
  0x31   : > { %1933 = vmatprep.subr.bf16.mxu1 %v2141_v1 }
  0x33   : > { %1922 = vmatpush3.bf16.msra.mxu0 %v2091_v35  ;;  %v1263_v35 = vpack.c.bf16 %v1262_v33, %v1261_v32 }
  0x34   : > { %1934 = vmatpush3.bf16.msra.mxu1 %v2092_v37  ;;  %1939 = vmatprep.subr.bf16.mxu0 %v2141_v1  ;;  %v2126_v37 = vld [vmem:[%s2531_s1 + $0x1e0] sm:$0xff]  }
  0x35   : > { %1951 = vmatprep.subr.bf16.mxu1 %v2141_v1 }
  0x36   : > { %1924 = vmatmul.mubr.msk.bf16.vlgmr.msra.gmra.mrb[8].mxu0 %vm246_vm1, %v525_v41  ;;  %v2130_v41 = vld [vmem:[%s2531_s1 + $0x1f0] sm:$0xff]  }
  0x37   : > { %1936 = vmatmul.mubr.msk.bf16.vlgmr.msra.gmra.mrb[8].mxu1 %vm246_vm1, %v607_v42  ;;  %1940 = vmatpush3.bf16.msra.mxu0 %v2093_v43  ;;  %v2131_v42 = vld [vmem:[%s2531_s1 + $0x1d8] sm:$0xff]  }
  0x38   : > { %1952 = vmatpush3.bf16.msra.mxu1 %v2094_v44  ;;  %1941 = vmatprep.subr.bf16.mxu0 %v2141_v1  ;;  %v1343_v43 = vld [vmem:[%s2209_s5 + $0x11] sm:$0xff]  ;;  %v1344_v44 = vld [vmem:[%s2209_s5 + $0x19] sm:$0x3] }
  0x39   : > { %1953 = vmatprep.subr.bf16.mxu1 %v2141_v1  ;;  %1947 = vmatprep.mubr.msk.bf16.mxu0 %vm2142_vm0, %v2141_v1 }
  0x3a   : > { %1959 = vmatprep.mubr.msk.bf16.mxu1 %vm2142_vm0, %v2141_v1 }
  0x3b   : > { %1942 = vmatpush3.bf16.msra.mxu0 %v2095_v45  ;;  %v2132_v45 = vld [vmem:[%s2531_s1 + $0x1f8] sm:$0xff]  }
  0x3c   : > { %1954 = vmatpush3.bf16.msra.mxu1 %v2096_v46  ;;  %1943 = vmatprep.subr.bf16.mxu0 %v2141_v1  ;;  %v1425_v46 = vld [vmem:[%s2209_s5 + $0x12] sm:$0xff] }
  0x3d   : > { %1955 = vmatprep.subr.bf16.mxu1 %v2141_v1 }
  0x3f   : > { %1944 = vmatpush3.bf16.msra.mxu0 %v2097_v47  ;;  %v1426_v47 = vld [vmem:[%s2209_s5 + $0x1a] sm:$0x3]  ;;  %s1786_s5 = sshll.u32 %s2536_s16, 4 }
  0x40   : > { %1956 = vmatpush3.bf16.msra.mxu1 %v2098_v48  ;;  %1945 = vmatprep.subr.bf16.mxu0 %v2141_v1  ;;  %v1345_v48 = vpack.c.bf16 %v1344_v44, %v1343_v43  ;;  %s197_s6 = scalar_lea.vmem %s2534_s4, %s1786_s5 }
  0x41   : > { %1957 = vmatprep.subr.bf16.mxu1 %v2141_v1 }
  0x43   : > { %1946 = vmatpush3.bf16.msra.mxu0 %v2099_v49  ;;  %v1427_v49 = vpack.c.bf16 %v1426_v47, %v1425_v46 }
  0x44   : > { %1958 = vmatpush3.bf16.msra.mxu1 %v2100_v51  ;;  %1963 = vmatprep.subr.bf16.mxu0 %v2141_v1 }
  0x45   : > { %1975 = vmatprep.subr.bf16.mxu1 %v2141_v1 }
  0x46   : > { %1948 = vmatmul.mubr.msk.bf16.vlgmr.msra.gmra.mrb[12].mxu0 %vm246_vm1, %v689_v55 }
  0x47   : > { %1960 = vmatmul.mubr.msk.bf16.vlgmr.msra.gmra.mrb[12].mxu1 %vm246_vm1, %v771_v56  ;;  %1964 = vmatpush3.bf16.msra.mxu0 %v2101_v57 }
  0x48   : > { %1976 = vmatpush3.bf16.msra.mxu1 %v2102_v58  ;;  %1965 = vmatprep.subr.bf16.mxu0 %v2141_v1 }
  0x49   : > { %1977 = vmatprep.subr.bf16.mxu1 %v2141_v1  ;;  %1971 = vmatprep.mubr.msk.bf16.mxu0 %vm2142_vm0, %v2141_v1 }
  0x4a   : > { %1983 = vmatprep.mubr.msk.bf16.mxu1 %vm2142_vm0, %v2141_v1 }
  0x4b   : > { %1966 = vmatpush3.bf16.msra.mxu0 %v2103_v59 }
  0x4c   : > { %1978 = vmatpush3.bf16.msra.mxu1 %v2104_v60  ;;  %1967 = vmatprep.subr.bf16.mxu0 %v2141_v1 }
  0x4d   : > { %1979 = vmatprep.subr.bf16.mxu1 %v2141_v1 }
  0x4f   : > { %1968 = vmatpush3.bf16.msra.mxu0 %v2105_v61 }
  0x50   : > { %1980 = vmatpush3.bf16.msra.mxu1 %v2106_v62  ;;  %1969 = vmatprep.subr.bf16.mxu0 %v2141_v1 }
  0x51   : > { %1981 = vmatprep.subr.bf16.mxu1 %v2141_v1 }
  0x53   : > { %1970 = vmatpush3.bf16.msra.mxu0 %v2107_v63 }
  0x54   : > { %1982 = vmatpush3.bf16.msra.mxu1 %v2108_v3  ;;  %1987 = vmatprep.subr.bf16.mxu0 %v2141_v1 }
  0x55   : > { %1999 = vmatprep.subr.bf16.mxu1 %v2141_v1 }
  0x56   : > { %1972 = vmatmul.mubr.msk.bf16.vlgmr.msra.gmra.mrb[16].mxu0 %vm246_vm1, %v853_v6 }
  0x57   : > { %1984 = vmatmul.mubr.msk.bf16.vlgmr.msra.gmra.mrb[16].mxu1 %vm246_vm1, %v935_v7  ;;  %1988 = vmatpush3.bf16.msra.mxu0 %v2109_v8 }
  0x58   : > { %2000 = vmatpush3.bf16.msra.mxu1 %v2110_v9  ;;  %1989 = vmatprep.subr.bf16.mxu0 %v2141_v1 }
  0x59   : > { %2001 = vmatprep.subr.bf16.mxu1 %v2141_v1  ;;  %1995 = vmatprep.mubr.msk.bf16.mxu0 %vm2142_vm0, %v2141_v1 }
  0x5a   : > { %2007 = vmatprep.mubr.msk.bf16.mxu1 %vm2142_vm0, %v2141_v1 }
  0x5b   : > { %1990 = vmatpush3.bf16.msra.mxu0 %v2111_v10 }
  0x5c   : > { %2002 = vmatpush3.bf16.msra.mxu1 %v2112_v11  ;;  %1991 = vmatprep.subr.bf16.mxu0 %v2141_v1 }
  0x5d   : > { %2003 = vmatprep.subr.bf16.mxu1 %v2141_v1 }
  0x5f   : > { %1992 = vmatpush3.bf16.msra.mxu0 %v2113_v12 }
  0x60   : > { %2004 = vmatpush3.bf16.msra.mxu1 %v2114_v13  ;;  %1993 = vmatprep.subr.bf16.mxu0 %v2141_v1 }
  0x61   : > { %2005 = vmatprep.subr.bf16.mxu1 %v2141_v1 }
  0x63   : > { %1994 = vmatpush3.bf16.msra.mxu0 %v2115_v14 }
  0x64   : > { %2006 = vmatpush3.bf16.msra.mxu1 %v2116_v17  ;;  %2011 = vmatprep.subr.bf16.mxu0 %v2141_v1 }
  0x65   : > { %2023 = vmatprep.subr.bf16.mxu1 %v2141_v1 }
  0x66   : > { %1996 = vmatmul.mubr.msk.bf16.vlgmr.msra.gmra.mrb[20].mxu0 %vm246_vm1, %v1017_v20 }
  0x67   : > { %2008 = vmatmul.mubr.msk.bf16.vlgmr.msra.gmra.mrb[20].mxu1 %vm246_vm1, %v1099_v21  ;;  %2012 = vmatpush3.bf16.msra.mxu0 %v2117_v22 }
  0x68   : > { %2024 = vmatpush3.bf16.msra.mxu1 %v2118_v23  ;;  %2013 = vmatprep.subr.bf16.mxu0 %v2141_v1 }
  0x69   : > { %2025 = vmatprep.subr.bf16.mxu1 %v2141_v1  ;;  %2019 = vmatprep.mubr.msk.bf16.mxu0 %vm2142_vm0, %v2141_v1 }
  0x6a   : > { %2031 = vmatprep.mubr.msk.bf16.mxu1 %vm2142_vm0, %v2141_v1 }
  0x6b   : > { %2014 = vmatpush3.bf16.msra.mxu0 %v2119_v24 }
  0x6c   : > { %2026 = vmatpush3.bf16.msra.mxu1 %v2120_v25  ;;  %2015 = vmatprep.subr.bf16.mxu0 %v2141_v1 }
  0x6d   : > { %2027 = vmatprep.subr.bf16.mxu1 %v2141_v1 }
  0x6f   : > { %2016 = vmatpush3.bf16.msra.mxu0 %v2121_v26 }
  0x70   : > { %2028 = vmatpush3.bf16.msra.mxu1 %v2122_v27  ;;  %2017 = vmatprep.subr.bf16.mxu0 %v2141_v1 }
  0x71   : > { %2029 = vmatprep.subr.bf16.mxu1 %v2141_v1 }
  0x73   : > { %2018 = vmatpush3.bf16.msra.mxu0 %v2123_v28 }
  0x74   : > { %2030 = vmatpush3.bf16.msra.mxu1 %v2124_v31  ;;  %2035 = vmatprep.subr.bf16.mxu0 %v2141_v1 }
  0x75   : > { %2047 = vmatprep.subr.bf16.mxu1 %v2141_v1 }
  0x76   : > { %2020 = vmatmul.mubr.msk.bf16.vlgmr.msra.gmra.mrb[24].mxu0 %vm246_vm1, %v1181_v34 }
  0x77   : > { %2032 = vmatmul.mubr.msk.bf16.vlgmr.msra.gmra.mrb[24].mxu1 %vm246_vm1, %v1263_v35  ;;  %2036 = vmatpush3.bf16.msra.mxu0 %v2125_v36 }
  0x78   : > { %2048 = vmatpush3.bf16.msra.mxu1 %v2126_v37  ;;  %2037 = vmatprep.subr.bf16.mxu0 %v2141_v1 }
  0x79   : > { %2049 = vmatprep.subr.bf16.mxu1 %v2141_v1  ;;  %2043 = vmatprep.mubr.msk.bf16.mxu0 %vm2142_vm0, %v2141_v1 }
  0x7a   : > { %2055 = vmatprep.mubr.msk.bf16.mxu1 %vm2142_vm0, %v2141_v1 }
  0x7b   : > { %2038 = vmatpush3.bf16.msra.mxu0 %v2127_v38 }
  0x7c   : > { %2050 = vmatpush3.bf16.msra.mxu1 %v2128_v39  ;;  %2039 = vmatprep.subr.bf16.mxu0 %v2141_v1 }
  0x7d   : > { %2051 = vmatprep.subr.bf16.mxu1 %v2141_v1 }
  0x7f   : > { %2040 = vmatpush3.bf16.msra.mxu0 %v2129_v40 }
  0x80   : > { %2052 = vmatpush3.bf16.msra.mxu1 %v2130_v41  ;;  %2041 = vmatprep.subr.bf16.mxu0 %v2141_v1 }
  0x81   : > { %2053 = vmatprep.subr.bf16.mxu1 %v2141_v1 }
  0x83   : > { %2042 = vmatpush3.bf16.msra.mxu0 %v2131_v42 }
  0x84   : > { %2054 = vmatpush3.bf16.msra.mxu1 %v2132_v45 }
  0x86   : > { %2044 = vmatmul.mubr.msk.bf16.vlgmr.msra.gmra.mrb[28].mxu0 %vm246_vm1, %v1345_v48 }
  0x87   : > { %2056 = vmatmul.mubr.msk.bf16.vlgmr.msra.gmra.mrb[28].mxu1 %vm246_vm1, %v1427_v49 }
  0xe9   : > { %v284_v50 = vpop.f32.mrb[0].mxu0 }
  0xea   : > { %v352_v51 = vpop.f32.mrb[0].mxu1  ;;  %v1877_v52 = vpop.f32.mrb[1].mxu0 }
  0xeb   : > { %v353_v53 = vadd.f32 %v352_v51, %v284_v50  ;;  %v1889_v54 = vpop.f32.mrb[1].mxu1  ;;  %v287_v55 = vpop.f32.mrb[2].mxu0 }
  0xec   : > { %v355_v56 = vpop.f32.mrb[2].mxu1  ;;  %v1878_v57 = vpop.f32.mrb[3].mxu0 }
  0xed   : > { %v356_v58 = vadd.f32 %v355_v56, %v287_v55  ;;  %v1890_v59 = vpop.f32.mrb[3].mxu1 }
  0xf9   : > { %v432_v60 = vpop.f32.mrb[4].mxu0 }
  0xfa   : > { %v439_v1 = vadd.f32 %v432_v60, %v353_v53  ;;  %v514_v61 = vpop.f32.mrb[4].mxu1  ;;  %v1901_v62 = vpop.f32.mrb[5].mxu0 }
  0xfb   : > { %v1913_v63 = vpop.f32.mrb[5].mxu1  ;;  %v435_v0 = vpop.f32.mrb[6].mxu0 }
  0xfc   : > { %v521_v2 = vadd.f32 %v514_v61, %v439_v1  ;;  %v440_v3 = vadd.f32 %v435_v0, %v356_v58  ;;  %v517_v4 = vpop.f32.mrb[6].mxu1  ;;  %v1902_v5 = vpop.f32.mrb[7].mxu0 }
  0xfd   : > { %v1914_v6 = vpop.f32.mrb[7].mxu1 }
  0xfe   : > { %v522_v7 = vadd.f32 %v517_v4, %v440_v3 }
 0x109   : > { %v596_v8 = vpop.f32.mrb[8].mxu0 }
 0x10a   : > { %v603_v9 = vadd.f32 %v596_v8, %v521_v2  ;;  %v678_v10 = vpop.f32.mrb[8].mxu1  ;;  %v1925_v11 = vpop.f32.mrb[9].mxu0  ;;  %v1782_v8 = vld [vmem:[%s2532_s2] ss:$0 sm:$0xff] }
 0x10b   : > { %v1937_v12 = vpop.f32.mrb[9].mxu1  ;;  %v599_v13 = vpop.f32.mrb[10].mxu0 }
 0x10c   : > { %v685_v14 = vadd.f32 %v678_v10, %v603_v9  ;;  %v604_v15 = vadd.f32 %v599_v13, %v522_v7  ;;  %v681_v16 = vpop.f32.mrb[10].mxu1  ;;  %v1926_v17 = vpop.f32.mrb[11].mxu0 }
 0x10d   : > { %v1938_v18 = vpop.f32.mrb[11].mxu1 }
 0x10e   : > { %v686_v19 = vadd.f32 %v681_v16, %v604_v15 }
 0x119   : > { %v760_v20 = vpop.f32.mrb[12].mxu0 }
 0x11a   : > { %v767_v21 = vadd.f32 %v760_v20, %v685_v14  ;;  %v842_v22 = vpop.f32.mrb[12].mxu1  ;;  %v1949_v23 = vpop.f32.mrb[13].mxu0 }
 0x11b   : > { %v1961_v24 = vpop.f32.mrb[13].mxu1  ;;  %v763_v25 = vpop.f32.mrb[14].mxu0 }
 0x11c   : > { %v849_v26 = vadd.f32 %v842_v22, %v767_v21  ;;  %v768_v27 = vadd.f32 %v763_v25, %v686_v19  ;;  %v845_v28 = vpop.f32.mrb[14].mxu1  ;;  %v1950_v29 = vpop.f32.mrb[15].mxu0 }
 0x11d   : > { %v1962_v30 = vpop.f32.mrb[15].mxu1 }
 0x11e   : > { %v850_v31 = vadd.f32 %v845_v28, %v768_v27 }
 0x129   : > { %v924_v32 = vpop.f32.mrb[16].mxu0 }
 0x12a   : > { %v931_v33 = vadd.f32 %v924_v32, %v849_v26  ;;  %v1006_v34 = vpop.f32.mrb[16].mxu1  ;;  %v1973_v35 = vpop.f32.mrb[17].mxu0 }
 0x12b   : > { %v1985_v36 = vpop.f32.mrb[17].mxu1  ;;  %v927_v37 = vpop.f32.mrb[18].mxu0 }
 0x12c   : > { %v1013_v38 = vadd.f32 %v1006_v34, %v931_v33  ;;  %v932_v39 = vadd.f32 %v927_v37, %v850_v31  ;;  %v1009_v40 = vpop.f32.mrb[18].mxu1  ;;  %v1974_v41 = vpop.f32.mrb[19].mxu0 }
 0x12d   : > { %v1986_v42 = vpop.f32.mrb[19].mxu1 }
 0x12e   : > { %v1014_v43 = vadd.f32 %v1009_v40, %v932_v39 }
 0x139   : > { %v1088_v44 = vpop.f32.mrb[20].mxu0 }
 0x13a   : > { %v1095_v45 = vadd.f32 %v1088_v44, %v1013_v38  ;;  %v1170_v46 = vpop.f32.mrb[20].mxu1  ;;  %v1997_v47 = vpop.f32.mrb[21].mxu0 }
 0x13b   : > { %v2009_v48 = vpop.f32.mrb[21].mxu1  ;;  %v1091_v49 = vpop.f32.mrb[22].mxu0 }
 0x13c   : > { %v1177_v50 = vadd.f32 %v1170_v46, %v1095_v45  ;;  %v1096_v51 = vadd.f32 %v1091_v49, %v1014_v43  ;;  %v1173_v52 = vpop.f32.mrb[22].mxu1  ;;  %v1998_v53 = vpop.f32.mrb[23].mxu0 }
 0x13d   : > { %v2010_v54 = vpop.f32.mrb[23].mxu1 }
 0x13e   : > { %v1178_v55 = vadd.f32 %v1173_v52, %v1096_v51 }
 0x149   : > { %v1252_v56 = vpop.f32.mrb[24].mxu0 }
 0x14a   : > { %v1259_v57 = vadd.f32 %v1252_v56, %v1177_v50  ;;  %v1334_v58 = vpop.f32.mrb[24].mxu1  ;;  %v2021_v59 = vpop.f32.mrb[25].mxu0 }
 0x14b   : > { %v2033_v60 = vpop.f32.mrb[25].mxu1  ;;  %v1255_v1 = vpop.f32.mrb[26].mxu0 }
 0x14c   : > { %v1341_v61 = vadd.f32 %v1334_v58, %v1259_v57  ;;  %v1260_v62 = vadd.f32 %v1255_v1, %v1178_v55  ;;  %v1337_v63 = vpop.f32.mrb[26].mxu1  ;;  %v2022_v0 = vpop.f32.mrb[27].mxu0 }
 0x14d   : > { %v2034_v2 = vpop.f32.mrb[27].mxu1 }
 0x14e   : > { %v1342_v3 = vadd.f32 %v1337_v63, %v1260_v62 }
 0x159   : > { %v1416_v4 = vpop.f32.mrb[28].mxu0 }
 0x15a   : > { %v1423_v5 = vadd.f32 %v1416_v4, %v1341_v61  ;;  %v1498_v6 = vpop.f32.mrb[28].mxu1  ;;  %v2045_v7 = vpop.f32.mrb[29].mxu0 }
 0x15b   : > { %v2057_v9 = vpop.f32.mrb[29].mxu1  ;;  %v1419_v10 = vpop.f32.mrb[30].mxu0 }
 0x15c   : > { %v1505_v11 = vadd.f32 %v1498_v6, %v1423_v5  ;;  %v1424_v12 = vadd.f32 %v1419_v10, %v1342_v3  ;;  %v1501_v13 = vpop.f32.mrb[30].mxu1  ;;  %v2046_v14 = vpop.f32.mrb[31].mxu0 }
 0x15d   : > { %v2058_v15 = vpop.f32.mrb[31].mxu1 }
 0x15e   : > { %v1514_v16 = vadd.f32 %v1782_v8, %v1505_v11  ;;  %v1506_v17 = vadd.f32 %v1501_v13, %v1424_v12 }
 0x160   : > { %1516 = vst [vmem:[%s197_s6] sm:$0xff] %v1514_v16  ;;  %v1515_v18 = vadd.f32 %v1782_v8, %v1506_v17 }
 0x162   : > { %1517 = vst [vmem:[%s197_s6 + $0x8] sm:$0x3] %v1515_v18 }
 0x163 PF: > { %s14_s15 = sadd.s32 1, %s2139_s15  }
 0x164   : > { %p11_p4 = scmp.ge.s32.totalorder %s14_s15, 4  }
 0x166   :  { %13 = sbr.rel (!%p11_p4) target bundleno = 1 (0x1), region = 81 }

</bundles_post_ra>
